<compile_context>
chip_gen: v7x
topology: tpu7x:2x2x1
jax: 0.10.0
libtpu: 0.0.40
codegen_flags: <defaults>
</compile_context>

<pallas_src>
import functools

import jax
import jax.numpy as jnp
from jax import lax
from jax.experimental import pallas as pl
from jax.experimental.pallas import tpu as pltpu


def _fused_cnn_kernel(x_ref, w1_ref, b1_ref, w2s_ref, b2_ref, w3_ref, b3_ref,
                      o_ref, h1s_ref, h2_ref, *, L, C, bn, use_bf16):
    """One grid step: `bn` independent rows of (lane-padded) length Lp.

    x_ref  : (bn, Lp)      f32 input rows, L on lanes
    w1_ref : (3, C, 1)     layer-1 weight  w1[k, c, 0]
    b1_ref : (C, 1)
    w2s_ref: (C, 3C)       tap-stacked layer-2 weight  w2s[d, k*C + c]
    b2_ref : (C, 1)
    w3_ref : (3, C, 1)     layer-3 weight  w3[k, c, 0]
    b3_ref : (1, 1)
    o_ref  : (bn, Lp)      f32 output rows, lane-dense
    h1s_ref: (bn, 3C, Lp)  tap-stacked shifted layer-1 activations (bf16/f32)
    h2_ref : (bn, C, Lp)   layer-2 activations (f32)
    """
    f32 = jnp.float32
    Lp = x_ref.shape[-1]

    def shifted(v, s):
        # result[..., l] = v[..., l - s], zero-filled at the wrapped lane (s in {-1,0,1}).
        if s == 0:
            return v
        r = pltpu.roll(v.reshape(-1, Lp), s % Lp, axis=1).reshape(v.shape)
        lane = lax.broadcasted_iota(jnp.int32, v.shape, v.ndim - 1)
        keep = lane >= s if s > 0 else lane < Lp + s
        return jnp.where(keep, r, 0.0)

    def mask_tail(v):
        # Zero the lane-padding region l >= L so conv zero-padding semantics hold.
        if Lp == L:
            return v
        lane = lax.broadcasted_iota(jnp.int32, v.shape, v.ndim - 1)
        return jnp.where(lane < L, v, 0.0)

    # ---- layer 1: Conv1d(1 -> C) + ReLU.  Pure VPU broadcast MAC. ----------
    x = x_ref[...].astype(f32)                                # (bn, Lp)
    acc1 = jnp.broadcast_to(b1_ref[...][None, :, :], (bn, C, Lp))
    for k in range(3):
        xk = shifted(x, 1 - k)                                # x[l + k - 1]
        acc1 = acc1 + (jnp.broadcast_to(xk[:, None, :], (bn, C, Lp)) *
                       jnp.broadcast_to(w1_ref[k][None, :, :], (bn, C, Lp)))
    h1 = mask_tail(jnp.maximum(acc1, 0.0))
    # Store the three shifted tap copies -> layer 2 becomes one K=3C matmul.
    for k in range(3):
        h1s_ref[:, k * C:(k + 1) * C, :] = shifted(h1, 1 - k).astype(h1s_ref.dtype)

    # ---- layer 2: Conv1d(C -> C) + ReLU.  One (C,3C)@(3C,Lp) MXU matmul per
    # batch row (K=192), bf16 operands by default, f32 accumulation, weight is
    # never broadcast over the batch. -----------------------------------------
    w2s = w2s_ref[...]
    b2 = b2_ref[...]
    prec = None if use_bf16 else lax.Precision.HIGHEST
    for b in range(bn):
        y = jnp.dot(w2s, h1s_ref[b], precision=prec,
                    preferred_element_type=f32)               # (C, Lp) f32
        h2_ref[b] = mask_tail(jnp.maximum(y + b2, 0.0))

    # ---- layer 3: Conv1d(C -> 1).  VPU multiply + sublane reduce: result is
    # already a lane-dense (bn, Lp) tile, no M=1 matmul, no transpose. --------
    h2 = h2_ref[...]
    acc3 = None
    for k in range(3):
        term = shifted(h2, 1 - k) * jnp.broadcast_to(w3_ref[k][None, :, :],
                                                     (bn, C, Lp))
        acc3 = term if acc3 is None else acc3 + term
    out = jnp.sum(acc3, axis=1) + jnp.broadcast_to(b3_ref[...], (bn, Lp))
    o_ref[...] = out.astype(o_ref.dtype)


def _pick_bn(N):
    # Block's second-to-last dim must be a multiple of 8 or equal the full dim.
    # bn=8 keeps scratch small and gives N/8 pipelined (megacore-parallel) steps.
    return 8 if (N % 8 == 0) else N


def _vmem_limit_bytes(bn, C, Lp, act_bytes):
    slab = bn * C * Lp * 4                       # one (bn, C, Lp) f32 slab
    est = (2 * 2 * bn * Lp * 4                   # double-buffered x / out blocks
           + (2 << 20)                           # weights + misc
           + 3 * bn * C * Lp * act_bytes         # tap-stacked h1 scratch
           + slab                                # h2 scratch
           + 3 * slab)                           # headroom for value temporaries
    return int(min(max(2 * est, 32 << 20), 96 << 20))


@functools.partial(jax.jit, static_argnames=("use_bf16",))
def residual_cnn_forward(x_ncl, params, use_bf16=True):
    """x_ncl: (N, 1, L) like the PyTorch module; returns (N, 1, L) f32."""
    N, _, L = x_ncl.shape
    C = params["b1"].shape[0]
    Lp = max(128, -(-L // 128) * 128)            # lane-dense length
    bn = _pick_bn(N)
    assert N % bn == 0
    # TODO(synk): for very long L (Lp*C*bn beyond the VMEM budget, esp. v7x's
    # 64 MiB), tile L across a second grid axis with a 1-element halo.

    x2d = x_ncl.reshape(N, L).astype(jnp.float32)
    if Lp != L:
        x2d = jnp.pad(x2d, ((0, 0), (0, Lp - L)))

    act_dtype = jnp.bfloat16 if use_bf16 else jnp.float32
    # Kernel-side weight layouts (tiny host-side transposes, done once).
    w1k = jnp.transpose(params["w1"], (2, 0, 1))                     # (3, C, 1)
    b1k = params["b1"].reshape(C, 1)
    w2s = jnp.transpose(params["w2"], (0, 2, 1)).reshape(C, 3 * C)   # (C, 3C)
    w2s = w2s.astype(act_dtype)                                      # cast once
    b2k = params["b2"].reshape(C, 1)
    w3k = jnp.transpose(params["w3"], (2, 1, 0))                     # (3, C, 1)
    b3k = params["b3"].reshape(1, 1)

    kernel = functools.partial(_fused_cnn_kernel, L=L, C=C, bn=bn,
                               use_bf16=use_bf16)
    out2d = pl.pallas_call(
        kernel,
        out_shape=jax.ShapeDtypeStruct((N, Lp), jnp.float32),
        grid=(N // bn,),
        in_specs=[
            pl.BlockSpec((bn, Lp), lambda n: (n, 0)),           # x rows
            pl.BlockSpec((3, C, 1), lambda n: (0, 0, 0)),       # weights: constant
            pl.BlockSpec((C, 1), lambda n: (0, 0)),             # index -> fetched
            pl.BlockSpec((C, 3 * C), lambda n: (0, 0)),         # once, VMEM-resident
            pl.BlockSpec((C, 1), lambda n: (0, 0)),
            pl.BlockSpec((3, C, 1), lambda n: (0, 0, 0)),
            pl.BlockSpec((1, 1), lambda n: (0, 0)),
        ],
        out_specs=pl.BlockSpec((bn, Lp), lambda n: (n, 0)),
        scratch_shapes=[
            pltpu.VMEM((bn, 3 * C, Lp), act_dtype),   # tap-stacked, shifted h1
            pltpu.VMEM((bn, C, Lp), jnp.float32),     # h2
        ],
        compiler_params=pltpu.CompilerParams(
            dimension_semantics=("parallel",),
            vmem_limit_bytes=_vmem_limit_bytes(bn, C, Lp,
                                               2 if use_bf16 else 4)),
    )(x2d, w1k, b1k, w2s, b2k, w3k, b3k)

    return out2d[:, :L].reshape(N, 1, L)


def init_params(key, hidden=64):
    """PyTorch-layout Conv1d params with PyTorch default init ranges."""
    ks = jax.random.split(key, 6)

    def u(k, shape, fan_in):
        bound = (fan_in * 3.0) ** -0.5
        return jax.random.uniform(k, shape, jnp.float32, -bound, bound)

    return {
        "w1": u(ks[0], (hidden, 1, 3), 1),            # (Cout, Cin, K)
        "b1": u(ks[1], (hidden,), 1),
        "w2": u(ks[2], (hidden, hidden, 3), hidden),
        "b2": u(ks[3], (hidden,), hidden),
        "w3": u(ks[4], (1, hidden, 3), hidden),
        "b3": u(ks[5], (1,), hidden),
    }


def reference_forward(x_ncl, params):
    """Pure-JAX reference using lax.conv_general_dilated (full f32 precision)."""
    def conv(x, w, b, relu):
        y = lax.conv_general_dilated(
            x, w, window_strides=(1,), padding=[(1, 1)],
            dimension_numbers=("NCH", "OIH", "NCH"),
            precision=lax.Precision.HIGHEST)
        y = y + b[None, :, None]
        return jnp.maximum(y, 0.0) if relu else y

    h = conv(x_ncl, params["w1"], params["b1"], True)
    h = conv(h, params["w2"], params["b2"], True)
    return conv(h, params["w3"], params["b3"], False)


if __name__ == "__main__":
    key = jax.random.PRNGKey(0)
    k_x, k_p = jax.random.split(key)
    params = init_params(k_p, hidden=64)

    # Small shape (exercises the lane-padding / tail-mask path), exact f32 MXU.
    x_small = jax.random.normal(k_x, (2, 1, 16), jnp.float32)
    out_small = jax.block_until_ready(
        residual_cnn_forward(x_small, params, use_bf16=False))
    ref_small = reference_forward(x_small, params)
    assert out_small.shape == (2, 1, 16), out_small.shape
    err_small = float(jnp.max(jnp.abs(out_small - ref_small)))
    assert jnp.allclose(out_small, ref_small, atol=1e-4, rtol=1e-4), err_small

    # Multi-step grid (bn=8, 2 steps) with the default bf16 MXU operands.
    x_big = jax.random.normal(jax.random.PRNGKey(1), (16, 1, 256), jnp.float32)
    out_big = jax.block_until_ready(
        residual_cnn_forward(x_big, params, use_bf16=True))
    ref_big = reference_forward(x_big, params)
    assert out_big.shape == (16, 1, 256), out_big.shape
    err_big = float(jnp.max(jnp.abs(out_big - ref_big)))
    assert jnp.allclose(out_big, ref_big, atol=3e-2, rtol=3e-2), err_big

    print("KERNEL_OK")
</pallas_src>

<mosaic_0001>
module attributes {stable_mosaic.version = 11 : i64} {
  func.func @_fused_cnn_kernel(%arg0: i32, %arg1: memref<2x128xf32, #tpu.memory_space<vmem>>, %arg2: memref<3x64x1xf32, #tpu.memory_space<vmem>>, %arg3: memref<64x1xf32, #tpu.memory_space<vmem>>, %arg4: memref<64x192xf32, #tpu.memory_space<vmem>>, %arg5: memref<64x1xf32, #tpu.memory_space<vmem>>, %arg6: memref<3x64x1xf32, #tpu.memory_space<vmem>>, %arg7: memref<1x1xf32, #tpu.memory_space<vmem>>, %arg8: memref<2x128xf32, #tpu.memory_space<vmem>>, %arg9: memref<2x192x128xf32, #tpu.memory_space<vmem>>, %arg10: memref<2x64x128xf32, #tpu.memory_space<vmem>>) attributes {dimension_semantics = [#tpu.dimension_semantics<parallel>], iteration_bounds = array<i64: 1>, scalar_prefetch = 0 : i64, scratch_operands = 2 : i64, tpu.core_type = #tpu.core_type<tc>, window_params = [{transform_indices = @transform_0, window_bounds = array<i64: 2, 128>}, {pipeline_mode = #tpu.pipeline_mode<synchronous>, transform_indices = @transform_1, window_bounds = array<i64: 3, 64, 1>}, {pipeline_mode = #tpu.pipeline_mode<synchronous>, transform_indices = @transform_2, window_bounds = array<i64: 64, 1>}, {pipeline_mode = #tpu.pipeline_mode<synchronous>, transform_indices = @transform_3, window_bounds = array<i64: 64, 192>}, {pipeline_mode = #tpu.pipeline_mode<synchronous>, transform_indices = @transform_4, window_bounds = array<i64: 64, 1>}, {pipeline_mode = #tpu.pipeline_mode<synchronous>, transform_indices = @transform_5, window_bounds = array<i64: 3, 64, 1>}, {pipeline_mode = #tpu.pipeline_mode<synchronous>, transform_indices = @transform_6, window_bounds = array<i64: 1, 1>}, {transform_indices = @transform_7, window_bounds = array<i64: 2, 128>}]} {
    %c0 = arith.constant 0 : index
    %c0_0 = arith.constant 0 : index
    %0 = vector.load %arg1[%c0, %c0_0] : memref<2x128xf32, #tpu.memory_space<vmem>>, vector<2x128xf32>
    %c0_1 = arith.constant 0 : index
    %c0_2 = arith.constant 0 : index
    %1 = vector.load %arg3[%c0_1, %c0_2] : memref<64x1xf32, #tpu.memory_space<vmem>>, vector<64x1xf32>
    %2 = vector.shape_cast %1 : vector<64x1xf32> to vector<1x64x1xf32>
    %3 = vector.shape_cast %2 : vector<1x64x1xf32> to vector<1x64x1xf32>
    %4 = vector.broadcast %3 : vector<1x64x1xf32> to vector<2x64x128xf32>
    %c1_i32 = arith.constant 1 : i32
    %5 = tpu.dynamic_rotate %0 by %c1_i32 dim 1 : vector<2x128xf32>, i32 -> vector<2x128xf32>
    %6 = tpu.iota {dimensions = array<i32: 1>} : vector<2x128xi32>
    %c1_i32_3 = arith.constant 1 : i32
    %7 = vector.broadcast %c1_i32_3 : i32 to vector<2x128xi32>
    %8 = arith.cmpi sge, %6, %7 : vector<2x128xi32>
    %cst = arith.constant 0.000000e+00 : f32
    %9 = vector.broadcast %cst : f32 to vector<2x128xf32>
    %10 = arith.select %8, %5, %9 : vector<2x128xi1>, vector<2x128xf32>
    %11 = vector.shape_cast %10 : vector<2x128xf32> to vector<2x1x128xf32>
    %12 = vector.shape_cast %11 : vector<2x1x128xf32> to vector<2x1x128xf32>
    %13 = vector.broadcast %12 : vector<2x1x128xf32> to vector<2x64x128xf32>
    %c0_4 = arith.constant 0 : index
    %c0_5 = arith.constant 0 : index
    %c0_6 = arith.constant 0 : index
    %14 = vector.load %arg2[%c0_4, %c0_5, %c0_6] : memref<3x64x1xf32, #tpu.memory_space<vmem>>, vector<1x64x1xf32>
    %15 = vector.shape_cast %14 : vector<1x64x1xf32> to vector<64x1xf32>
    %16 = vector.shape_cast %15 : vector<64x1xf32> to vector<1x64x1xf32>
    %17 = vector.shape_cast %16 : vector<1x64x1xf32> to vector<1x64x1xf32>
    %18 = vector.broadcast %17 : vector<1x64x1xf32> to vector<2x64x128xf32>
    %19 = arith.mulf %13, %18 : vector<2x64x128xf32>
    %20 = arith.addf %4, %19 : vector<2x64x128xf32>
    %21 = vector.shape_cast %0 : vector<2x128xf32> to vector<2x1x128xf32>
    %22 = vector.shape_cast %21 : vector<2x1x128xf32> to vector<2x1x128xf32>
    %23 = vector.broadcast %22 : vector<2x1x128xf32> to vector<2x64x128xf32>
    %c1 = arith.constant 1 : index
    %c0_7 = arith.constant 0 : index
    %c0_8 = arith.constant 0 : index
    %24 = vector.load %arg2[%c1, %c0_7, %c0_8] : memref<3x64x1xf32, #tpu.memory_space<vmem>>, vector<1x64x1xf32>
    %25 = vector.shape_cast %24 : vector<1x64x1xf32> to vector<64x1xf32>
    %26 = vector.shape_cast %25 : vector<64x1xf32> to vector<1x64x1xf32>
    %27 = vector.shape_cast %26 : vector<1x64x1xf32> to vector<1x64x1xf32>
    %28 = vector.broadcast %27 : vector<1x64x1xf32> to vector<2x64x128xf32>
    %29 = arith.mulf %23, %28 : vector<2x64x128xf32>
    %30 = arith.addf %20, %29 : vector<2x64x128xf32>
    %c127_i32 = arith.constant 127 : i32
    %31 = tpu.dynamic_rotate %0 by %c127_i32 dim 1 : vector<2x128xf32>, i32 -> vector<2x128xf32>
    %32 = tpu.iota {dimensions = array<i32: 1>} : vector<2x128xi32>
    %c127_i32_9 = arith.constant 127 : i32
    %33 = vector.broadcast %c127_i32_9 : i32 to vector<2x128xi32>
    %34 = arith.cmpi slt, %32, %33 : vector<2x128xi32>
    %cst_10 = arith.constant 0.000000e+00 : f32
    %35 = vector.broadcast %cst_10 : f32 to vector<2x128xf32>
    %36 = arith.select %34, %31, %35 : vector<2x128xi1>, vector<2x128xf32>
    %37 = vector.shape_cast %36 : vector<2x128xf32> to vector<2x1x128xf32>
    %38 = vector.shape_cast %37 : vector<2x1x128xf32> to vector<2x1x128xf32>
    %39 = vector.broadcast %38 : vector<2x1x128xf32> to vector<2x64x128xf32>
    %c2 = arith.constant 2 : index
    %c0_11 = arith.constant 0 : index
    %c0_12 = arith.constant 0 : index
    %40 = vector.load %arg2[%c2, %c0_11, %c0_12] : memref<3x64x1xf32, #tpu.memory_space<vmem>>, vector<1x64x1xf32>
    %41 = vector.shape_cast %40 : vector<1x64x1xf32> to vector<64x1xf32>
    %42 = vector.shape_cast %41 : vector<64x1xf32> to vector<1x64x1xf32>
    %43 = vector.shape_cast %42 : vector<1x64x1xf32> to vector<1x64x1xf32>
    %44 = vector.broadcast %43 : vector<1x64x1xf32> to vector<2x64x128xf32>
    %45 = arith.mulf %39, %44 : vector<2x64x128xf32>
    %46 = arith.addf %30, %45 : vector<2x64x128xf32>
    %cst_13 = arith.constant 0.000000e+00 : f32
    %47 = vector.broadcast %cst_13 : f32 to vector<2x64x128xf32>
    %48 = arith.maximumf %46, %47 : vector<2x64x128xf32>
    %49 = tpu.iota {dimensions = array<i32: 2>} : vector<2x64x128xi32>
    %c16_i32 = arith.constant 16 : i32
    %50 = vector.broadcast %c16_i32 : i32 to vector<2x64x128xi32>
    %51 = arith.cmpi slt, %49, %50 : vector<2x64x128xi32>
    %cst_14 = arith.constant 0.000000e+00 : f32
    %52 = vector.broadcast %cst_14 : f32 to vector<2x64x128xf32>
    %53 = arith.select %51, %48, %52 : vector<2x64x128xi1>, vector<2x64x128xf32>
    %54 = vector.shape_cast %53 : vector<2x64x128xf32> to vector<128x128xf32>
    %c1_i32_15 = arith.constant 1 : i32
    %55 = tpu.dynamic_rotate %54 by %c1_i32_15 dim 1 : vector<128x128xf32>, i32 -> vector<128x128xf32>
    %56 = vector.shape_cast %55 : vector<128x128xf32> to vector<2x64x128xf32>
    %57 = tpu.iota {dimensions = array<i32: 2>} : vector<2x64x128xi32>
    %c1_i32_16 = arith.constant 1 : i32
    %58 = vector.broadcast %c1_i32_16 : i32 to vector<2x64x128xi32>
    %59 = arith.cmpi sge, %57, %58 : vector<2x64x128xi32>
    %cst_17 = arith.constant 0.000000e+00 : f32
    %60 = vector.broadcast %cst_17 : f32 to vector<2x64x128xf32>
    %61 = arith.select %59, %56, %60 : vector<2x64x128xi1>, vector<2x64x128xf32>
    %c0_18 = arith.constant 0 : index
    %c0_19 = arith.constant 0 : index
    %c0_20 = arith.constant 0 : index
    %62 = vector.load %arg9[%c0_18, %c0_19, %c0_20] : memref<2x192x128xf32, #tpu.memory_space<vmem>>, vector<2x64x128xf32>
    tpu.vector_store %arg9[%c0_18, %c0_19, %c0_20], %61 {strides = array<i32>} : memref<2x192x128xf32, #tpu.memory_space<vmem>>, vector<2x64x128xf32>,
    %c0_21 = arith.constant 0 : index
    %c64 = arith.constant 64 : index
    %c0_22 = arith.constant 0 : index
    %63 = vector.load %arg9[%c0_21, %c64, %c0_22] : memref<2x192x128xf32, #tpu.memory_space<vmem>>, vector<2x64x128xf32>
    tpu.vector_store %arg9[%c0_21, %c64, %c0_22], %53 {strides = array<i32>} : memref<2x192x128xf32, #tpu.memory_space<vmem>>, vector<2x64x128xf32>,
    %64 = vector.shape_cast %53 : vector<2x64x128xf32> to vector<128x128xf32>
    %c127_i32_23 = arith.constant 127 : i32
    %65 = tpu.dynamic_rotate %64 by %c127_i32_23 dim 1 : vector<128x128xf32>, i32 -> vector<128x128xf32>
    %66 = vector.shape_cast %65 : vector<128x128xf32> to vector<2x64x128xf32>
    %67 = tpu.iota {dimensions = array<i32: 2>} : vector<2x64x128xi32>
    %c127_i32_24 = arith.constant 127 : i32
    %68 = vector.broadcast %c127_i32_24 : i32 to vector<2x64x128xi32>
    %69 = arith.cmpi slt, %67, %68 : vector<2x64x128xi32>
    %cst_25 = arith.constant 0.000000e+00 : f32
    %70 = vector.broadcast %cst_25 : f32 to vector<2x64x128xf32>
    %71 = arith.select %69, %66, %70 : vector<2x64x128xi1>, vector<2x64x128xf32>
    %c0_26 = arith.constant 0 : index
    %c128 = arith.constant 128 : index
    %c0_27 = arith.constant 0 : index
    %72 = vector.load %arg9[%c0_26, %c128, %c0_27] : memref<2x192x128xf32, #tpu.memory_space<vmem>>, vector<2x64x128xf32>
    tpu.vector_store %arg9[%c0_26, %c128, %c0_27], %71 {strides = array<i32>} : memref<2x192x128xf32, #tpu.memory_space<vmem>>, vector<2x64x128xf32>,
    %c0_28 = arith.constant 0 : index
    %c0_29 = arith.constant 0 : index
    %73 = vector.load %arg4[%c0_28, %c0_29] : memref<64x192xf32, #tpu.memory_space<vmem>>, vector<64x192xf32>
    %c0_30 = arith.constant 0 : index
    %c0_31 = arith.constant 0 : index
    %74 = vector.load %arg5[%c0_30, %c0_31] : memref<64x1xf32, #tpu.memory_space<vmem>>, vector<64x1xf32>
    %c0_32 = arith.constant 0 : index
    %c0_33 = arith.constant 0 : index
    %c0_34 = arith.constant 0 : index
    %75 = vector.load %arg9[%c0_32, %c0_33, %c0_34] : memref<2x192x128xf32, #tpu.memory_space<vmem>>, vector<1x192x128xf32>
    %76 = vector.shape_cast %75 : vector<1x192x128xf32> to vector<192x128xf32>
    %cst_35 = arith.constant dense<0.000000e+00> : vector<64x128xf32>
    %77 = tpu.matmul %73, %76, %cst_35 {dimension_numbers = #tpu.dot_dimension_numbers<[1], [0], [0], [1], [0, 0, 1, 1], [], []>, precision = #tpu.contract_precision<fp32>} : vector<64x192xf32>, vector<192x128xf32>, vector<64x128xf32> -> vector<64x128xf32>
    %78 = vector.broadcast %74 : vector<64x1xf32> to vector<64x128xf32>
    %79 = arith.addf %77, %78 : vector<64x128xf32>
    %cst_36 = arith.constant 0.000000e+00 : f32
    %80 = vector.broadcast %cst_36 : f32 to vector<64x128xf32>
    %81 = arith.maximumf %79, %80 : vector<64x128xf32>
    %82 = tpu.iota {dimensions = array<i32: 1>} : vector<64x128xi32>
    %c16_i32_37 = arith.constant 16 : i32
    %83 = vector.broadcast %c16_i32_37 : i32 to vector<64x128xi32>
    %84 = arith.cmpi slt, %82, %83 : vector<64x128xi32>
    %cst_38 = arith.constant 0.000000e+00 : f32
    %85 = vector.broadcast %cst_38 : f32 to vector<64x128xf32>
    %86 = arith.select %84, %81, %85 : vector<64x128xi1>, vector<64x128xf32>
    %c0_39 = arith.constant 0 : index
    %c0_40 = arith.constant 0 : index
    %c0_41 = arith.constant 0 : index
    %87 = vector.load %arg10[%c0_39, %c0_40, %c0_41] : memref<2x64x128xf32, #tpu.memory_space<vmem>>, vector<1x64x128xf32>
    %88 = vector.shape_cast %87 : vector<1x64x128xf32> to vector<64x128xf32>
    %89 = vector.shape_cast %86 : vector<64x128xf32> to vector<1x64x128xf32>
    tpu.vector_store %arg10[%c0_39, %c0_40, %c0_41], %89 {strides = array<i32>} : memref<2x64x128xf32, #tpu.memory_space<vmem>>, vector<1x64x128xf32>,
    %c1_42 = arith.constant 1 : index
    %c0_43 = arith.constant 0 : index
    %c0_44 = arith.constant 0 : index
    %90 = vector.load %arg9[%c1_42, %c0_43, %c0_44] : memref<2x192x128xf32, #tpu.memory_space<vmem>>, vector<1x192x128xf32>
    %91 = vector.shape_cast %90 : vector<1x192x128xf32> to vector<192x128xf32>
    %cst_45 = arith.constant dense<0.000000e+00> : vector<64x128xf32>
    %92 = tpu.matmul %73, %91, %cst_45 {dimension_numbers = #tpu.dot_dimension_numbers<[1], [0], [0], [1], [0, 0, 1, 1], [], []>, precision = #tpu.contract_precision<fp32>} : vector<64x192xf32>, vector<192x128xf32>, vector<64x128xf32> -> vector<64x128xf32>
    %93 = vector.broadcast %74 : vector<64x1xf32> to vector<64x128xf32>
    %94 = arith.addf %92, %93 : vector<64x128xf32>
    %cst_46 = arith.constant 0.000000e+00 : f32
    %95 = vector.broadcast %cst_46 : f32 to vector<64x128xf32>
    %96 = arith.maximumf %94, %95 : vector<64x128xf32>
    %97 = tpu.iota {dimensions = array<i32: 1>} : vector<64x128xi32>
    %c16_i32_47 = arith.constant 16 : i32
    %98 = vector.broadcast %c16_i32_47 : i32 to vector<64x128xi32>
    %99 = arith.cmpi slt, %97, %98 : vector<64x128xi32>
    %cst_48 = arith.constant 0.000000e+00 : f32
    %100 = vector.broadcast %cst_48 : f32 to vector<64x128xf32>
    %101 = arith.select %99, %96, %100 : vector<64x128xi1>, vector<64x128xf32>
    %c1_49 = arith.constant 1 : index
    %c0_50 = arith.constant 0 : index
    %c0_51 = arith.constant 0 : index
    %102 = vector.load %arg10[%c1_49, %c0_50, %c0_51] : memref<2x64x128xf32, #tpu.memory_space<vmem>>, vector<1x64x128xf32>
    %103 = vector.shape_cast %102 : vector<1x64x128xf32> to vector<64x128xf32>
    %104 = vector.shape_cast %101 : vector<64x128xf32> to vector<1x64x128xf32>
    tpu.vector_store %arg10[%c1_49, %c0_50, %c0_51], %104 {strides = array<i32>} : memref<2x64x128xf32, #tpu.memory_space<vmem>>, vector<1x64x128xf32>,
    %c0_52 = arith.constant 0 : index
    %c0_53 = arith.constant 0 : index
    %c0_54 = arith.constant 0 : index
    %105 = vector.load %arg10[%c0_52, %c0_53, %c0_54] : memref<2x64x128xf32, #tpu.memory_space<vmem>>, vector<2x64x128xf32>
    %106 = vector.shape_cast %105 : vector<2x64x128xf32> to vector<128x128xf32>
    %c1_i32_55 = arith.constant 1 : i32
    %107 = tpu.dynamic_rotate %106 by %c1_i32_55 dim 1 : vector<128x128xf32>, i32 -> vector<128x128xf32>
    %108 = vector.shape_cast %107 : vector<128x128xf32> to vector<2x64x128xf32>
    %109 = tpu.iota {dimensions = array<i32: 2>} : vector<2x64x128xi32>
    %c1_i32_56 = arith.constant 1 : i32
    %110 = vector.broadcast %c1_i32_56 : i32 to vector<2x64x128xi32>
    %111 = arith.cmpi sge, %109, %110 : vector<2x64x128xi32>
    %cst_57 = arith.constant 0.000000e+00 : f32
    %112 = vector.broadcast %cst_57 : f32 to vector<2x64x128xf32>
    %113 = arith.select %111, %108, %112 : vector<2x64x128xi1>, vector<2x64x128xf32>
    %c0_58 = arith.constant 0 : index
    %c0_59 = arith.constant 0 : index
    %c0_60 = arith.constant 0 : index
    %114 = vector.load %arg6[%c0_58, %c0_59, %c0_60] : memref<3x64x1xf32, #tpu.memory_space<vmem>>, vector<1x64x1xf32>
    %115 = vector.shape_cast %114 : vector<1x64x1xf32> to vector<64x1xf32>
    %116 = vector.shape_cast %115 : vector<64x1xf32> to vector<1x64x1xf32>
    %117 = vector.shape_cast %116 : vector<1x64x1xf32> to vector<1x64x1xf32>
    %118 = vector.broadcast %117 : vector<1x64x1xf32> to vector<2x64x128xf32>
    %119 = arith.mulf %113, %118 : vector<2x64x128xf32>
    %c1_61 = arith.constant 1 : index
    %c0_62 = arith.constant 0 : index
    %c0_63 = arith.constant 0 : index
    %120 = vector.load %arg6[%c1_61, %c0_62, %c0_63] : memref<3x64x1xf32, #tpu.memory_space<vmem>>, vector<1x64x1xf32>
    %121 = vector.shape_cast %120 : vector<1x64x1xf32> to vector<64x1xf32>
    %122 = vector.shape_cast %121 : vector<64x1xf32> to vector<1x64x1xf32>
    %123 = vector.shape_cast %122 : vector<1x64x1xf32> to vector<1x64x1xf32>
    %124 = vector.broadcast %123 : vector<1x64x1xf32> to vector<2x64x128xf32>
    %125 = arith.mulf %105, %124 : vector<2x64x128xf32>
    %126 = arith.addf %119, %125 : vector<2x64x128xf32>
    %127 = vector.shape_cast %105 : vector<2x64x128xf32> to vector<128x128xf32>
    %c127_i32_64 = arith.constant 127 : i32
    %128 = tpu.dynamic_rotate %127 by %c127_i32_64 dim 1 : vector<128x128xf32>, i32 -> vector<128x128xf32>
    %129 = vector.shape_cast %128 : vector<128x128xf32> to vector<2x64x128xf32>
    %130 = tpu.iota {dimensions = array<i32: 2>} : vector<2x64x128xi32>
    %c127_i32_65 = arith.constant 127 : i32
    %131 = vector.broadcast %c127_i32_65 : i32 to vector<2x64x128xi32>
    %132 = arith.cmpi slt, %130, %131 : vector<2x64x128xi32>
    %cst_66 = arith.constant 0.000000e+00 : f32
    %133 = vector.broadcast %cst_66 : f32 to vector<2x64x128xf32>
    %134 = arith.select %132, %129, %133 : vector<2x64x128xi1>, vector<2x64x128xf32>
    %c2_67 = arith.constant 2 : index
    %c0_68 = arith.constant 0 : index
    %c0_69 = arith.constant 0 : index
    %135 = vector.load %arg6[%c2_67, %c0_68, %c0_69] : memref<3x64x1xf32, #tpu.memory_space<vmem>>, vector<1x64x1xf32>
    %136 = vector.shape_cast %135 : vector<1x64x1xf32> to vector<64x1xf32>
    %137 = vector.shape_cast %136 : vector<64x1xf32> to vector<1x64x1xf32>
    %138 = vector.shape_cast %137 : vector<1x64x1xf32> to vector<1x64x1xf32>
    %139 = vector.broadcast %138 : vector<1x64x1xf32> to vector<2x64x128xf32>
    %140 = arith.mulf %134, %139 : vector<2x64x128xf32>
    %141 = arith.addf %126, %140 : vector<2x64x128xf32>
    %cst_70 = arith.constant dense<0.000000e+00> : vector<2x128xf32>
    %142 = vector.multi_reduction <add>, %141, %cst_70 [1] : vector<2x64x128xf32> to vector<2x128xf32>
    %c0_71 = arith.constant 0 : index
    %c0_72 = arith.constant 0 : index
    %143 = vector.load %arg7[%c0_71, %c0_72] : memref<1x1xf32, #tpu.memory_space<vmem>>, vector<1x1xf32>
    %144 = vector.shape_cast %143 : vector<1x1xf32> to vector<1x1xf32>
    %145 = vector.broadcast %144 : vector<1x1xf32> to vector<2x128xf32>
    %146 = arith.addf %142, %145 : vector<2x128xf32>
    %c0_73 = arith.constant 0 : index
    %c0_74 = arith.constant 0 : index
    %147 = vector.load %arg8[%c0_73, %c0_74] : memref<2x128xf32, #tpu.memory_space<vmem>>, vector<2x128xf32>
    tpu.vector_store %arg8[%c0_73, %c0_74], %146 {strides = array<i32>} : memref<2x128xf32, #tpu.memory_space<vmem>>, vector<2x128xf32>,
    return
  }
  func.func @transform_0(%arg0: i32) -> (i32, i32) {
    %c0_i32 = arith.constant 0 : i32
    %c0_i32_0 = arith.constant 0 : i32
    return %arg0, %c0_i32 : i32, i32
  }
  func.func @transform_1(%arg0: i32) -> (i32, i32, i32) {
    %c0_i32 = arith.constant 0 : i32
    %c0_i32_0 = arith.constant 0 : i32
    %c0_i32_1 = arith.constant 0 : i32
    %c0_i32_2 = arith.constant 0 : i32
    return %c0_i32, %c0_i32_0, %c0_i32_1 : i32, i32, i32
  }
  func.func @transform_2(%arg0: i32) -> (i32, i32) {
    %c0_i32 = arith.constant 0 : i32
    %c0_i32_0 = arith.constant 0 : i32
    %c0_i32_1 = arith.constant 0 : i32
    return %c0_i32, %c0_i32_0 : i32, i32
  }
  func.func @transform_3(%arg0: i32) -> (i32, i32) {
    %c0_i32 = arith.constant 0 : i32
    %c0_i32_0 = arith.constant 0 : i32
    %c0_i32_1 = arith.constant 0 : i32
    return %c0_i32, %c0_i32_0 : i32, i32
  }
  func.func @transform_4(%arg0: i32) -> (i32, i32) {
    %c0_i32 = arith.constant 0 : i32
    %c0_i32_0 = arith.constant 0 : i32
    %c0_i32_1 = arith.constant 0 : i32
    return %c0_i32, %c0_i32_0 : i32, i32
  }
  func.func @transform_5(%arg0: i32) -> (i32, i32, i32) {
    %c0_i32 = arith.constant 0 : i32
    %c0_i32_0 = arith.constant 0 : i32
    %c0_i32_1 = arith.constant 0 : i32
    %c0_i32_2 = arith.constant 0 : i32
    return %c0_i32, %c0_i32_0, %c0_i32_1 : i32, i32, i32
  }
  func.func @transform_6(%arg0: i32) -> (i32, i32) {
    %c0_i32 = arith.constant 0 : i32
    %c0_i32_0 = arith.constant 0 : i32
    %c0_i32_1 = arith.constant 0 : i32
    return %c0_i32, %c0_i32_0 : i32, i32
  }
  func.func @transform_7(%arg0: i32) -> (i32, i32) {
    %c0_i32 = arith.constant 0 : i32
    %c0_i32_0 = arith.constant 0 : i32
    return %arg0, %c0_i32 : i32, i32
  }
}

</mosaic_0001>

<bundles_post_ra>
// kernel: residual_cnn_forward.1
= control target key start
LH: loop header
LB: loop body
LE: loop exit
PB: predicated region body
PF: predicated region fallthrough
CT: control target
= control target key end

     0   :  { %s6205_s0 = inlined_call_operand.vmem [shape: f32[2,128], index: 0, kind: input, shape index: {}]   ;;  %s6206_s1 = inlined_call_operand.vmem [shape: f32[3,64,1], index: 1, kind: input, shape index: {}]   ;;  %s6207_s2 = inlined_call_operand.vmem [shape: f32[64,1], index: 2, kind: input, shape index: {}]   ;;  %s6208_s3 = inlined_call_operand.vmem [shape: f32[64,192], index: 3, kind: input, shape index: {}]   ;;  %s6209_s4 = inlined_call_operand.vmem [shape: f32[64,1], index: 4, kind: input, shape index: {}]   ;;  %s6210_s5 = inlined_call_operand.vmem [shape: f32[3,64,1], index: 5, kind: input, shape index: {}]   ;;  %s6211_s6 = inlined_call_operand.<no memory space> [shape: f32[1,1], index: 6, kind: input, shape index: {}]   ;;  %s6212_s7 = inlined_call_operand.hbm [shape: f32[2,128], index: 7, kind: output, shape index: {}]  }
   0x1   :  { %v12_v0 = vstv %s6211_s6 }
   0x2   :  { %13 = vst [vmem:[#allocation4] sm:$0x1] %v12_v0 }
   0x3   :  { %v4214_v1 = vld [vmem:[%s6205_s0] sm:$0x3]  ;;  %v4162_v2 = vmov 0   ;;  %s4163_s28 = smov 1   ;;  %v118_v3 = vld [vmem:[%s6206_s1 + $0x8] sm:$0xff] }
   0x4   :  { %4137 = vset.pattern.permute.xlu1 %v4162_v2  ;;  %78 = vrot.lane.b32.xlu0 %v4214_v1, %s4163_s28  ;;  %v117_v4 = vld [vmem:[%s6206_s1] sm:$0xff]  ;;  %v31_v7 = vld [vmem:[%s6207_s2 + $0x8] sm:$0xff] }
   0x5   :  { %132 = vperm.xlu1 %4137, %v118_v3   ;;  %4136 = vset.pattern.permute.xlu0 %v4162_v2  ;;  %v30_v5 = vld [vmem:[%s6207_s2] sm:$0xff]  ;;  %v3490_v8 = vld [vmem:[%s6206_s1 + $0x48] sm:$0xff] }
   0x6   :  { %v3489_v6 = vld [vmem:[%s6206_s1 + $0x40] sm:$0xff] }
   0x8   :  { %127 = vperm.xlu0 %4136, %v117_v4  }
   0x9   :  { %40 = vperm.xlu1 %4137, %v30_v5  }
   0xc   :  { %241 = vperm.xlu0 %4136, %v3489_v6  }
   0xd   :  { %45 = vperm.xlu1 %4137, %v31_v7  }
   0xe   :  { %14 = vsyncpa [#allocation6], 0  ;;  %s4164_s16 = smov 127   ;;  %v120_v9 = vld [vmem:[%s6206_s1 + $0x18] sm:$0xff]  ;;  %v119_v10 = vld [vmem:[%s6206_s1 + $0x10] sm:$0xff]  ;;  %v80_v35 = vlaneseq  ;;  %vm694_vm3 = vcmask 523264  }
   0xf   :  { %v3498_v11 = vld [vmem:[%s6206_s1 + $0x88] sm:$0xff]  ;;  %v3497_v12 = vld [vmem:[%s6206_s1 + $0x80] sm:$0xff]  ;;  %v33_v13 = vld [vmem:[%s6207_s2 + $0x18] sm:$0xff]  ;;  %v4165_v36 = vmov 1966171168   ;;  %vm3471_vm4 = vcmask 1041409  }
  0x10   :  { %311 = vrot.lane.b32.xlu0 %v4214_v1, %s4164_s16  ;;  %v32_v14 = vld [vmem:[%s6207_s2 + $0x10] sm:$0xff]  ;;  %v3492_v15 = vld [vmem:[%s6206_s1 + $0x58] sm:$0xff]  ;;  %v122_v17 = vld [vmem:[%s6206_s1 + $0x28] sm:$0xff]  ;;  %v86_v37 = vunpack.c.l.s4 %v4165_v36  ;;  %v4316_v38 = vand.u32 127, %v80_v35  ;;  %v89_v40 = vshrl.u32 %v80_v35, 7 }
  0x11   :  { %246 = vperm.xlu1 %4137, %v3490_v8   ;;  %v3491_v16 = vld [vmem:[%s6206_s1 + $0x50] sm:$0xff]  ;;  %v121_v18 = vld [vmem:[%s6206_s1 + $0x20] sm:$0xff]  ;;  %v3500_v19 = vld [vmem:[%s6206_s1 + $0x98] sm:$0xff] }
  0x12   :  { %v3499_v20 = vld [vmem:[%s6206_s1 + $0x90] sm:$0xff]  ;;  %v35_v21 = vld [vmem:[%s6207_s2 + $0x28] sm:$0xff]  ;;  %v34_v22 = vld [vmem:[%s6207_s2 + $0x20] sm:$0xff]  ;;  %6360 = vst [vmem:[#allocation8_spill] sm:$0xff] %v4316_v38  ;;  %v87_v39 = vunpack.c.0.s8 %v86_v37  ;;  %vm82_vm0 = vcmp.ge.s32.totalorder %v4316_v38, 1  ;;  %v109_v51 = vsub.s32 0, %v89_v40 }
  0x13   :  { %v3494_v23 = vld [vmem:[%s6206_s1 + $0x68] sm:$0xff]  ;;  %v3493_v24 = vld [vmem:[%s6206_s1 + $0x60] sm:$0xff]  ;;  %v124_v25 = vld [vmem:[%s6206_s1 + $0x38] sm:$0xff]  ;;  %vm313_vm1 = vcmp.lt.s32.totalorder %v4316_v38, 127  ;;  %vm445_vm2 = vcmp.lt.s32.totalorder %v4316_v38, 16 }
  0x14   :  { %142 = vperm.xlu0 %4136, %v120_v9   ;;  %v123_v26 = vld [vmem:[%s6206_s1 + $0x30] sm:$0xff]  ;;  %v3502_v27 = vld [vmem:[%s6206_s1 + $0xa8] sm:$0xff]  ;;  %v3501_v28 = vld [vmem:[%s6206_s1 + $0xa0] sm:$0xff]  ;;  %v90_v42 = vsub.s32 %v87_v39, %v89_v40 }
  0x15   :  { %137 = vperm.xlu1 %4137, %v119_v10   ;;  %v37_v29 = vld [vmem:[%s6207_s2 + $0x38] sm:$0xff]  ;;  %v36_v30 = vld [vmem:[%s6207_s2 + $0x30] sm:$0xff] }
  0x16   :  { %v3496_v31 = vld [vmem:[%s6206_s1 + $0x78] sm:$0xff]  ;;  %v3495_v32 = vld [vmem:[%s6206_s1 + $0x70] sm:$0xff]  ;;  %v204_v44 = vrot.slane %v4214_v1, %v90_v42 }
  0x17   :  { %v3504_v33 = vld [vmem:[%s6206_s1 + $0xb8] sm:$0xff]  ;;  %v3503_v34 = vld [vmem:[%s6206_s1 + $0xb0] sm:$0xff] }
  0x18   :  { %364 = vperm.xlu0 %4136, %v3498_v11   ;;  %v205_v48 = vcombine.high %v204_v44, %v204_v44  ;;  %v212_v52 = vrot.slane %v204_v44, %v90_v42 }
  0x19   :  { %359 = vperm.xlu1 %4137, %v3497_v12  }
  0x1a   :  { %v219_v55 = vrot.slane %v205_v48, %v90_v42  ;;  %v4323_v58 = vrot.slane %v212_v52, %v109_v51 }
  0x1c   :  { %55 = vperm.xlu0 %4136, %v33_v13   ;;  %v4327_v61 = vrot.slane %v219_v55, %v109_v51 }
  0x1d   :  { %50 = vperm.xlu1 %4137, %v32_v14  }
  0x20   :  { %256 = vperm.xlu0 %4136, %v3492_v15  }
  0x21   :  { %251 = vperm.xlu1 %4137, %v3491_v16  }
  0x24   :  { %152 = vperm.xlu0 %4136, %v122_v17  }
  0x25   :  { %147 = vperm.xlu1 %4137, %v121_v18  }
  0x28   :  { %374 = vperm.xlu0 %4136, %v3500_v19  }
  0x29   :  { %369 = vperm.xlu1 %4137, %v3499_v20  }
  0x2c   :  { %65 = vperm.xlu0 %4136, %v35_v21  }
  0x2d   :  { %60 = vperm.xlu1 %4137, %v34_v22  }
  0x30   :  { %266 = vperm.xlu0 %4136, %v3494_v23  }
  0x31   :  { %261 = vperm.xlu1 %4137, %v3493_v24  }
  0x34   :  { %162 = vperm.xlu0 %4136, %v124_v25  }
  0x35   :  { %157 = vperm.xlu1 %4137, %v123_v26  }
  0x38   :  { %384 = vperm.xlu0 %4136, %v3502_v27   ;;  %v6213_v27 = vmov 0.0|0.0  }
  0x39   :  { %379 = vperm.xlu1 %4137, %v3501_v28   ;;  %3522 = vmatprep.subr.bf16.mxu0 %v6213_v27 }
  0x3a   :  { %3738 = vmatprep.subr.bf16.mxu1 %v6213_v27 }
  0x3c   :  { %75 = vperm.xlu0 %4136, %v37_v29  }
  0x3d   :  { %70 = vperm.xlu1 %4137, %v36_v30  }
  0x40   :  { %276 = vperm.xlu0 %4136, %v3496_v31  }
  0x41   :  { %271 = vperm.xlu1 %4137, %v3495_v32  }
  0x44   :  { %394 = vperm.xlu0 %4136, %v3504_v33  }
  0x45   :  { %389 = vperm.xlu1 %4137, %v3503_v34  }
  0x76   :  { %v79_v41 = vpop.permute.xlu0 %78 }
  0x77   :  { %v83_v43 = vsel %vm82_vm0, %v79_v41, 0.0 }
  0x78   :  { %v91_v45 = vrot.slane %v83_v43, %v90_v42 }
  0x7a   :  { %v92_v49 = vcombine.high %v91_v45, %v91_v45  ;;  %v99_v53 = vrot.slane %v91_v45, %v90_v42 }
  0x7c   :  { %v106_v56 = vrot.slane %v92_v49, %v90_v42  ;;  %v4325_v59 = vrot.slane %v99_v53, %v109_v51 }
  0x7e   :  { %v4329_v62 = vrot.slane %v106_v56, %v109_v51 }
  0x84   :  { %v133_v46 = vpop.permute.xlu1 %132 }
  0x85   :  { %v166_v8 = vmul.f32 %v133_v46, %v4325_v59  ;;  %v174_v9 = vmul.f32 %v133_v46, %v4329_v62 }
  0x87   :  { %v128_v47 = vpop.permute.xlu0 %127 }
  0x88   :  { %v41_v50 = vpop.permute.xlu1 %40  ;;  %v165_v1 = vmul.f32 %v128_v47, %v4325_v59  ;;  %v173_v3 = vmul.f32 %v128_v47, %v4329_v62 }
  0x8a   :  { %v181_v13 = vadd.f32 %v165_v1, %v41_v50  ;;  %v189_v17 = vadd.f32 %v173_v3, %v41_v50 }
  0x8b   :  { %v242_v54 = vpop.permute.xlu0 %241 }
  0x8c   :  { %v46_v57 = vpop.permute.xlu1 %45  ;;  %v279_v4 = vmul.f32 %v242_v54, %v4323_v58  ;;  %v287_v10 = vmul.f32 %v242_v54, %v4327_v61 }
  0x8d   :  { %v182_v18 = vadd.f32 %v166_v8, %v46_v57  ;;  %v190_v20 = vadd.f32 %v174_v9, %v46_v57 }
  0x8e   :  { %v295_v19 = vadd.f32 %v279_v4, %v181_v13  ;;  %v303_v23 = vadd.f32 %v287_v10, %v189_v17 }
  0x8f   :  { %v312_v60 = vpop.permute.xlu0 %311 }
  0x90   :  { %v314_v63 = vsel %vm313_vm1, %v312_v60, 0.0  ;;  %v247_v0 = vpop.permute.xlu1 %246 }
  0x91   :  { %v322_v2 = vrot.slane %v314_v63, %v90_v42  ;;  %v280_v11 = vmul.f32 %v247_v0, %v4323_v58  ;;  %v288_v16 = vmul.f32 %v247_v0, %v4327_v61 }
  0x93   :  { %v323_v5 = vcombine.high %v322_v2, %v322_v2  ;;  %v330_v6 = vrot.slane %v322_v2, %v90_v42  ;;  %v143_v7 = vpop.permute.xlu0 %142  ;;  %v296_v24 = vadd.f32 %v280_v11, %v182_v18  ;;  %v304_v28 = vadd.f32 %v288_v16, %v190_v20 }
  0x94   :  { %v138_v12 = vpop.permute.xlu1 %137  ;;  %v176_v43 = vmul.f32 %v143_v7, %v4329_v62 }
  0x95   :  { %v337_v14 = vrot.slane %v323_v5, %v90_v42  ;;  %v4340_v15 = vrot.slane %v330_v6, %v109_v51  ;;  %v168_v42 = vmul.f32 %v143_v7, %v4325_v59  ;;  %v167_v46 = vmul.f32 %v138_v12, %v4325_v59 }
  0x96   :  { %v175_v47 = vmul.f32 %v138_v12, %v4329_v62 }
  0x97   :  { %v4343_v21 = vrot.slane %v337_v14, %v109_v51  ;;  %v365_v22 = vpop.permute.xlu0 %364 }
  0x98   :  { %v398_v25 = vmul.f32 %v365_v22, %v4340_v15  ;;  %v360_v26 = vpop.permute.xlu1 %359 }
  0x99   :  { %v406_v29 = vmul.f32 %v365_v22, %v4343_v21  ;;  %v397_v30 = vmul.f32 %v360_v26, %v4340_v15  ;;  %v405_v31 = vmul.f32 %v360_v26, %v4343_v21 }
  0x9a   :  { %v414_v32 = vadd.f32 %v398_v25, %v296_v24 }
  0x9b   :  { %v422_v33 = vadd.f32 %v406_v29, %v304_v28  ;;  %v413_v34 = vadd.f32 %v397_v30, %v295_v19  ;;  %v421_v35 = vadd.f32 %v405_v31, %v303_v23  ;;  %v56_v36 = vpop.permute.xlu0 %55 }
  0x9c   :  { %v51_v37 = vpop.permute.xlu1 %50  ;;  %v430_v39 = vmax.f32 %v414_v32, 0.0  ;;  %v184_v0 = vadd.f32 %v168_v42, %v56_v36  ;;  %v192_v1 = vadd.f32 %v176_v43, %v56_v36 }
  0x9d   :  { %v429_v40 = vmax.f32 %v413_v34, 0.0  ;;  %v438_v41 = vmax.f32 %v422_v33, 0.0  ;;  %v437_v45 = vmax.f32 %v421_v35, 0.0  ;;  %v183_v4 = vadd.f32 %v167_v46, %v51_v37 }
  0x9e   :  { %v4356_v44 = vsel %vm445_vm2, %v430_v39, 0.0  ;;  %v191_v9 = vadd.f32 %v175_v47, %v51_v37 }
  0x9f   :  { %v257_v48 = vpop.permute.xlu0 %256  ;;  %464 = vrot.lane.b32.xlu0 %v4356_v44, %s4163_s28  ;;  %v4364_v49 = vsel %vm445_vm2, %v429_v40, 0.0  ;;  %v747_v50 = vand.u32 4294901760, %v4356_v44  ;;  %v4372_v53 = vsel %vm445_vm2, %v438_v41, 0.0  ;;  %v4376_v54 = vsel %vm445_vm2, %v437_v45, 0.0 }
  0xa0   :  { %v282_v51 = vmul.f32 %v257_v48, %v4323_v58  ;;  %v252_v52 = vpop.permute.xlu1 %251  ;;  %462 = vrot.lane.b32.xlu1 %v4364_v49, %s4163_s28  ;;  %v744_v55 = vand.u32 4294901760, %v4364_v49  ;;  %v290_v56 = vmul.f32 %v257_v48, %v4327_v61  ;;  %v1943_v63 = vand.u32 4294901760, %v4376_v54 }
  0xa1   :  { %v281_v57 = vmul.f32 %v252_v52, %v4323_v58  ;;  %v4382_v60 = vsub.f32 %v4356_v44, %v747_v50  ;;  %v289_v5 = vmul.f32 %v252_v52, %v4327_v61  ;;  %v1946_v7 = vand.u32 4294901760, %v4372_v53 }
  0xa2   :  { %v4385_v2 = vpack.c.bf16 %v747_v50, %v744_v55  ;;  %v4388_v3 = vsub.f32 %v4364_v49, %v744_v55  ;;  %v4395_v8 = vsub.f32 %v4376_v54, %v1943_v63  ;;  %v298_v10 = vadd.f32 %v282_v51, %v184_v0 }
  0xa3   :  { %6361 = vst [vmem:[#allocation9_spill] sm:$0xff] %v4382_v60  ;;  %v153_v6 = vpop.permute.xlu0 %152  ;;  %480 = vrot.lane.b32.xlu0 %v4372_v53, %s4163_s28  ;;  %v994_v13 = vand.u32 4294901760, %v4382_v60  ;;  %v306_v14 = vadd.f32 %v290_v56, %v192_v1  ;;  %v297_v16 = vadd.f32 %v281_v57, %v183_v4  ;;  %v4401_v17 = vpack.c.bf16 %v1946_v7, %v1943_v63 }
  0xa4   :  { %6362 = vst [vmem:[#allocation10_spill] sm:$0xff] %v4385_v2  ;;  %6363 = vst [vmem:[#allocation11_spill] sm:$0xff] %v4388_v3  ;;  %v148_v11 = vpop.permute.xlu1 %147  ;;  %478 = vrot.lane.b32.xlu1 %v4376_v54, %s4163_s28  ;;  %v987_v12 = vand.u32 4294901760, %v4388_v3  ;;  %v4404_v18 = vsub.f32 %v4372_v53, %v1946_v7  ;;  %v2186_v22 = vand.u32 4294901760, %v4395_v8  ;;  %v305_v24 = vadd.f32 %v289_v5, %v191_v9 }
  0xa5   :  { %6364 = vst [vmem:[#allocation12_spill] sm:$0xff] %v4395_v8  ;;  %6365 = vst [vmem:[#allocation13_spill] sm:$0xff] %v4401_v17  ;;  %v995_v20 = vsub.f32 %v4382_v60, %v994_v13  ;;  %v170_v51 = vmul.f32 %v153_v6, %v4325_v59  ;;  %v178_v57 = vmul.f32 %v153_v6, %v4329_v62 }
  0xa6   :  { %6366 = vst [vmem:[#allocation14_spill] sm:$0xff] %v4404_v18  ;;  %v988_v19 = vsub.f32 %v4388_v3, %v987_v12  ;;  %v2193_v26 = vand.u32 4294901760, %v4404_v18  ;;  %v4414_v29 = vpack.c.bf16 %v994_v13, %v987_v12  ;;  %v2187_v37 = vsub.f32 %v4395_v8, %v2186_v22 }
  0xa7   :  { %v375_v25 = vpop.permute.xlu0 %374  ;;  %v996_v34 = vand.u32 4294901760, %v995_v20  ;;  %v169_v63 = vmul.f32 %v148_v11, %v4325_v59  ;;  %v177_v4 = vmul.f32 %v148_v11, %v4329_v62 }
  0xa8   :  { %6367 = vst [vmem:[#allocation15_spill] sm:$0xff] %v4414_v29  ;;  %v400_v30 = vmul.f32 %v375_v25, %v4340_v15  ;;  %v408_v31 = vmul.f32 %v375_v25, %v4343_v21  ;;  %v370_v32 = vpop.permute.xlu1 %369  ;;  %v989_v33 = vand.u32 4294901760, %v988_v19  ;;  %v2194_v39 = vsub.f32 %v4404_v18, %v2193_v26 }
  0xa9   :  { %v399_v35 = vmul.f32 %v370_v32, %v4340_v15  ;;  %v407_v36 = vmul.f32 %v370_v32, %v4343_v21  ;;  %v4424_v43 = vpack.c.bf16 %v2193_v26, %v2186_v22  ;;  %v2188_v48 = vand.u32 4294901760, %v2187_v37 }
  0xaa   :  { %v416_v40 = vadd.f32 %v400_v30, %v298_v10  ;;  %v424_v41 = vadd.f32 %v408_v31, %v306_v14  ;;  %v4422_v42 = vpack.c.bf16 %v996_v34, %v989_v33  ;;  %v2195_v50 = vand.u32 4294901760, %v2194_v39 }
  0xab   :  { %6369 = vst [vmem:[#allocation17_spill] sm:$0xff] %v4424_v43  ;;  %v415_v45 = vadd.f32 %v399_v35, %v297_v16  ;;  %v423_v46 = vadd.f32 %v407_v36, %v305_v24  ;;  %v66_v47 = vpop.permute.xlu0 %65 }
  0xac   :  { %6368 = vst [vmem:[#allocation16_spill] sm:$0xff] %v4422_v42  ;;  %v61_v52 = vpop.permute.xlu1 %60  ;;  %v432_v55 = vmax.f32 %v416_v40, 0.0  ;;  %v440_v56 = vmax.f32 %v424_v41, 0.0  ;;  %v4438_v9 = vpack.c.bf16 %v2195_v50, %v2188_v48  ;;  %v186_v31 = vadd.f32 %v170_v51, %v66_v47 }
  0xad   :  { %v431_v0 = vmax.f32 %v415_v45, 0.0  ;;  %v439_v1 = vmax.f32 %v423_v46, 0.0  ;;  %v194_v32 = vadd.f32 %v178_v57, %v66_v47  ;;  %v185_v35 = vadd.f32 %v169_v63, %v61_v52 }
  0xae   :  { %v4432_v5 = vsel %vm445_vm2, %v432_v55, 0.0  ;;  %v4436_v7 = vsel %vm445_vm2, %v440_v56, 0.0  ;;  %6370 = vst [vmem:[#allocation18_spill] sm:$0xff] %v4438_v9  ;;  %v193_v36 = vadd.f32 %v177_v4, %v61_v52 }
  0xaf   :  { %v267_v10 = vpop.permute.xlu0 %266  ;;  %468 = vrot.lane.b32.xlu0 %v4432_v5, %s4163_s28  ;;  %v4444_v6 = vsel %vm445_vm2, %v431_v0, 0.0  ;;  %v4448_v11 = vsel %vm445_vm2, %v439_v1, 0.0  ;;  %v753_v12 = vand.u32 4294901760, %v4432_v5  ;;  %v1952_v13 = vand.u32 4294901760, %v4436_v7 }
  0xb0   :  { %v284_v14 = vmul.f32 %v267_v10, %v4323_v58  ;;  %v292_v16 = vmul.f32 %v267_v10, %v4327_v61  ;;  %v262_v19 = vpop.permute.xlu1 %261  ;;  %466 = vrot.lane.b32.xlu1 %v4444_v6, %s4163_s28  ;;  %v750_v20 = vand.u32 4294901760, %v4444_v6  ;;  %v1949_v22 = vand.u32 4294901760, %v4448_v11 }
  0xb1   :  { %v283_v24 = vmul.f32 %v262_v19, %v4323_v58  ;;  %v291_v25 = vmul.f32 %v262_v19, %v4327_v61  ;;  %v4461_v26 = vsub.f32 %v4432_v5, %v753_v12  ;;  %v4464_v30 = vsub.f32 %v4436_v7, %v1952_v13 }
  0xb2   :  { %v4466_v33 = vpack.c.bf16 %v753_v12, %v750_v20  ;;  %v4469_v34 = vsub.f32 %v4444_v6, %v750_v20  ;;  %v4473_v39 = vpack.c.bf16 %v1952_v13, %v1949_v22  ;;  %v4476_v40 = vsub.f32 %v4448_v11, %v1949_v22 }
  0xb3   :  { %6371 = vst [vmem:[#allocation19_spill] sm:$0xff] %v4461_v26  ;;  %6372 = vst [vmem:[#allocation20_spill] sm:$0xff] %v4464_v30  ;;  %v163_v37 = vpop.permute.xlu0 %162  ;;  %484 = vrot.lane.b32.xlu0 %v4436_v7, %s4163_s28  ;;  %v300_v41 = vadd.f32 %v284_v14, %v186_v31  ;;  %v308_v45 = vadd.f32 %v292_v16, %v194_v32  ;;  %v1008_v48 = vand.u32 4294901760, %v4461_v26  ;;  %v2207_v55 = vand.u32 4294901760, %v4464_v30 }
  0xb4   :  { %6373 = vst [vmem:[#allocation21_spill] sm:$0xff] %v4466_v33  ;;  %6374 = vst [vmem:[#allocation22_spill] sm:$0xff] %v4469_v34  ;;  %v158_v46 = vpop.permute.xlu1 %157  ;;  %482 = vrot.lane.b32.xlu1 %v4448_v11, %s4163_s28  ;;  %v1001_v47 = vand.u32 4294901760, %v4469_v34  ;;  %v299_v50 = vadd.f32 %v283_v24, %v185_v35  ;;  %v307_v51 = vadd.f32 %v291_v25, %v193_v36  ;;  %v2200_v52 = vand.u32 4294901760, %v4476_v40 }
  0xb5   :  { %6375 = vst [vmem:[#allocation23_spill] sm:$0xff] %v4473_v39  ;;  %6376 = vst [vmem:[#allocation24_spill] sm:$0xff] %v4476_v40  ;;  %v1009_v57 = vsub.f32 %v4461_v26, %v1008_v48  ;;  %v2208_v10 = vsub.f32 %v4464_v30, %v2207_v55  ;;  %v172_v35 = vmul.f32 %v163_v37, %v4325_v59 }
  0xb6   :  { %v1002_v56 = vsub.f32 %v4469_v34, %v1001_v47  ;;  %v2201_v4 = vsub.f32 %v4476_v40, %v2200_v52  ;;  %v4492_v12 = vpack.c.bf16 %v1008_v48, %v1001_v47  ;;  %v4494_v13 = vpack.c.bf16 %v2207_v55, %v2200_v52 }
  0xb7   :  { %v385_v1 = vpop.permute.xlu0 %384  ;;  %v1010_v22 = vand.u32 4294901760, %v1009_v57  ;;  %v2209_v32 = vand.u32 4294901760, %v2208_v10  ;;  %v180_v52 = vmul.f32 %v163_v37, %v4329_v62  ;;  %v179_v57 = vmul.f32 %v158_v46, %v4329_v62 }
  0xb8   :  { %6377 = vst [vmem:[#allocation25_spill] sm:$0xff] %v4492_v12  ;;  %6378 = vst [vmem:[#allocation26_spill] sm:$0xff] %v4494_v13  ;;  %v402_v14 = vmul.f32 %v385_v1, %v4340_v15  ;;  %v410_v16 = vmul.f32 %v385_v1, %v4343_v21  ;;  %v380_v19 = vpop.permute.xlu1 %379  ;;  %v1003_v20 = vand.u32 4294901760, %v1002_v56  ;;  %v2202_v31 = vand.u32 4294901760, %v2201_v4 }
  0xb9   :  { %v401_v24 = vmul.f32 %v380_v19, %v4340_v15  ;;  %v409_v25 = vmul.f32 %v380_v19, %v4343_v21  ;;  %v171_v56 = vmul.f32 %v158_v46, %v4325_v59 }
  0xba   :  { %v418_v36 = vadd.f32 %v402_v14, %v300_v41  ;;  %v426_v47 = vadd.f32 %v410_v16, %v308_v45  ;;  %v4501_v48 = vpack.c.bf16 %v1010_v22, %v1003_v20  ;;  %v4504_v28 = vpack.c.bf16 %v2209_v32, %v2202_v31 }
  0xbb   :  { %v417_v55 = vadd.f32 %v401_v24, %v299_v50  ;;  %v425_v0 = vadd.f32 %v409_v25, %v307_v51  ;;  %v76_v1 = vpop.permute.xlu0 %75 }
  0xbc   :  { %6379 = vst [vmem:[#allocation27_spill] sm:$0xff] %v4501_v48  ;;  %6380 = vst [vmem:[#allocation28_spill] sm:$0xff] %v4504_v28  ;;  %v71_v19 = vpop.permute.xlu1 %70  ;;  %v434_v4 = vmax.f32 %v418_v36, 0.0  ;;  %v442_v10 = vmax.f32 %v426_v47, 0.0  ;;  %v188_v63 = vadd.f32 %v172_v35, %v76_v1  ;;  %v196_v23 = vadd.f32 %v180_v52, %v76_v1 }
  0xbd   :  { %v433_v41 = vmax.f32 %v417_v55, 0.0  ;;  %v441_v45 = vmax.f32 %v425_v0, 0.0  ;;  %v187_v14 = vadd.f32 %v171_v56, %v71_v19  ;;  %v195_v16 = vadd.f32 %v179_v57, %v71_v19 }
  0xbe   :  { %v4510_v37 = vsel %vm445_vm2, %v434_v4, 0.0  ;;  %v4514_v50 = vsel %vm445_vm2, %v442_v10, 0.0 }
  0xbf   :  { %v277_v59 = vpop.permute.xlu0 %276  ;;  %472 = vrot.lane.b32.xlu0 %v4510_v37, %s4163_s28  ;;  %v4520_v62 = vsel %vm445_vm2, %v433_v41, 0.0  ;;  %v4524_v46 = vsel %vm445_vm2, %v441_v45, 0.0  ;;  %v759_v51 = vand.u32 4294901760, %v4510_v37  ;;  %v1958_v0 = vand.u32 4294901760, %v4514_v50 }
  0xc0   :  { %v286_v20 = vmul.f32 %v277_v59, %v4323_v58  ;;  %v294_v22 = vmul.f32 %v277_v59, %v4327_v61  ;;  %v272_v24 = vpop.permute.xlu1 %271  ;;  %470 = vrot.lane.b32.xlu1 %v4520_v62, %s4163_s28  ;;  %v756_v25 = vand.u32 4294901760, %v4520_v62  ;;  %v1955_v31 = vand.u32 4294901760, %v4524_v46 }
  0xc1   :  { %v285_v32 = vmul.f32 %v272_v24, %v4323_v58  ;;  %v293_v35 = vmul.f32 %v272_v24, %v4327_v61  ;;  %v4537_v36 = vsub.f32 %v4510_v37, %v759_v51  ;;  %v4540_v47 = vsub.f32 %v4514_v50, %v1958_v0 }
  0xc2   :  { %v302_v52 = vadd.f32 %v286_v20, %v188_v63  ;;  %v310_v55 = vadd.f32 %v294_v22, %v196_v23  ;;  %v4542_v1 = vpack.c.bf16 %v759_v51, %v756_v25  ;;  %v4545_v56 = vsub.f32 %v4520_v62, %v756_v25 }
  0xc3   :  { %6381 = vst [vmem:[#allocation29_spill] sm:$0xff] %v4537_v36  ;;  %6382 = vst [vmem:[#allocation30_spill] sm:$0xff] %v4540_v47  ;;  %v301_v57 = vadd.f32 %v285_v32, %v187_v14  ;;  %v309_v19 = vadd.f32 %v293_v35, %v195_v16  ;;  %v395_v4 = vpop.permute.xlu0 %394  ;;  %488 = vrot.lane.b32.xlu0 %v4514_v50, %s4163_s28  ;;  %v4549_v58 = vpack.c.bf16 %v1958_v0, %v1955_v31 }
  0xc4   :  { %6383 = vst [vmem:[#allocation31_spill] sm:$0xff] %v4542_v1  ;;  %6384 = vst [vmem:[#allocation32_spill] sm:$0xff] %v4545_v56  ;;  %v4552_v61 = vsub.f32 %v4524_v46, %v1955_v31  ;;  %v404_v10 = vmul.f32 %v395_v4, %v4340_v15  ;;  %v412_v23 = vmul.f32 %v395_v4, %v4343_v21  ;;  %v390_v63 = vpop.permute.xlu1 %389  ;;  %486 = vrot.lane.b32.xlu1 %v4524_v46, %s4163_s28 }
  0xc5   :  { %6385 = vst [vmem:[#allocation33_spill] sm:$0xff] %v4549_v58  ;;  %v1015_v41 = vand.u32 4294901760, %v4545_v56  ;;  %v1022_v45 = vand.u32 4294901760, %v4537_v36  ;;  %v403_v14 = vmul.f32 %v390_v63, %v4340_v15  ;;  %v411_v16 = vmul.f32 %v390_v63, %v4343_v21 }
  0xc6   :  { %6386 = vst [vmem:[#allocation34_spill] sm:$0xff] %v4552_v61  ;;  %v2214_v59 = vand.u32 4294901760, %v4552_v61  ;;  %v2221_v51 = vand.u32 4294901760, %v4540_v47  ;;  %v420_v0 = vadd.f32 %v404_v10, %v302_v52  ;;  %v428_v20 = vadd.f32 %v412_v23, %v310_v55 }
  0xc7   :  { %v1016_v22 = vsub.f32 %v4545_v56, %v1015_v41  ;;  %v1023_v24 = vsub.f32 %v4537_v36, %v1022_v45  ;;  %v419_v25 = vadd.f32 %v403_v14, %v301_v57  ;;  %v427_v31 = vadd.f32 %v411_v16, %v309_v19 }
  0xc8   :  { %v2215_v32 = vsub.f32 %v4552_v61, %v2214_v59  ;;  %v2222_v35 = vsub.f32 %v4540_v47, %v2221_v51  ;;  %v436_v4 = vmax.f32 %v420_v0, 0.0  ;;  %v444_v15 = vmax.f32 %v428_v20, 0.0 }
  0xc9   :  { %v1017_v27 = vand.u32 4294901760, %v1016_v22  ;;  %v1024_v21 = vand.u32 4294901760, %v1023_v24  ;;  %v435_v63 = vmax.f32 %v419_v25, 0.0  ;;  %v443_v13 = vmax.f32 %v427_v31, 0.0 }
  0xca   :  { %v2216_v43 = vand.u32 4294901760, %v2215_v32  ;;  %v2223_v12 = vand.u32 4294901760, %v2222_v35  ;;  %v4570_v52 = vsel %vm445_vm2, %v436_v4, 0.0  ;;  %v4574_v55 = vsel %vm445_vm2, %v444_v15, 0.0 }
  0xcb   :  { %v4576_v57 = vpack.c.bf16 %v1024_v21, %v1017_v27  ;;  %476 = vrot.lane.b32.xlu0 %v4570_v52, %s4163_s28  ;;  %v452_v10 = vsel %vm445_vm2, %v435_v63, 0.0  ;;  %v460_v23 = vsel %vm445_vm2, %v443_v13, 0.0  ;;  %v765_v14 = vand.u32 4294901760, %v4570_v52 }
  0xcc   :  { %v1964_v16 = vand.u32 4294901760, %v4574_v55  ;;  %474 = vrot.lane.b32.xlu1 %v452_v10, %s4163_s28  ;;  %v762_v27 = vand.u32 4294901760, %v452_v10  ;;  %v1961_v0 = vand.u32 4294901760, %v460_v23  ;;  %v4589_v20 = vpack.c.bf16 %v2223_v12, %v2216_v43 }
  0xcd   :  { %6387 = vst [vmem:[#allocation35_spill] sm:$0xff] %v4576_v57  ;;  %v4594_v24 = vsub.f32 %v4570_v52, %v765_v14  ;;  %v4599_v13 = vpack.c.bf16 %v1022_v45, %v1015_v41  ;;  %v4601_v31 = vpack.c.bf16 %v2221_v51, %v2214_v59 }
  0xce   :  { %6388 = vst [vmem:[#allocation36_spill] sm:$0xff] %v4589_v20  ;;  %v4597_v25 = vsub.f32 %v4574_v55, %v1964_v16  ;;  %v4603_v32 = vpack.c.bf16 %v765_v14, %v762_v27  ;;  %v4605_v35 = vsub.f32 %v452_v10, %v762_v27  ;;  %v4607_v4 = vpack.c.bf16 %v1964_v16, %v1961_v0 }
  0xcf   :  { %6389 = vst [vmem:[#allocation37_spill] sm:$0xff] %v4594_v24  ;;  %6391 = vst [vmem:[#allocation39_spill] sm:$0xff] %v4599_v13  ;;  %v4609_v43 = vsub.f32 %v460_v23, %v1961_v0  ;;  %492 = vrot.lane.b32.xlu0 %v4574_v55, %s4163_s28  ;;  %v1036_v12 = vand.u32 4294901760, %v4594_v24 }
  0xd0   :  { %6390 = vst [vmem:[#allocation38_spill] sm:$0xff] %v4597_v25  ;;  %6392 = vst [vmem:[#allocation40_spill] sm:$0xff] %v4601_v31  ;;  %v2235_v15 = vand.u32 4294901760, %v4597_v25  ;;  %490 = vrot.lane.b32.xlu1 %v460_v23, %s4163_s28  ;;  %v1029_v41 = vand.u32 4294901760, %v4605_v35 }
  0xd1   :  { %6393 = vst [vmem:[#allocation41_spill] sm:$0xff] %v4603_v32  ;;  %6394 = vst [vmem:[#allocation42_spill] sm:$0xff] %v4605_v35  ;;  %v2228_v45 = vand.u32 4294901760, %v4609_v43  ;;  %v1037_v21 = vsub.f32 %v4594_v24, %v1036_v12  ;;  %v612_v24 = vld [vmem:[%s6208_s3 + $0x30] sm:$0xff] }
  0xd2   :  { %6395 = vst [vmem:[#allocation43_spill] sm:$0xff] %v4607_v4  ;;  %6396 = vst [vmem:[#allocation44_spill] sm:$0xff] %v4609_v43  ;;  %v2236_v63 = vsub.f32 %v4597_v25, %v2235_v15  ;;  %v1030_v14 = vsub.f32 %v4605_v35, %v1029_v41  ;;  %v4626_v27 = vpack.c.bf16 %v1036_v12, %v1029_v41  ;;  %v3159_v12 = vld [vmem:[%s6210_s5 + $0x10] sm:$0xff]  ;;  %v3161_v41 = vld [vmem:[%s6210_s5 + $0x20] sm:$0xff] }
  0xd3   :  { %v2229_v16 = vsub.f32 %v4609_v43, %v2228_v45  ;;  %v4628_v0 = vpack.c.bf16 %v2235_v15, %v2228_v45  ;;  %544 = vrot.lane.b32.xlu0 %v4356_v44, %s4164_s16  ;;  %v1038_v22 = vand.u32 4294901760, %v1037_v21  ;;  %v607_v44 = vld [vmem:[%s6208_s3 + $0x8] sm:$0xff]  ;;  %v3164_v45 = vld [vmem:[%s6210_s5 + $0x38] sm:$0xff] }
  0xd4   :  { %6397 = vst [vmem:[#allocation45_spill] sm:$0xff] %v4626_v27  ;;  %v2237_v59 = vand.u32 4294901760, %v2236_v63  ;;  %542 = vrot.lane.b32.xlu1 %v4364_v49, %s4164_s16  ;;  %v1031_v51 = vand.u32 4294901760, %v1030_v14  ;;  %v696_v49 = vsel %vm694_vm3, %v607_v44, 0  ;;  %v3162_v15 = vld [vmem:[%s6210_s5 + $0x28] sm:$0xff]  ;;  %v3505_v63 = vld [vmem:[%s6210_s5 + $0x40] sm:$0xff] }
  0xd5   :  { %6398 = vst [vmem:[#allocation46_spill] sm:$0xff] %v4628_v0  ;;  %v2230_v19 = vand.u32 4294901760, %v2229_v16 }
  0xd6   :  { %v4634_v31 = vpack.c.bf16 %v1038_v22, %v1031_v51  ;;  %v3160_v22 = vld [vmem:[%s6210_s5 + $0x18] sm:$0xff]  ;;  %v3506_v51 = vld [vmem:[%s6210_s5 + $0x48] sm:$0xff] }
  0xd7   :  { %v4636_v13 = vpack.c.bf16 %v2237_v59, %v2230_v19  ;;  %560 = vrot.lane.b32.xlu0 %v4372_v53, %s4164_s16  ;;  %v4654_v53 = vand.u32 4294901760, %v696_v49  ;;  %v628_v19 = vld [vmem:[%s6209_s4 + $0x30] sm:$0xff] }
  0xd8   :  { %6399 = vst [vmem:[#allocation47_spill] sm:$0xff] %v4634_v31  ;;  %558 = vrot.lane.b32.xlu1 %v4376_v54, %s4164_s16  ;;  %v3163_v59 = vld [vmem:[%s6210_s5 + $0x30] sm:$0xff] }
  0xd9   :  { %6400 = vst [vmem:[#allocation48_spill] sm:$0xff] %v4636_v13  ;;  %6401 = vst [vmem:[#allocation49_spill] sm:$0xff] %v4654_v53  ;;  %v4657_v54 = vsub.f32 %v696_v49, %v4654_v53 }
  0xdb   :  { %548 = vrot.lane.b32.xlu0 %v4432_v5, %s4164_s16  ;;  %6402 = vst [vmem:[#allocation50_spill] sm:$0xff] %v4657_v54  ;;  %v4664_v5 = vand.u32 4294901760, %v4657_v54 }
  0xdc   :  { %546 = vrot.lane.b32.xlu1 %v4444_v6, %s4164_s16 }
  0xdd   :  { %6403 = vst [vmem:[#allocation51_spill] sm:$0xff] %v4664_v5 }
  0xdf   :  { %564 = vrot.lane.b32.xlu0 %v4436_v7, %s4164_s16  ;;  %v810_v7 = vsub.f32 %v4657_v54, %v4664_v5 }
  0xe0   :  { %562 = vrot.lane.b32.xlu1 %v4448_v11, %s4164_s16  ;;  %v623_v11 = vld [vmem:[%s6209_s4 + $0x8] sm:$0xff] }
  0xe1   :  { %v811_v6 = vand.u32 4294901760, %v810_v7 }
  0xe3   :  { %552 = vrot.lane.b32.xlu0 %v4510_v37, %s4164_s16  ;;  %812 = vmatprep.mubr.f32.mxu0 %v811_v6  ;;  %v622_v37 = vld [vmem:[%s6209_s4] sm:$0xff] }
  0xe4   :  { %550 = vrot.lane.b32.xlu1 %v4520_v62, %s4164_s16  ;;  %2011 = vmatprep.mubr.f32.mxu1 %v811_v6  ;;  %v624_v62 = vld [vmem:[%s6209_s4 + $0x10] sm:$0xff]  ;;  %v3513_v6 = vld [vmem:[%s6210_s5 + $0x80] sm:$0xff] }
  0xe7   :  { %568 = vrot.lane.b32.xlu0 %v4514_v50, %s4164_s16  ;;  %v625_v50 = vld [vmem:[%s6209_s4 + $0x18] sm:$0xff] }
  0xe8   :  { %566 = vrot.lane.b32.xlu1 %v4524_v46, %s4164_s16  ;;  %v627_v46 = vld [vmem:[%s6209_s4 + $0x28] sm:$0xff] }
  0xeb   :  { %556 = vrot.lane.b32.xlu0 %v4570_v52, %s4164_s16  ;;  %v626_v52 = vld [vmem:[%s6209_s4 + $0x20] sm:$0xff] }
  0xec   :  { %554 = vrot.lane.b32.xlu1 %v452_v10, %s4164_s16  ;;  %v3158_v10 = vld [vmem:[%s6210_s5 + $0x8] sm:$0xff] }
  0xef   :  { %572 = vrot.lane.b32.xlu0 %v4574_v55, %s4164_s16  ;;  %v629_v55 = vld [vmem:[%s6209_s4 + $0x38] sm:$0xff] }
  0xf0   :  { %570 = vrot.lane.b32.xlu1 %v460_v23, %s4164_s16  ;;  %v3157_v23 = vld [vmem:[%s6210_s5] sm:$0xff] }
  0xf3   :  { %661 = vperm.xlu0 %4136, %v623_v11  }
  0xf4   :  { %656 = vperm.xlu1 %4137, %v622_v37  }
  0xf7   :  { %671 = vperm.xlu0 %4136, %v625_v50   ;;  %v3507_v50 = vld [vmem:[%s6210_s5 + $0x50] sm:$0xff] }
  0xf8   :  { %666 = vperm.xlu1 %4137, %v624_v62  }
  0xfb   :  { %681 = vperm.xlu0 %4136, %v627_v46  }
  0xfc   :  { %676 = vperm.xlu1 %4137, %v626_v52  }
  0xff   :  { %691 = vperm.xlu0 %4136, %v629_v55  }
 0x100   :  { %686 = vperm.xlu1 %4137, %v628_v19  }
 0x103   :  { %3172 = vperm.xlu0 %4136, %v3158_v10  }
 0x104   :  { %3167 = vperm.xlu1 %4137, %v3157_v23  }
 0x107   :  { %3182 = vperm.xlu0 %4136, %v3160_v22  }
 0x108   :  { %3177 = vperm.xlu1 %4137, %v3159_v12  }
 0x10b   :  { %3192 = vperm.xlu0 %4136, %v3162_v15  }
 0x10c   :  { %3187 = vperm.xlu1 %4137, %v3161_v41   ;;  %v3508_v41 = vld [vmem:[%s6210_s5 + $0x58] sm:$0xff] }
 0x10f   :  { %3202 = vperm.xlu0 %4136, %v3164_v45  }
 0x110   :  { %3197 = vperm.xlu1 %4137, %v3163_v59  }
 0x111   :  { %v465_v21 = vpop.permute.xlu0 %464 }
 0x112   :  { %v495_v14 = vsel %vm82_vm0, %v465_v21, 0.0  ;;  %v463_v16 = vpop.permute.xlu1 %462  ;;  %v6408_v21 = vmov 0.0|0.0  }
 0x113   :  { %v723_v44 = vand.u32 4294901760, %v495_v14  ;;  %v494_v49 = vsel %vm82_vm0, %v463_v16, 0.0  ;;  %3237 = vperm.xlu0 %4136, %v3506_v51   ;;  %v3514_v51 = vld [vmem:[%s6210_s5 + $0x88] sm:$0xff] }
 0x114   :  { %v720_v7 = vand.u32 4294901760, %v494_v49  ;;  %3232 = vperm.xlu1 %4137, %v3505_v63  }
 0x115   :  { %v4739_v11 = vsub.f32 %v495_v14, %v723_v44  ;;  %v481_v37 = vpop.permute.xlu0 %480 }
 0x116   :  { %v4744_v62 = vpack.c.bf16 %v723_v44, %v720_v7  ;;  %v4746_v46 = vsub.f32 %v494_v49, %v720_v7  ;;  %v503_v52 = vsel %vm82_vm0, %v481_v37, 0.0  ;;  %v479_v55 = vpop.permute.xlu1 %478 }
 0x117   :  { %6404 = vst [vmem:[#allocation52_spill] sm:$0xff] %v4739_v11  ;;  %v938_v19 = vand.u32 4294901760, %v4739_v11  ;;  %v1922_v10 = vand.u32 4294901760, %v503_v52  ;;  %v502_v23 = vsel %vm82_vm0, %v479_v55, 0.0  ;;  %3361 = vperm.xlu0 %4136, %v3513_v6  }
 0x118   :  { %6405 = vst [vmem:[#allocation53_spill] sm:$0xff] %v4744_v62  ;;  %6406 = vst [vmem:[#allocation54_spill] sm:$0xff] %v4746_v46  ;;  %v931_v22 = vand.u32 4294901760, %v4746_v46  ;;  %v1919_v15 = vand.u32 4294901760, %v502_v23  ;;  %3524 = vmatpush1.bf16.msra.mxu0 %v4744_v62  ;;  %3242 = vperm.xlu1 %4137, %v3507_v50  }
 0x119   :  { %v939_v45 = vsub.f32 %v4739_v11, %v938_v19  ;;  %v4761_v59 = vsub.f32 %v503_v52, %v1922_v10  ;;  %3525 = vmatprep.subr.bf16.mxu0 %v6408_v21  ;;  %v3509_v52 = vld [vmem:[%s6210_s5 + $0x60] sm:$0xff] }
 0x11a   :  { %v932_v63 = vsub.f32 %v4746_v46, %v931_v22  ;;  %v4768_v14 = vpack.c.bf16 %v1922_v10, %v1919_v15  ;;  %v4770_v16 = vsub.f32 %v502_v23, %v1919_v15  ;;  %v4772_v44 = vpack.c.bf16 %v938_v19, %v931_v22  ;;  %v3515_v19 = vld [vmem:[%s6210_s5 + $0x90] sm:$0xff] }
 0x11b   :  { %6407 = vst [vmem:[#allocation55_spill] sm:$0xff] %v4761_v59  ;;  %v940_v49 = vand.u32 4294901760, %v939_v45  ;;  %v2137_v7 = vand.u32 4294901760, %v4761_v59  ;;  %3247 = vperm.xlu0 %4136, %v3508_v41   ;;  %v3510_v45 = vld [vmem:[%s6210_s5 + $0x68] sm:$0xff] }
 0x11c   :  { %6409 = vst [vmem:[#allocation56_spill] sm:$0xff] %v4768_v14  ;;  %6410 = vst [vmem:[#allocation57_spill] sm:$0xff] %v4770_v16  ;;  %v933_v6 = vand.u32 4294901760, %v932_v63  ;;  %v2130_v37 = vand.u32 4294901760, %v4770_v16  ;;  %3366 = vperm.xlu1 %4137, %v3514_v51   ;;  %3740 = vmatpush1.bf16.msra.mxu1 %v4768_v14  ;;  %v3516_v63 = vld [vmem:[%s6210_s5 + $0x98] sm:$0xff] }
 0x11d   :  { %6411 = vst [vmem:[#allocation58_spill] sm:$0xff] %v4772_v44  ;;  %v2138_v55 = vsub.f32 %v4761_v59, %v2137_v7  ;;  %3741 = vmatprep.subr.bf16.mxu1 %v6408_v21 }
 0x11e   :  { %v2131_v10 = vsub.f32 %v4770_v16, %v2130_v37  ;;  %v4788_v23 = vpack.c.bf16 %v940_v49, %v933_v6  ;;  %v4790_v22 = vpack.c.bf16 %v2137_v7, %v2130_v37 }
 0x11f   :  { %v2139_v15 = vand.u32 4294901760, %v2138_v55  ;;  %3252 = vperm.xlu0 %4136, %v3509_v52   ;;  %v3511_v55 = vld [vmem:[%s6210_s5 + $0x70] sm:$0xff] }
 0x120   :  { %6412 = vst [vmem:[#allocation59_spill] sm:$0xff] %v4790_v22  ;;  %v2132_v41 = vand.u32 4294901760, %v2131_v10  ;;  %3371 = vperm.xlu1 %4137, %v3515_v19  }
 0x121   :  { %v469_v51 = vpop.permute.xlu0 %468 }
 0x122   :  { %v497_v50 = vsel %vm82_vm0, %v469_v51, 0.0  ;;  %v467_v49 = vpop.permute.xlu1 %466  ;;  %v4800_v6 = vpack.c.bf16 %v2139_v15, %v2132_v41  ;;  %v3517_v51 = vld [vmem:[%s6210_s5 + $0xa0] sm:$0xff] }
 0x123   :  { %v729_v7 = vand.u32 4294901760, %v497_v50  ;;  %v496_v37 = vsel %vm82_vm0, %v467_v49, 0.0  ;;  %3257 = vperm.xlu0 %4136, %v3510_v45  }
 0x124   :  { %v726_v52 = vand.u32 4294901760, %v496_v37  ;;  %3376 = vperm.xlu1 %4137, %v3516_v63  }
 0x125   :  { %v4807_v19 = vsub.f32 %v497_v50, %v729_v7  ;;  %v485_v10 = vpop.permute.xlu0 %484 }
 0x126   :  { %v4812_v15 = vpack.c.bf16 %v729_v7, %v726_v52  ;;  %v4814_v41 = vsub.f32 %v496_v37, %v726_v52  ;;  %v505_v45 = vsel %vm82_vm0, %v485_v10, 0.0  ;;  %v483_v49 = vpop.permute.xlu1 %482  ;;  %v3512_v7 = vld [vmem:[%s6210_s5 + $0x78] sm:$0xff]  ;;  %v3518_v52 = vld [vmem:[%s6210_s5 + $0xa8] sm:$0xff] }
 0x127   :  { %6413 = vst [vmem:[#allocation60_spill] sm:$0xff] %v4807_v19  ;;  %v6216_v63 = vand.u32 4294901760, %v4807_v19  ;;  %v1928_v12 = vand.u32 4294901760, %v505_v45  ;;  %v504_v50 = vsel %vm82_vm0, %v483_v49, 0.0  ;;  %3262 = vperm.xlu0 %4136, %v3511_v55  }
 0x128   :  { %6414 = vst [vmem:[#allocation61_spill] sm:$0xff] %v4812_v15  ;;  %6415 = vst [vmem:[#allocation62_spill] sm:$0xff] %v4814_v41  ;;  %v6215_v0 = vand.u32 4294901760, %v4814_v41  ;;  %v1925_v27 = vand.u32 4294901760, %v504_v50  ;;  %3381 = vperm.xlu1 %4137, %v3517_v51   ;;  %3527 = vmatpush1.bf16.msra.mxu0 %v4812_v15 }
 0x129   :  { %v4826_v37 = vsub.f32 %v505_v45, %v1928_v12  ;;  %3528 = vmatprep.subr.bf16.mxu0 %v6408_v21 }
 0x12a   :  { %v4832_v10 = vpack.c.bf16 %v1928_v12, %v1925_v27  ;;  %v4834_v55 = vsub.f32 %v504_v50, %v1925_v27  ;;  %v4840_v51 = vpack.c.bf16 %v6216_v63, %v6215_v0  ;;  %v3520_v12 = vld [vmem:[%s6210_s5 + $0xb8] sm:$0xff]  ;;  %v3519_v27 = vld [vmem:[%s6210_s5 + $0xb0] sm:$0xff] }
 0x12b   :  { %6416 = vst [vmem:[#allocation63_spill] sm:$0xff] %v4826_v37  ;;  %v6222_v49 = vand.u32 4294901760, %v4826_v37  ;;  %3267 = vperm.xlu0 %4136, %v3512_v7  }
 0x12c   :  { %6417 = vst [vmem:[#allocation64_spill] sm:$0xff] %v4832_v10  ;;  %6418 = vst [vmem:[#allocation65_spill] sm:$0xff] %v4834_v55  ;;  %v6221_v45 = vand.u32 4294901760, %v4834_v55  ;;  %3386 = vperm.xlu1 %4137, %v3518_v52   ;;  %3743 = vmatpush1.bf16.msra.mxu1 %v4832_v10 }
 0x12d   :  { %6419 = vst [vmem:[#allocation66_spill] sm:$0xff] %v4840_v51  ;;  %3744 = vmatprep.subr.bf16.mxu1 %v6408_v21 }
 0x12e   :  { %v4856_v50 = vpack.c.bf16 %v6222_v49, %v6221_v45 }
 0x12f   :  { %3396 = vperm.xlu0 %4136, %v3520_v12  }
 0x130   :  { %6420 = vst [vmem:[#allocation67_spill] sm:$0xff] %v4856_v50  ;;  %3391 = vperm.xlu1 %4137, %v3519_v27  }
 0x131   :  { %v473_v7 = vpop.permute.xlu0 %472 }
 0x132   :  { %v499_v52 = vsel %vm82_vm0, %v473_v7, 0.0  ;;  %v471_v0 = vpop.permute.xlu1 %470 }
 0x133   :  { %v735_v63 = vand.u32 4294901760, %v499_v52  ;;  %v498_v29 = vsel %vm82_vm0, %v471_v0, 0.0  ;;  %v609_v0 = vld [vmem:[%s6208_s3 + $0x18] sm:$0xff] }
 0x134   :  { %v732_v22 = vand.u32 4294901760, %v498_v29  ;;  %v699_v45 = vsel %vm694_vm3, %v609_v0, 0 }
 0x135   :  { %v4862_v51 = vsub.f32 %v499_v52, %v735_v63  ;;  %v489_v44 = vpop.permute.xlu0 %488  ;;  %v611_v52 = vld [vmem:[%s6208_s3 + $0x28] sm:$0xff]  ;;  %v4907_v15 = vand.u32 4294901760, %v699_v45 }
 0x136   :  { %v4864_v5 = vpack.c.bf16 %v735_v63, %v732_v22  ;;  %v4866_v10 = vsub.f32 %v498_v29, %v732_v22  ;;  %v507_v12 = vsel %vm82_vm0, %v489_v44, 0.0  ;;  %v487_v27 = vpop.permute.xlu1 %486 }
 0x137   :  { %6421 = vst [vmem:[#allocation68_spill] sm:$0xff] %v4862_v51  ;;  %v1934_v7 = vand.u32 4294901760, %v507_v12  ;;  %v506_v49 = vsel %vm82_vm0, %v487_v27, 0.0  ;;  %v606_v27 = vld [vmem:[%s6208_s3] sm:$0xff]  ;;  %6429 = vst [vmem:[#allocation74_spill] sm:$0xff] %v4907_v15 }
 0x138   :  { %6422 = vst [vmem:[#allocation69_spill] sm:$0xff] %v4864_v5  ;;  %6423 = vst [vmem:[#allocation70_spill] sm:$0xff] %v4866_v10  ;;  %v1931_v63 = vand.u32 4294901760, %v506_v49  ;;  %3530 = vmatpush1.bf16.msra.mxu0 %v4864_v5  ;;  %v6425_v50 = vand.u32 4294901760, %v4866_v10  ;;  %v4905_v14 = vand.u32 4294901760, %v606_v27  ;;  %v6474_v28 = vand.u32 4294901760, %v4866_v10 }
 0x139   :  { %v4878_v29 = vsub.f32 %v507_v12, %v1934_v7  ;;  %3531 = vmatprep.subr.bf16.mxu0 %v6408_v21  ;;  %v6426_v12 = vand.u32 4294901760, %v4862_v51 }
 0x13a   :  { %v4881_v44 = vpack.c.bf16 %v1934_v7, %v1931_v63  ;;  %v4883_v22 = vsub.f32 %v506_v49, %v1931_v63  ;;  %v608_v49 = vld [vmem:[%s6208_s3 + $0x10] sm:$0xff]  ;;  %6428 = vst [vmem:[#allocation73_spill] sm:$0xff] %v4905_v14  ;;  %v613_v7 = vld [vmem:[%s6208_s3 + $0x38] sm:$0xff]  ;;  %v5197_v57 = vsub.f32 %v4866_v10, %v6474_v28 }
 0x13b   :  { %v4896_v5 = vpack.c.bf16 %v6426_v12, %v6425_v50  ;;  %v702_v50 = vsel %vm694_vm3, %v611_v52, 0  ;;  %v610_v12 = vld [vmem:[%s6208_s3 + $0x20] sm:$0xff]  ;;  %v6432_v43 = vand.u32 4294901760, %v4878_v29 }
 0x13c   :  { %6424 = vst [vmem:[#allocation71_spill] sm:$0xff] %v4881_v44  ;;  %3746 = vmatpush1.bf16.msra.mxu1 %v4881_v44  ;;  %v4918_v44 = vand.u32 4294901760, %v608_v49  ;;  %v6431_v62 = vand.u32 4294901760, %v4883_v22  ;;  %v4928_v47 = vand.u32 4294901760, %v702_v50  ;;  %v4930_v35 = vand.u32 4294901760, %v610_v12 }
 0x13d   :  { %6427 = vst [vmem:[#allocation72_spill] sm:$0xff] %v4896_v5  ;;  %v477_v0 = vpop.permute.xlu0 %476  ;;  %3747 = vmatprep.subr.bf16.mxu1 %v6408_v21 }
 0x13e   :  { %v501_v63 = vsel %vm82_vm0, %v477_v0, 0.0  ;;  %v475_v5 = vpop.permute.xlu1 %474  ;;  %6430 = vst [vmem:[#allocation75_spill] sm:$0xff] %v4918_v44  ;;  %v4924_v25 = vpack.c.bf16 %v6432_v43, %v6431_v62  ;;  %6434 = vst [vmem:[#allocation77_spill] sm:$0xff] %v4928_v47  ;;  %v705_v0 = vsel %vm694_vm3, %v613_v7, 0  ;;  %v4939_v43 = vsub.f32 %v606_v27, %v4905_v14 }
 0x13f   :  { %v741_v52 = vand.u32 4294901760, %v501_v63  ;;  %v500_v54 = vsel %vm82_vm0, %v475_v5, 0.0  ;;  %6435 = vst [vmem:[#allocation78_spill] sm:$0xff] %v4930_v35  ;;  %v4942_v62 = vsub.f32 %v699_v45, %v4907_v15  ;;  %v4953_v36 = vsub.f32 %v608_v49, %v4918_v44 }
 0x140   :  { %6433 = vst [vmem:[#allocation76_spill] sm:$0xff] %v4924_v25  ;;  %v738_v61 = vand.u32 4294901760, %v500_v54  ;;  %6436 = vst [vmem:[#allocation79_spill] sm:$0xff] %v4939_v43  ;;  %v4960_v45 = vand.u32 4294901760, %v705_v0  ;;  %v4976_v8 = vand.u32 4294901760, %v4939_v43 }
 0x141   :  { %v4936_v40 = vsub.f32 %v501_v63, %v741_v52  ;;  %v493_v30 = vpop.permute.xlu0 %492  ;;  %6437 = vst [vmem:[#allocation80_spill] sm:$0xff] %v4942_v62  ;;  %6439 = vst [vmem:[#allocation82_spill] sm:$0xff] %v4953_v36  ;;  %v4988_v49 = vand.u32 4294901760, %v4942_v62  ;;  %v4991_v63 = vand.u32 4294901760, %v4953_v36 }
 0x142   :  { %v4944_v5 = vpack.c.bf16 %v741_v52, %v738_v61  ;;  %v4946_v25 = vsub.f32 %v500_v54, %v738_v61  ;;  %v4950_v7 = vsel %vm82_vm0, %v493_v30, 0.0  ;;  %v491_v56 = vpop.permute.xlu1 %490  ;;  %6440 = vst [vmem:[#allocation83_spill] sm:$0xff] %v4960_v45  ;;  %v4962_v52 = vand.u32 4294901760, %v612_v24  ;;  %6444 = vst [vmem:[#allocation87_spill] sm:$0xff] %v4976_v8  ;;  %v615_v61 = vld [vmem:[%s6208_s3 + $0x48] sm:$0xff] }
 0x143   :  { %v4958_v27 = vsel %vm82_vm0, %v491_v56, 0.0  ;;  %v4967_v30 = vsub.f32 %v702_v50, %v4928_v47  ;;  %v4970_v54 = vsub.f32 %v610_v12, %v4930_v35  ;;  %6448 = vst [vmem:[#allocation89_spill] sm:$0xff] %v4988_v49  ;;  %6449 = vst [vmem:[#allocation90_spill] sm:$0xff] %v4991_v63  ;;  %v4994_v34 = vsub.f32 %v705_v0, %v4960_v45  ;;  %v614_v0 = vld [vmem:[%s6208_s3 + $0x40] sm:$0xff]  ;;  %v617_v47 = vld [vmem:[%s6208_s3 + $0x58] sm:$0xff] }
 0x144   :  { %6438 = vst [vmem:[#allocation81_spill] sm:$0xff] %v4944_v5  ;;  %6441 = vst [vmem:[#allocation84_spill] sm:$0xff] %v4962_v52  ;;  %3533 = vmatpush1.bf16.msra.mxu0 %v4944_v5  ;;  %v6445_v50 = vand.u32 4294901760, %v4958_v27  ;;  %v6446_v5 = vand.u32 4294901760, %v4950_v7  ;;  %v4997_v26 = vsub.f32 %v612_v24, %v4962_v52  ;;  %v708_v3 = vsel %vm694_vm3, %v615_v61, 0 }
 0x145   :  { %6442 = vst [vmem:[#allocation85_spill] sm:$0xff] %v4967_v30  ;;  %6443 = vst [vmem:[#allocation86_spill] sm:$0xff] %v4970_v54  ;;  %v545_v56 = vpop.permute.xlu0 %544  ;;  %3534 = vmatprep.subr.bf16.mxu0 %v6408_v21  ;;  %v816_v24 = vsub.f32 %v4939_v43, %v4976_v8  ;;  %v825_v61 = vsub.f32 %v4942_v62, %v4988_v49  ;;  %v831_v35 = vsub.f32 %v4953_v36, %v4991_v63 }
 0x146   :  { %v4985_v12 = vpack.c.bf16 %v6446_v5, %v6445_v50  ;;  %v543_v18 = vpop.permute.xlu1 %542  ;;  %6450 = vst [vmem:[#allocation91_spill] sm:$0xff] %v4994_v34  ;;  %6451 = vst [vmem:[#allocation92_spill] sm:$0xff] %v4997_v26  ;;  %v5002_v5 = vand.u32 4294901760, %v4967_v30  ;;  %v5005_v50 = vand.u32 4294901760, %v4970_v54  ;;  %v5029_v16 = vand.u32 4294901760, %v4994_v34 }
 0x147   :  { %v5032_v8 = vand.u32 4294901760, %v4997_v26  ;;  %v5034_v43 = vand.u32 4294901760, %v708_v3  ;;  %v6461_v63 = vand.u32 4294901760, %v4807_v19  ;;  %v6462_v36 = vand.u32 4294901760, %v4814_v41 }
 0x148   :  { %6447 = vst [vmem:[#allocation88_spill] sm:$0xff] %v4985_v12  ;;  %3536 = vmatpush1.bf16.msra.mxu0 %v4385_v2  ;;  %3749 = vmatpush1.bf16.msra.mxu1 %v4985_v12  ;;  %6452 = vst [vmem:[#allocation93_spill] sm:$0xff] %v5002_v5  ;;  %v6454_v12 = vand.u32 4294901760, %v4946_v25  ;;  %v6455_v2 = vand.u32 4294901760, %v4936_v40  ;;  %v6469_v13 = vand.u32 4294901760, %v4950_v7  ;;  %v6470_v31 = vand.u32 4294901760, %v4958_v27 }
 0x149   :  { %6453 = vst [vmem:[#allocation94_spill] sm:$0xff] %v5005_v50  ;;  %v561_v60 = vpop.permute.xlu0 %560  ;;  %3537 = vmatprep.subr.bf16.mxu0 %v6408_v21  ;;  %3750 = vmatprep.subr.bf16.mxu1 %v6408_v21  ;;  %6457 = vst [vmem:[#allocation96_spill] sm:$0xff] %v5029_v16  ;;  %v953_v49 = vsub.f32 %v4807_v19, %v6461_v63  ;;  %v946_v62 = vsub.f32 %v4814_v41, %v6462_v36  ;;  %v575_v63 = vsel %vm313_vm1, %v545_v56, 0.0 }
 0x14a   :  { %v5019_v52 = vpack.c.bf16 %v6455_v2, %v6454_v12  ;;  %v559_v45 = vpop.permute.xlu1 %558  ;;  %6458 = vst [vmem:[#allocation97_spill] sm:$0xff] %v5032_v8  ;;  %6459 = vst [vmem:[#allocation98_spill] sm:$0xff] %v5034_v43  ;;  %v5036_v2 = vand.u32 4294901760, %v614_v0  ;;  %v840_v12 = vsub.f32 %v4967_v30, %v5002_v5  ;;  %v711_v5 = vsel %vm694_vm3, %v617_v47, 0 }
 0x14b   :  { %v5064_v30 = vand.u32 4294901760, %v831_v35  ;;  %v861_v47 = vsub.f32 %v4997_v26, %v5032_v8  ;;  %v5071_v44 = vsub.f32 %v708_v3, %v5034_v43  ;;  %v5082_v56 = vand.u32 4294901760, %v711_v5 }
 0x14c   :  { %6456 = vst [vmem:[#allocation95_spill] sm:$0xff] %v5019_v52  ;;  %6460 = vst [vmem:[#allocation99_spill] sm:$0xff] %v5036_v2  ;;  %3539 = vmatpush1.bf16.msra.mxu0 %v4466_v33  ;;  %3752 = vmatpush1.bf16.msra.mxu1 %v4401_v17  ;;  %v846_v52 = vsub.f32 %v4970_v54, %v5005_v50  ;;  %v5052_v17 = vand.u32 4294901760, %v816_v24  ;;  %v619_v50 = vld [vmem:[%s6208_s3 + $0x68] sm:$0xff]  ;;  %v574_v33 = vsel %vm313_vm1, %v543_v18, 0.0  ;;  %v5062_v54 = vand.u32 4294901760, %v825_v61 }
 0x14d   :  { %v549_v59 = vpop.permute.xlu0 %548  ;;  %3540 = vmatprep.subr.bf16.mxu0 %v6408_v21  ;;  %3753 = vmatprep.subr.bf16.mxu1 %v6408_v21  ;;  %v855_v24 = vsub.f32 %v4994_v34, %v5029_v16  ;;  %v5074_v15 = vsub.f32 %v614_v0, %v5036_v2  ;;  %v5078_v18 = vand.u32 4294901760, %v840_v12  ;;  %6463 = vst [vmem:[#allocation100_spill] sm:$0xff] %v5082_v56  ;;  %v5085_v61 = vsel %vm694_vm3, %v619_v50, 0  ;;  %v5092_v0 = vld [vmem:[%s6208_s3 + $0x50] sm:$0xff] }
 0x14e   :  { %v547_v36 = vpop.permute.xlu1 %546  ;;  %v5080_v35 = vand.u32 4294901760, %v846_v52  ;;  %v954_v8 = vand.u32 4294901760, %v953_v49  ;;  %v947_v16 = vand.u32 4294901760, %v946_v62  ;;  %v771_v3 = vand.u32 4294901760, %v575_v63 }
 0x14f   :  { %v768_v26 = vand.u32 4294901760, %v574_v33  ;;  %v583_v52 = vsel %vm313_vm1, %v561_v60, 0.0  ;;  %v582_v50 = vsel %vm313_vm1, %v559_v45, 0.0  ;;  %v5100_v62 = vsel %vm313_vm1, %v549_v59, 0.0 }
 0x150   :  { %3542 = vmatpush1.bf16.msra.mxu0 %v4542_v1  ;;  %3755 = vmatpush1.bf16.msra.mxu1 %v4473_v39  ;;  %v5104_v49 = vsel %vm313_vm1, %v547_v36, 0.0  ;;  %v5106_v39 = vand.u32 4294901760, %v855_v24  ;;  %v5108_v1 = vand.u32 4294901760, %v861_v47  ;;  %v5111_v2 = vand.u32 4294901760, %v5071_v44 }
 0x151   :  { %v565_v34 = vpop.permute.xlu0 %564  ;;  %3543 = vmatprep.subr.bf16.mxu0 %v6408_v21  ;;  %3756 = vmatprep.subr.bf16.mxu1 %v6408_v21  ;;  %v5114_v60 = vand.u32 4294901760, %v5074_v15  ;;  %v6466_v45 = vand.u32 4294901760, %v4826_v37  ;;  %v5124_v36 = vsub.f32 %v711_v5, %v5082_v56  ;;  %v5127_v24 = vand.u32 4294901760, %v5092_v0  ;;  %v621_v5 = vld [vmem:[%s6208_s3 + $0x78] sm:$0xff] }
 0x152   :  { %v563_v12 = vpop.permute.xlu1 %562  ;;  %6464 = vst [vmem:[#allocation101_spill] sm:$0xff] %v5108_v1  ;;  %6465 = vst [vmem:[#allocation102_spill] sm:$0xff] %v5111_v2  ;;  %v5130_v47 = vand.u32 4294901760, %v5085_v61  ;;  %v1970_v43 = vand.u32 4294901760, %v583_v52  ;;  %v1967_v19 = vand.u32 4294901760, %v582_v50  ;;  %v777_v41 = vand.u32 4294901760, %v5100_v62 }
 0x153   :  { %v5119_v59 = vsub.f32 %v4826_v37, %v6466_v45  ;;  %v774_v45 = vand.u32 4294901760, %v5104_v49  ;;  %v5144_v56 = vpack.c.bf16 %v771_v3, %v768_v26  ;;  %v585_v46 = vsel %vm313_vm1, %v565_v34, 0.0 }
 0x154   :  { %3545 = vmatpush1.bf16.msra.mxu0 %v4603_v32  ;;  %3758 = vmatpush1.bf16.msra.mxu1 %v4549_v58  ;;  %v6467_v58 = vand.u32 4294901760, %v4834_v55  ;;  %v5148_v14 = vpack.c.bf16 %v954_v8, %v947_v16  ;;  %v5153_v53 = vsub.f32 %v4950_v7, %v6469_v13  ;;  %v584_v20 = vsel %vm313_vm1, %v563_v12, 0.0 }
 0x155   :  { %v553_v37 = vpop.permute.xlu0 %552  ;;  %3546 = vmatprep.subr.bf16.mxu0 %v6408_v21  ;;  %3759 = vmatprep.subr.bf16.mxu1 %v6408_v21  ;;  %6468 = vst [vmem:[#allocation103_spill] sm:$0xff] %v5144_v56  ;;  %v5164_v34 = vsub.f32 %v4958_v27, %v6470_v31  ;;  %v5166_v8 = vsub.f32 %v575_v63, %v771_v3  ;;  %v5173_v13 = vsel %vm694_vm3, %v621_v5, 0  ;;  %v1976_v12 = vand.u32 4294901760, %v585_v46 }
 0x156   :  { %v5142_v32 = vsub.f32 %v4834_v55, %v6467_v58  ;;  %v551_v11 = vpop.permute.xlu1 %550  ;;  %v579_v58 = vsel %vm313_vm1, %v553_v37, 0.0  ;;  %v5168_v16 = vsub.f32 %v574_v33, %v768_v26  ;;  %v5175_v37 = vsub.f32 %v583_v52, %v1970_v43 }
 0x157   :  { %v578_v55 = vsel %vm313_vm1, %v551_v11, 0.0  ;;  %v5177_v7 = vpack.c.bf16 %v1970_v43, %v1967_v19  ;;  %v5179_v11 = vpack.c.bf16 %v777_v41, %v774_v45  ;;  %v1973_v26 = vand.u32 4294901760, %v584_v20 }
 0x158   :  { %3548 = vmatpush1.bf16.msra.mxu0 %v5144_v56  ;;  %3761 = vmatpush1.bf16.msra.mxu1 %v4607_v4  ;;  %v783_v33 = vand.u32 4294901760, %v579_v58  ;;  %v780_v27 = vand.u32 4294901760, %v578_v55  ;;  %v6473_v5 = vand.u32 4294901760, %v4862_v51  ;;  %v5205_v43 = vsub.f32 %v582_v50, %v1967_v19 }
 0x159   :  { %6471 = vst [vmem:[#allocation104_spill] sm:$0xff] %v5177_v7  ;;  %6472 = vst [vmem:[#allocation105_spill] sm:$0xff] %v5179_v11  ;;  %v569_v31 = vpop.permute.xlu0 %568  ;;  %3549 = vmatprep.subr.bf16.mxu0 %v6408_v21  ;;  %3762 = vmatprep.subr.bf16.mxu1 %v6408_v21  ;;  %v5217_v19 = vsub.f32 %v5100_v62, %v777_v41  ;;  %v5220_v50 = vsub.f32 %v5104_v49, %v774_v45 }
 0x15a   :  { %v587_v63 = vsel %vm313_vm1, %v569_v31, 0.0  ;;  %v567_v3 = vpop.permute.xlu1 %566  ;;  %v5190_v4 = vsub.f32 %v4862_v51, %v6473_v5  ;;  %v5210_v31 = vpack.c.bf16 %v1976_v12, %v1973_v26  ;;  %v5212_v52 = vpack.c.bf16 %v783_v33, %v780_v27 }
 0x15b   :  { %v586_v56 = vsel %vm313_vm1, %v567_v3, 0.0  ;;  %v1982_v3 = vand.u32 4294901760, %v587_v63  ;;  %v5224_v10 = vsub.f32 %v585_v46, %v1976_v12  ;;  %v5226_v28 = vsub.f32 %v584_v20, %v1973_v26 }
 0x15c   :  { %3551 = vmatpush1.bf16.msra.mxu0 %v5179_v11  ;;  %3764 = vmatpush1.bf16.msra.mxu1 %v5177_v7  ;;  %v1979_v51 = vand.u32 4294901760, %v586_v56  ;;  %v5228_v42 = vsub.f32 %v579_v58, %v783_v33  ;;  %v5233_v41 = vsub.f32 %v578_v55, %v780_v27  ;;  %v6341_v12 = vand.u32 4294901760, %v5217_v19 }
 0x15d   :  { %v557_v48 = vpop.permute.xlu0 %556  ;;  %3552 = vmatprep.subr.bf16.mxu0 %v6408_v21  ;;  %3765 = vmatprep.subr.bf16.mxu1 %v6408_v21  ;;  %v5235_v62 = vsub.f32 %v587_v63, %v1982_v3  ;;  %v6340_v63 = vand.u32 4294901760, %v5220_v50 }
 0x15e   :  { %v581_v9 = vsel %vm313_vm1, %v557_v48, 0.0  ;;  %v555_v7 = vpop.permute.xlu1 %554  ;;  %v5237_v49 = vpack.c.bf16 %v1982_v3, %v1979_v51  ;;  %v5250_v26 = vsub.f32 %v586_v56, %v1979_v51  ;;  %v6479_v56 = vand.u32 4294901760, %v5153_v53 }
 0x15f   :  { %v789_v5 = vand.u32 4294901760, %v581_v9  ;;  %v580_v11 = vsel %vm313_vm1, %v555_v7, 0.0  ;;  %v6490_v38 = vand.u32 4294901760, %v5233_v41 }
 0x160   :  { %v786_v1 = vand.u32 4294901760, %v580_v11  ;;  %3554 = vmatpush1.bf16.msra.mxu0 %v5212_v52  ;;  %3767 = vmatpush1.bf16.msra.mxu1 %v5210_v31  ;;  %6475 = vst [vmem:[#allocation106_spill] sm:$0xff] %v5237_v49 }
 0x161   :  { %v573_v45 = vpop.permute.xlu0 %572  ;;  %3555 = vmatprep.subr.bf16.mxu0 %v6408_v21  ;;  %3768 = vmatprep.subr.bf16.mxu1 %v6408_v21  ;;  %v5241_v20 = vsub.f32 %v581_v9, %v789_v5 }
 0x162   :  { %v5243_v46 = vpack.c.bf16 %v789_v5, %v786_v1  ;;  %v5245_v58 = vsub.f32 %v580_v11, %v786_v1  ;;  %v589_v7 = vsel %vm313_vm1, %v573_v45, 0.0  ;;  %v571_v55 = vpop.permute.xlu1 %570  ;;  %v6481_v45 = vand.u32 4294901760, %v5168_v16 }
 0x163   :  { %v1988_v33 = vand.u32 4294901760, %v589_v7  ;;  %v588_v27 = vsel %vm313_vm1, %v571_v55, 0.0  ;;  %v6482_v55 = vand.u32 4294901760, %v5166_v8 }
 0x164   :  { %6476 = vst [vmem:[#allocation107_spill] sm:$0xff] %v5243_v46  ;;  %v1985_v1 = vand.u32 4294901760, %v588_v27  ;;  %3557 = vmatpush1.bf16.msra.mxu0 %v5243_v46  ;;  %3770 = vmatpush1.bf16.msra.mxu1 %v5237_v49  ;;  %v6510_v46 = vand.u32 4294901760, %v5164_v34 }
 0x165   :  { %v5262_v3 = vsub.f32 %v589_v7, %v1988_v33  ;;  %3558 = vmatprep.subr.bf16.mxu0 %v6408_v21  ;;  %3771 = vmatprep.subr.bf16.mxu1 %v6408_v21  ;;  %v6478_v7 = vand.u32 4294901760, %v5164_v34 }
 0x166   :  { %v5268_v9 = vpack.c.bf16 %v1988_v33, %v1985_v1  ;;  %v5270_v5 = vsub.f32 %v588_v27, %v1985_v1  ;;  %v5285_v33 = vpack.c.bf16 %v6482_v55, %v6481_v45  ;;  %v968_v27 = vand.u32 4294901760, %v5190_v4 }
 0x167   :  { %818 = vmatmul.mubr.f32.vlgmr.msra.gmra.mrb[0].mxu0 %v5052_v17  ;;  %v5279_v48 = vpack.c.bf16 %v6479_v56, %v6478_v7  ;;  %v6484_v1 = vand.u32 4294901760, %v4878_v29  ;;  %v618_v56 = vld [vmem:[%s6208_s3 + $0x60] sm:$0xff]  ;;  %v5301_v45 = vpack.c.bf16 %v6341_v12, %v6340_v63  ;;  %v961_v4 = vand.u32 4294901760, %v5197_v57 }
 0x168   :  { %6477 = vst [vmem:[#allocation108_spill] sm:$0xff] %v5268_v9  ;;  %6483 = vst [vmem:[#allocation110_spill] sm:$0xff] %v5285_v33  ;;  %3560 = vmatpush1.bf16.msra.mxu0 %v4788_v23  ;;  %3773 = vmatpush1.bf16.msra.mxu1 %v5268_v9  ;;  %v6486_v55 = vand.u32 4294901760, %v4883_v22  ;;  %v6487_v23 = vand.u32 4294901760, %v5205_v43  ;;  %v6491_v63 = vand.u32 4294901760, %v5228_v42  ;;  %v6493_v57 = vand.u32 4294901760, %v4936_v40 }
 0x169   :  { %6480 = vst [vmem:[#allocation109_spill] sm:$0xff] %v5279_v48  ;;  %v2166_v51 = vsub.f32 %v4878_v29, %v6484_v1  ;;  %6485 = vst [vmem:[#allocation111_spill] sm:$0xff] %v5301_v45  ;;  %3561 = vmatprep.subr.bf16.mxu0 %v6408_v21  ;;  %3774 = vmatprep.subr.bf16.mxu1 %v6408_v21  ;;  %v6488_v1 = vand.u32 4294901760, %v5175_v37  ;;  %v6494_v45 = vand.u32 4294901760, %v4946_v25  ;;  %v6495_v48 = vand.u32 4294901760, %v5226_v28 }
 0x16a   :  { %v2159_v7 = vsub.f32 %v4883_v22, %v6486_v55  ;;  %v5319_v12 = vpack.c.bf16 %v6491_v63, %v6490_v38  ;;  %v981_v55 = vsub.f32 %v4936_v40, %v6493_v57  ;;  %827 = vmatprep.mubr.f32.mxu0 %v5062_v54  ;;  %v6499_v38 = vand.u32 4294901760, %v5241_v20 }
 0x16b   :  { %v5313_v11 = vpack.c.bf16 %v6488_v1, %v6487_v23  ;;  %v974_v33 = vsub.f32 %v4946_v25, %v6494_v45  ;;  %v6496_v23 = vand.u32 4294901760, %v5224_v10  ;;  %2017 = vmatmul.mubr.f32.vlgmr.msra.gmra.mrb[0].mxu1 %v5052_v17  ;;  %833 = vmatmul.mubr.f32.gmra.mrb[2].mxu0 %v5064_v30  ;;  %v5344_v45 = vsub.f32 %v5092_v0, %v5127_v24 }
 0x16c   :  { %6492 = vst [vmem:[#allocation113_spill] sm:$0xff] %v5319_v12  ;;  %v5346_v57 = vand.u32 4294901760, %v618_v56  ;;  %v6501_v12 = vand.u32 4294901760, %v5250_v26  ;;  %3563 = vmatpush1.bf16.msra.mxu0 %v5148_v14  ;;  %3776 = vmatpush1.bf16.msra.mxu1 %v4800_v6  ;;  %v870_v17 = vsub.f32 %v5071_v44, %v5111_v2  ;;  %v5365_v0 = vand.u32 4294901760, %v5124_v36 }
 0x16d   :  { %6489 = vst [vmem:[#allocation112_spill] sm:$0xff] %v5313_v11  ;;  %v5332_v1 = vpack.c.bf16 %v6496_v23, %v6495_v48  ;;  %v6498_v11 = vand.u32 4294901760, %v5245_v58  ;;  %v6502_v48 = vand.u32 4294901760, %v5235_v62  ;;  %v2167_v14 = vand.u32 4294901760, %v2166_v51  ;;  %3564 = vmatprep.subr.bf16.mxu0 %v6408_v21  ;;  %3777 = vmatprep.subr.bf16.mxu1 %v6408_v21 }
 0x16e   :  { %v3565_v6 = vpack.c.bf16 %v968_v27, %v961_v4  ;;  %v975_v2 = vand.u32 4294901760, %v974_v33  ;;  %v6509_v9 = vand.u32 4294901760, %v5153_v53  ;;  %v2173_v51 = vsub.f32 %v5164_v34, %v6510_v46  ;;  %842 = vmatprep.mubr.f32.mxu0 %v5078_v18  ;;  %2026 = vmatprep.mubr.f32.mxu1 %v5062_v54 }
 0x16f   :  { %6497 = vst [vmem:[#allocation114_spill] sm:$0xff] %v5332_v1  ;;  %v5338_v63 = vpack.c.bf16 %v6499_v38, %v6498_v11  ;;  %v5352_v23 = vpack.c.bf16 %v6502_v48, %v6501_v12  ;;  %v6504_v1 = vand.u32 4294901760, %v5270_v5  ;;  %v6505_v11 = vand.u32 4294901760, %v5262_v3  ;;  %848 = vmatmul.mubr.f32.gmra.mrb[4].mxu0 %v5080_v35  ;;  %2032 = vmatmul.mubr.f32.gmra.mrb[2].mxu1 %v5064_v30 }
 0x170   :  { %v5369_v12 = vsub.f32 %v5085_v61, %v5130_v47  ;;  %v5372_v48 = vand.u32 4294901760, %v5173_v13  ;;  %v2180_v49 = vsub.f32 %v5153_v53, %v6509_v9  ;;  %v5399_v9 = vsub.f32 %v618_v56, %v5346_v57  ;;  %3566 = vmatpush1.bf16.msra.mxu0 %v3565_v6  ;;  %857 = vmatprep.mubr.f32.mxu0 %v5106_v39 }
 0x171   :  { %6500 = vst [vmem:[#allocation115_spill] sm:$0xff] %v5338_v63  ;;  %6503 = vst [vmem:[#allocation116_spill] sm:$0xff] %v5352_v23  ;;  %v5358_v38 = vpack.c.bf16 %v6505_v11, %v6504_v1  ;;  %v620_v1 = vld [vmem:[%s6208_s3 + $0x70] sm:$0xff]  ;;  %v2160_v11 = vand.u32 4294901760, %v2159_v7  ;;  %v6508_v23 = vand.u32 4294901760, %v5119_v59  ;;  %v982_v63 = vand.u32 4294901760, %v981_v55  ;;  %3567 = vmatprep.subr.bf16.mxu0 %v6408_v21  ;;  %2041 = vmatprep.mubr.f32.mxu1 %v5078_v18 }
 0x172   :  { %v5396_v59 = vand.u32 4294901760, %v5344_v45  ;;  %v5401_v33 = vand.u32 4294901760, %v620_v1  ;;  %v871_v54 = vand.u32 4294901760, %v870_v17  ;;  %v885_v30 = vsub.f32 %v5124_v36, %v5365_v0  ;;  %s4167_s3 = smov [#allocation5]  }
 0x173   :  { %6506 = vst [vmem:[#allocation117_spill] sm:$0xff] %v5358_v38  ;;  %v6507_v38 = vand.u32 4294901760, %v5142_v32  ;;  %v876_v32 = vsub.f32 %v5074_v15, %v5114_v60  ;;  %v5408_v46 = vand.u32 4294901760, %v5369_v12  ;;  %v5412_v27 = vsub.f32 %v5173_v13, %v5372_v48  ;;  %2047 = vmatmul.mubr.f32.gmra.mrb[4].mxu1 %v5080_v35 }
 0x174   :  { %6511 = vst [vmem:[#allocation118_spill] sm:$0xff] %v5396_v59  ;;  %v2181_v56 = vand.u32 4294901760, %v2180_v49  ;;  %v2174_v4 = vand.u32 4294901760, %v2173_v51  ;;  %v3568_v7 = vpack.c.bf16 %v982_v63, %v975_v2  ;;  %v3781_v55 = vpack.c.bf16 %v2167_v14, %v2160_v11  ;;  %2056 = vmatprep.mubr.f32.mxu1 %v5106_v39  ;;  %v6517_v11 = vld [vmem:[#allocation16_spill] sm:$0xff] }
 0x175   :  { %v3778_v61 = vpack.c.bf16 %v6508_v23, %v6507_v38  ;;  %6512 = vst [vmem:[#allocation119_spill] sm:$0xff] %v5408_v46  ;;  %v6513_v23 = vld [vmem:[#allocation101_spill] sm:$0xff]  ;;  %v877_v38 = vand.u32 4294901760, %v876_v32  ;;  %v891_v17 = vsub.f32 %v5344_v45, %v5396_v59  ;;  %v5421_v6 = vand.u32 4294901760, %v5399_v9 }
 0x176   :  { %863 = vmatmul.mubr.f32.gmra.mrb[6].mxu0 %v6513_v23  ;;  %v5424_v13 = vsub.f32 %v620_v1, %v5401_v33  ;;  %v3784_v2 = vpack.c.bf16 %v2181_v56, %v2174_v4  ;;  %v886_v18 = vand.u32 4294901760, %v885_v30  ;;  %v900_v35 = vsub.f32 %v5369_v12, %v5408_v46  ;;  %v6518_v30 = vld [vmem:[#allocation27_spill] sm:$0xff]  ;;  %v6519_v56 = vld [vmem:[#allocation18_spill] sm:$0xff] }
 0x177   :  { %3779 = vmatpush1.bf16.msra.mxu1 %v3778_v61  ;;  %6514 = vst [vmem:[#allocation101_spill] sm:$0xff] %v5421_v6  ;;  %3569 = vmatpush1.bf16.msra.mxu0 %v3568_v7  ;;  %v5432_v49 = vand.u32 4294901760, %v5412_v27  ;;  %v892_v63 = vand.u32 4294901760, %v891_v17  ;;  %v906_v1 = vsub.f32 %v5399_v9, %v5421_v6  ;;  %v6520_v4 = vand.u32 4294901760, %v5166_v8  ;;  %v6522_v17 = vld [vmem:[#allocation35_spill] sm:$0xff] }
 0x178   :  { %3780 = vmatprep.subr.bf16.mxu1 %v6408_v21  ;;  %3570 = vmatprep.subr.bf16.mxu0 %v6408_v21  ;;  %v5438_v14 = vand.u32 4294901760, %v5424_v13  ;;  %v901_v39 = vand.u32 4294901760, %v900_v35 }
 0x179   :  { %872 = vmatprep.mubr.f32.mxu0 %v871_v54  ;;  %6515 = vst [vmem:[#allocation120_spill] sm:$0xff] %v5432_v49  ;;  %2062 = vmatmul.mubr.f32.gmra.mrb[6].mxu1 %v6513_v23  ;;  %v915_v61 = vsub.f32 %v5412_v27, %v5432_v49  ;;  %v907_v51 = vand.u32 4294901760, %v906_v1  ;;  %v1051_v7 = vsub.f32 %v5166_v8, %v6520_v4  ;;  %v6524_v1 = vand.u32 4294901760, %v5175_v37 }
 0x17a   :  { %878 = vmatmul.mubr.f32.gmra.mrb[8].mxu0 %v877_v38  ;;  %6516 = vst [vmem:[#allocation121_spill] sm:$0xff] %v5438_v14  ;;  %2071 = vmatprep.mubr.f32.mxu1 %v871_v54  ;;  %v921_v32 = vsub.f32 %v5424_v13, %v5438_v14  ;;  %v6521_v54 = vand.u32 4294901760, %v5168_v16 }
 0x17b   :  { %3782 = vmatpush1.bf16.msra.mxu1 %v3781_v55  ;;  %3572 = vmatpush1.bf16.msra.mxu0 %v6517_v11  ;;  %v916_v23 = vand.u32 4294901760, %v915_v61  ;;  %v1052_v35 = vand.u32 4294901760, %v1051_v7  ;;  %v2250_v11 = vsub.f32 %v5175_v37, %v6524_v1  ;;  %v6528_v7 = vand.u32 4294901760, %v5224_v10  ;;  %v6531_v1 = vld [vmem:[#allocation36_spill] sm:$0xff] }
 0x17c   :  { %3783 = vmatprep.subr.bf16.mxu1 %v6408_v21  ;;  %3573 = vmatprep.subr.bf16.mxu0 %v6408_v21  ;;  %v1044_v55 = vsub.f32 %v5168_v16, %v6521_v54 }
 0x17d   :  { %887 = vmatprep.mubr.f32.mxu0 %v886_v18  ;;  %2077 = vmatmul.mubr.f32.gmra.mrb[8].mxu1 %v877_v38  ;;  %v922_v38 = vand.u32 4294901760, %v921_v32  ;;  %v2264_v54 = vsub.f32 %v5224_v10, %v6528_v7 }
 0x17e   :  { %893 = vmatmul.mubr.f32.gmra.mrb[10].mxu0 %v892_v63  ;;  %2086 = vmatprep.mubr.f32.mxu1 %v886_v18  ;;  %v6525_v18 = vand.u32 4294901760, %v5205_v43 }
 0x17f   :  { %3785 = vmatpush1.bf16.msra.mxu1 %v3784_v2  ;;  %3575 = vmatpush1.bf16.msra.mxu0 %v6518_v30  ;;  %v6523_v2 = vld [vmem:[#allocation28_spill] sm:$0xff]  ;;  %v1045_v30 = vand.u32 4294901760, %v1044_v55  ;;  %v6529_v55 = vand.u32 4294901760, %v5226_v28 }
 0x180   :  { %3786 = vmatprep.subr.bf16.mxu1 %v6408_v21  ;;  %3576 = vmatprep.subr.bf16.mxu0 %v6408_v21  ;;  %v2243_v61 = vsub.f32 %v5205_v43, %v6525_v18  ;;  %v2251_v18 = vand.u32 4294901760, %v2250_v11  ;;  %v2265_v11 = vand.u32 4294901760, %v2264_v54 }
 0x181   :  { %902 = vmatprep.mubr.f32.mxu0 %v901_v39  ;;  %2092 = vmatmul.mubr.f32.gmra.mrb[10].mxu1 %v892_v63  ;;  %v6526_v63 = vand.u32 4294901760, %v5217_v19  ;;  %v3583_v49 = vpack.c.bf16 %v1052_v35, %v1045_v30 }
 0x182   :  { %908 = vmatmul.mubr.f32.gmra.mrb[12].mxu0 %v907_v51  ;;  %2101 = vmatprep.mubr.f32.mxu1 %v901_v39  ;;  %v6533_v39 = vand.u32 4294901760, %v5233_v41  ;;  %v2244_v7 = vand.u32 4294901760, %v2243_v61  ;;  %v6537_v61 = vand.u32 4294901760, %v5250_v26 }
 0x183   :  { %3788 = vmatpush1.bf16.msra.mxu1 %v6519_v56  ;;  %3578 = vmatpush1.bf16.msra.mxu0 %v6522_v17  ;;  %v1065_v32 = vsub.f32 %v5217_v19, %v6526_v63  ;;  %v6527_v56 = vand.u32 4294901760, %v5220_v50  ;;  %v2257_v17 = vsub.f32 %v5226_v28, %v6529_v55  ;;  %v6532_v63 = vand.u32 4294901760, %v5228_v42 }
 0x184   :  { %3789 = vmatprep.subr.bf16.mxu1 %v6408_v21  ;;  %3579 = vmatprep.subr.bf16.mxu0 %v6408_v21 }
 0x185   :  { %v1058_v4 = vsub.f32 %v5220_v50, %v6527_v56  ;;  %917 = vmatprep.mubr.f32.mxu0 %v916_v23  ;;  %2107 = vmatmul.mubr.f32.gmra.mrb[12].mxu1 %v907_v51  ;;  %v1079_v56 = vsub.f32 %v5228_v42, %v6532_v63  ;;  %v1072_v51 = vsub.f32 %v5233_v41, %v6533_v39  ;;  %v1066_v14 = vand.u32 4294901760, %v1065_v32  ;;  %v6535_v63 = vld [vmem:[#allocation48_spill] sm:$0xff] }
 0x186   :  { %923 = vmatmul.mubr.f32.gmra.mrb[14].mxu0 %v922_v38  ;;  %2116 = vmatprep.mubr.f32.mxu1 %v916_v23  ;;  %v6536_v39 = vand.u32 4294901760, %v5235_v62  ;;  %v2271_v32 = vsub.f32 %v5250_v26, %v6537_v61  ;;  %v6538_v23 = vand.u32 4294901760, %v5241_v20  ;;  %v6540_v61 = vand.u32 4294901760, %v5262_v3 }
 0x187   :  { %3791 = vmatpush1.bf16.msra.mxu1 %v6523_v2  ;;  %v6530_v2 = vld [vmem:[#allocation47_spill] sm:$0xff]  ;;  %v1059_v55 = vand.u32 4294901760, %v1058_v4  ;;  %v1080_v6 = vand.u32 4294901760, %v1079_v56  ;;  %v1073_v46 = vand.u32 4294901760, %v1072_v51  ;;  %v3799_v4 = vpack.c.bf16 %v2251_v18, %v2244_v7 }
 0x188   :  { %3792 = vmatprep.subr.bf16.mxu1 %v6408_v21  ;;  %3581 = vmatpush1.bf16.msra.mxu0 %v6530_v2  ;;  %v6534_v2 = vld [vmem:[#allocation49_spill] sm:$0xff]  ;;  %v2278_v59 = vsub.f32 %v5235_v62, %v6536_v39 }
 0x189   :  { %3582 = vmatprep.subr.bf16.mxu0 %v6408_v21  ;;  %1113 = vmatprep.mubr.f32.mxu0 %v6534_v2  ;;  %v3586_v30 = vpack.c.bf16 %v1066_v14, %v1059_v55  ;;  %v3589_v56 = vpack.c.bf16 %v1080_v6, %v1073_v46  ;;  %v6541_v14 = vand.u32 4294901760, %v5270_v5 }
 0x18a   :  { %2122 = vmatmul.mubr.f32.gmra.mrb[14].mxu1 %v922_v38  ;;  %v6539_v38 = vand.u32 4294901760, %v5245_v58  ;;  %v2279_v54 = vand.u32 4294901760, %v2278_v59 }
 0x18b   :  { %3794 = vmatpush1.bf16.msra.mxu1 %v6531_v1  ;;  %v2258_v1 = vand.u32 4294901760, %v2257_v17  ;;  %2312 = vmatprep.mubr.f32.mxu1 %v6534_v2  ;;  %v2272_v17 = vand.u32 4294901760, %v2271_v32  ;;  %v2285_v18 = vsub.f32 %v5270_v5, %v6541_v14  ;;  %v6544_v32 = vld [vmem:[#allocation54_spill] sm:$0xff]  ;;  %v6556_v14 = vld [vmem:[#allocation68_spill] sm:$0xff] }
 0x18c   :  { %3795 = vmatprep.subr.bf16.mxu1 %v6408_v21  ;;  %3584 = vmatpush1.bf16.msra.mxu0 %v3583_v49  ;;  %v1093_v49 = vsub.f32 %v5241_v20, %v6538_v23  ;;  %v1086_v35 = vsub.f32 %v5245_v58, %v6539_v38  ;;  %v2292_v23 = vsub.f32 %v5262_v3, %v6540_v61  ;;  %v6546_v38 = vld [vmem:[#allocation62_spill] sm:$0xff] }
 0x18d   :  { %3585 = vmatprep.subr.bf16.mxu0 %v6408_v21  ;;  %v3802_v51 = vpack.c.bf16 %v2265_v11, %v2258_v1  ;;  %v2286_v7 = vand.u32 4294901760, %v2285_v18  ;;  %v3805_v6 = vpack.c.bf16 %v2279_v54, %v2272_v17  ;;  %v6542_v11 = vld [vmem:[#allocation73_spill] sm:$0xff]  ;;  %v6543_v1 = vld [vmem:[#allocation52_spill] sm:$0xff]  ;;  %v6549_v54 = vld [vmem:[#allocation75_spill] sm:$0xff] }
 0x18e   :  { %v1087_v39 = vand.u32 4294901760, %v1086_v35  ;;  %v2293_v59 = vand.u32 4294901760, %v2292_v23  ;;  %v6547_v35 = vld [vmem:[#allocation60_spill] sm:$0xff]  ;;  %v6550_v17 = vld [vmem:[#allocation55_spill] sm:$0xff]  ;;  %v6555_v23 = vld [vmem:[#allocation70_spill] sm:$0xff] }
 0x18f   :  { %3797 = vmatpush1.bf16.msra.mxu1 %v6535_v63  ;;  %v1094_v63 = vand.u32 4294901760, %v1093_v49  ;;  %v6545_v49 = vpack.c.bf16 %v6543_v1, %v6544_v32  ;;  %v3601_v18 = vpack.c.bf16 %v6556_v14, %v6555_v23  ;;  %v6560_v1 = vld [vmem:[#allocation84_spill] sm:$0xff]  ;;  %v6564_v32 = vld [vmem:[#allocation11_spill] sm:$0xff] }
 0x190   :  { %3798 = vmatprep.subr.bf16.mxu1 %v6408_v21  ;;  %3587 = vmatpush1.bf16.msra.mxu0 %v3586_v30  ;;  %v3808_v55 = vpack.c.bf16 %v2293_v59, %v2286_v7  ;;  %v3598_v30 = vpack.c.bf16 %v6547_v35, %v6546_v38  ;;  %v6557_v59 = vld [vmem:[#allocation77_spill] sm:$0xff]  ;;  %v6558_v7 = vld [vmem:[#allocation78_spill] sm:$0xff]  ;;  %v6566_v38 = vld [vmem:[#allocation100_spill] sm:$0xff] }
 0x191   :  { %3588 = vmatprep.subr.bf16.mxu0 %v6408_v21  ;;  %v3592_v46 = vpack.c.bf16 %v1094_v63, %v1087_v39  ;;  %v6553_v63 = vld [vmem:[#allocation65_spill] sm:$0xff]  ;;  %v6554_v39 = vld [vmem:[#allocation63_spill] sm:$0xff]  ;;  %v6577_v23 = vld [vmem:[#allocation24_spill] sm:$0xff] }
 0x192   :  { %v3814_v61 = vpack.c.bf16 %v6554_v39, %v6553_v63  ;;  %v6574_v63 = vld [vmem:[#allocation32_spill] sm:$0xff] }
 0x193   :  { %3800 = vmatpush1.bf16.msra.mxu1 %v3799_v4  ;;  %v6548_v4 = vld [vmem:[#allocation74_spill] sm:$0xff] }
 0x194   :  { %3801 = vmatprep.subr.bf16.mxu1 %v6408_v21  ;;  %3590 = vmatpush1.bf16.msra.mxu0 %v3589_v56  ;;  %v6551_v56 = vld [vmem:[#allocation57_spill] sm:$0xff] }
 0x195   :  { %3591 = vmatprep.subr.bf16.mxu0 %v6408_v21 }
 0x197   :  { %3803 = vmatpush1.bf16.msra.mxu1 %v3802_v51  ;;  %v6552_v51 = vpack.c.bf16 %v6550_v17, %v6551_v56  ;;  %v6571_v17 = vld [vmem:[#allocation12_spill] sm:$0xff] }
 0x198   :  { %3804 = vmatprep.subr.bf16.mxu1 %v6408_v21  ;;  %3593 = vmatpush1.bf16.msra.mxu0 %v3592_v46  ;;  %v3817_v46 = vpack.c.bf16 %v4878_v29, %v4883_v22  ;;  %v3820_v29 = vpack.c.bf16 %v5153_v53, %v5164_v34  ;;  %v6561_v22 = vld [vmem:[#allocation98_spill] sm:$0xff]  ;;  %v6567_v53 = vld [vmem:[#allocation19_spill] sm:$0xff] }
 0x199   :  { %3594 = vmatprep.subr.bf16.mxu0 %v6408_v21  ;;  %v6568_v34 = vld [vmem:[#allocation22_spill] sm:$0xff] }
 0x19a   :  { %v6569_v35 = vpack.c.bf16 %v6567_v53, %v6568_v34  ;;  %v6585_v53 = vld [vmem:[#allocation50_spill] sm:$0xff] }
 0x19b   :  { %3806 = vmatpush1.bf16.msra.mxu1 %v3805_v6  ;;  %1115 = vmatmul.mubr.f32.vlgmr.msra.gmra.mrb[0].mxu0 %v6542_v11  ;;  %v3604_v6 = vpack.c.bf16 %v4936_v40, %v4946_v25  ;;  %v6562_v40 = vld [vmem:[#allocation99_spill] sm:$0xff]  ;;  %v6563_v25 = vld [vmem:[#allocation9_spill] sm:$0xff]  ;;  %v6586_v34 = vld [vmem:[#allocation38_spill] sm:$0xff] }
 0x19c   :  { %3807 = vmatprep.subr.bf16.mxu1 %v6408_v21  ;;  %3596 = vmatpush1.bf16.msra.mxu0 %v6545_v49  ;;  %v6565_v49 = vpack.c.bf16 %v6563_v25, %v6564_v32  ;;  %v6583_v25 = vld [vmem:[#allocation34_spill] sm:$0xff] }
 0x19d   :  { %3597 = vmatprep.subr.bf16.mxu0 %v6408_v21  ;;  %1120 = vmatprep.mubr.f32.mxu0 %v6548_v4 }
 0x19f   :  { %3809 = vmatpush1.bf16.msra.mxu1 %v3808_v55  ;;  %1122 = vmatmul.mubr.f32.gmra.mrb[2].mxu0 %v6549_v54  ;;  %v6559_v55 = vld [vmem:[#allocation83_spill] sm:$0xff] }
 0x1a0   :  { %3810 = vmatprep.subr.bf16.mxu1 %v6408_v21  ;;  %3599 = vmatpush1.bf16.msra.mxu0 %v3598_v30  ;;  %v6570_v30 = vld [vmem:[#allocation14_spill] sm:$0xff] }
 0x1a1   :  { %3600 = vmatprep.subr.bf16.mxu0 %v6408_v21  ;;  %1127 = vmatprep.mubr.f32.mxu0 %v6557_v59  ;;  %v6572_v56 = vpack.c.bf16 %v6570_v30, %v6571_v17  ;;  %v3835_v17 = vpack.c.bf16 %v5175_v37, %v5205_v43  ;;  %v3841_v37 = vpack.c.bf16 %v5235_v62, %v5250_v26  ;;  %v6594_v62 = vld [vmem:[#allocation56_spill] sm:$0xff]  ;;  %v6597_v26 = vld [vmem:[#allocation69_spill] sm:$0xff] }
 0x1a2   :  { %2314 = vmatmul.mubr.f32.vlgmr.msra.gmra.mrb[0].mxu1 %v6542_v11  ;;  %v3628_v43 = vpack.c.bf16 %v5241_v20, %v5245_v58  ;;  %v6595_v20 = vld [vmem:[#allocation85_spill] sm:$0xff]  ;;  %v6596_v58 = vld [vmem:[#allocation86_spill] sm:$0xff] }
 0x1a3   :  { %3812 = vmatpush1.bf16.msra.mxu1 %v6552_v51  ;;  %2319 = vmatprep.mubr.f32.mxu1 %v6548_v4  ;;  %v6573_v51 = vld [vmem:[#allocation29_spill] sm:$0xff] }
 0x1a4   :  { %3813 = vmatprep.subr.bf16.mxu1 %v6408_v21  ;;  %1129 = vmatmul.mubr.f32.gmra.mrb[4].mxu0 %v6558_v7  ;;  %v6575_v39 = vpack.c.bf16 %v6573_v51, %v6574_v63  ;;  %v6600_v51 = vld [vmem:[#allocation92_spill] sm:$0xff]  ;;  %v6601_v63 = vld [vmem:[#allocation81_spill] sm:$0xff] }
 0x1a5   :  { %3602 = vmatpush1.bf16.msra.mxu0 %v3601_v18  ;;  %1134 = vmatprep.mubr.f32.mxu0 %v6559_v55  ;;  %v6579_v18 = vld [vmem:[#allocation37_spill] sm:$0xff] }
 0x1a6   :  { %2321 = vmatmul.mubr.f32.gmra.mrb[2].mxu1 %v6549_v54  ;;  %3603 = vmatprep.subr.bf16.mxu0 %v6408_v21 }
 0x1a7   :  { %3815 = vmatpush1.bf16.msra.mxu1 %v3814_v61  ;;  %2326 = vmatprep.mubr.f32.mxu1 %v6557_v59  ;;  %v6576_v61 = vld [vmem:[#allocation20_spill] sm:$0xff] }
 0x1a8   :  { %3816 = vmatprep.subr.bf16.mxu1 %v6408_v21  ;;  %1136 = vmatmul.mubr.f32.gmra.mrb[6].mxu0 %v6560_v1  ;;  %v6578_v14 = vpack.c.bf16 %v6576_v61, %v6577_v23  ;;  %v6603_v61 = vld [vmem:[#allocation10_spill] sm:$0xff]  ;;  %v6604_v23 = vld [vmem:[#allocation88_spill] sm:$0xff] }
 0x1a9   :  { %3605 = vmatpush1.bf16.msra.mxu0 %v3604_v6  ;;  %1141 = vmatprep.mubr.f32.mxu0 %v6561_v22 }
 0x1aa   :  { %2328 = vmatmul.mubr.f32.gmra.mrb[4].mxu1 %v6558_v7  ;;  %3606 = vmatprep.subr.bf16.mxu0 %v6408_v21 }
 0x1ab   :  { %3818 = vmatpush1.bf16.msra.mxu1 %v3817_v46  ;;  %2333 = vmatprep.mubr.f32.mxu1 %v6559_v55  ;;  %v6580_v46 = vld [vmem:[#allocation42_spill] sm:$0xff] }
 0x1ac   :  { %3819 = vmatprep.subr.bf16.mxu1 %v6408_v21  ;;  %1143 = vmatmul.mubr.f32.gmra.mrb[8].mxu0 %v6562_v40  ;;  %v6581_v6 = vpack.c.bf16 %v6579_v18, %v6580_v46  ;;  %v6606_v18 = vld [vmem:[#allocation13_spill] sm:$0xff]  ;;  %v6608_v46 = vld [vmem:[#allocation23_spill] sm:$0xff] }
 0x1ad   :  { %3608 = vmatpush1.bf16.msra.mxu0 %v6565_v49  ;;  %1148 = vmatprep.mubr.f32.mxu0 %v6566_v38  ;;  %v3619_v49 = vpack.c.bf16 %v5166_v8, %v5168_v16  ;;  %v3622_v8 = vpack.c.bf16 %v5217_v19, %v5220_v50  ;;  %v3838_v16 = vpack.c.bf16 %v5224_v10, %v5226_v28  ;;  %v6589_v10 = vld [vmem:[#allocation79_spill] sm:$0xff]  ;;  %v6590_v28 = vld [vmem:[#allocation53_spill] sm:$0xff]  ;;  %v6591_v19 = vld [vmem:[#allocation80_spill] sm:$0xff] }
 0x1ae   :  { %2335 = vmatmul.mubr.f32.gmra.mrb[6].mxu1 %v6560_v1  ;;  %3609 = vmatprep.subr.bf16.mxu0 %v6408_v21  ;;  %v6592_v50 = vld [vmem:[#allocation82_spill] sm:$0xff] }
 0x1af   :  { %3821 = vmatpush1.bf16.msra.mxu1 %v3820_v29  ;;  %2340 = vmatprep.mubr.f32.mxu1 %v6561_v22  ;;  %v6582_v29 = vld [vmem:[#allocation30_spill] sm:$0xff] }
 0x1b0   :  { %3822 = vmatprep.subr.bf16.mxu1 %v6408_v21  ;;  %1150 = vmatmul.mubr.f32.gmra.mrb[10].mxu0 %v5127_v24  ;;  %v6584_v32 = vpack.c.bf16 %v6582_v29, %v6583_v25  ;;  %v6615_v29 = vld [vmem:[#allocation104_spill] sm:$0xff]  ;;  %v6618_v25 = vld [vmem:[#allocation87_spill] sm:$0xff] }
 0x1b1   :  { %3611 = vmatpush1.bf16.msra.mxu0 %v6569_v35  ;;  %1155 = vmatprep.mubr.f32.mxu0 %v5130_v47  ;;  %v6587_v35 = vld [vmem:[#allocation44_spill] sm:$0xff] }
 0x1b2   :  { %2342 = vmatmul.mubr.f32.gmra.mrb[8].mxu1 %v6562_v40  ;;  %3612 = vmatprep.subr.bf16.mxu0 %v6408_v21  ;;  %v6588_v30 = vpack.c.bf16 %v6586_v34, %v6587_v35  ;;  %v6622_v34 = vld [vmem:[#allocation90_spill] sm:$0xff] }
 0x1b3   :  { %3824 = vmatpush1.bf16.msra.mxu1 %v6572_v56  ;;  %2347 = vmatprep.mubr.f32.mxu1 %v6566_v38  ;;  %v3625_v56 = vpack.c.bf16 %v5228_v42, %v5233_v41  ;;  %v3844_v42 = vpack.c.bf16 %v5262_v3, %v5270_v5  ;;  %v6593_v41 = vld [vmem:[#allocation61_spill] sm:$0xff]  ;;  %v6598_v5 = vld [vmem:[#allocation64_spill] sm:$0xff]  ;;  %v6599_v3 = vld [vmem:[#allocation91_spill] sm:$0xff] }
 0x1b4   :  { %3825 = vmatprep.subr.bf16.mxu1 %v6408_v21  ;;  %1157 = vmatmul.mubr.f32.gmra.mrb[12].mxu0 %v5346_v57  ;;  %v6623_v35 = vld [vmem:[#allocation66_spill] sm:$0xff] }
 0x1b5   :  { %3614 = vmatpush1.bf16.msra.mxu0 %v6575_v39  ;;  %1162 = vmatprep.mubr.f32.mxu0 %v5372_v48  ;;  %v6602_v39 = vld [vmem:[#allocation71_spill] sm:$0xff] }
 0x1b6   :  { %2349 = vmatmul.mubr.f32.gmra.mrb[10].mxu1 %v5127_v24  ;;  %3615 = vmatprep.subr.bf16.mxu0 %v6408_v21 }
 0x1b7   :  { %3827 = vmatpush1.bf16.msra.mxu1 %v6578_v14  ;;  %2354 = vmatprep.mubr.f32.mxu1 %v5130_v47  ;;  %v6605_v14 = vld [vmem:[#allocation21_spill] sm:$0xff] }
 0x1b8   :  { %3828 = vmatprep.subr.bf16.mxu1 %v6408_v21  ;;  %1164 = vmatmul.mubr.f32.gmra.mrb[14].mxu0 %v5401_v33 }
 0x1b9   :  { %3617 = vmatpush1.bf16.msra.mxu0 %v6581_v6  ;;  %1283 = vmatprep.mubr.f32.mxu0 %v6585_v53  ;;  %v6612_v6 = vld [vmem:[#allocation103_spill] sm:$0xff] }
 0x1ba   :  { %2356 = vmatmul.mubr.f32.gmra.mrb[12].mxu1 %v5346_v57  ;;  %3618 = vmatprep.subr.bf16.mxu0 %v6408_v21 }
 0x1bb   :  { %3830 = vmatpush1.bf16.msra.mxu1 %v6584_v32  ;;  %2361 = vmatprep.mubr.f32.mxu1 %v5372_v48  ;;  %v6619_v32 = vld [vmem:[#allocation58_spill] sm:$0xff] }
 0x1bc   :  { %3831 = vmatprep.subr.bf16.mxu1 %v6408_v21 }
 0x1bd   :  { %3620 = vmatpush1.bf16.msra.mxu0 %v3619_v49  ;;  %v6620_v49 = vld [vmem:[#allocation108_spill] sm:$0xff] }
 0x1be   :  { %2363 = vmatmul.mubr.f32.gmra.mrb[14].mxu1 %v5401_v33  ;;  %3621 = vmatprep.subr.bf16.mxu0 %v6408_v21 }
 0x1bf   :  { %3833 = vmatpush1.bf16.msra.mxu1 %v6588_v30  ;;  %2482 = vmatprep.mubr.f32.mxu1 %v6585_v53  ;;  %v6621_v53 = vld [vmem:[#allocation89_spill] sm:$0xff]  ;;  %v6624_v30 = vld [vmem:[#allocation59_spill] sm:$0xff] }
 0x1c0   :  { %3834 = vmatprep.subr.bf16.mxu1 %v6408_v21 }
 0x1c1   :  { %3623 = vmatpush1.bf16.msra.mxu0 %v3622_v8  ;;  %v6626_v8 = vld [vmem:[#allocation94_spill] sm:$0xff] }
 0x1c2   :  { %3624 = vmatprep.subr.bf16.mxu0 %v6408_v21 }
 0x1c3   :  { %3836 = vmatpush1.bf16.msra.mxu1 %v3835_v17  ;;  %v6625_v17 = vld [vmem:[#allocation93_spill] sm:$0xff] }
 0x1c4   :  { %3837 = vmatprep.subr.bf16.mxu1 %v6408_v21 }
 0x1c5   :  { %3626 = vmatpush1.bf16.msra.mxu0 %v3625_v56  ;;  %v6628_v56 = vld [vmem:[#allocation67_spill] sm:$0xff] }
 0x1c6   :  { %3627 = vmatprep.subr.bf16.mxu0 %v6408_v21 }
 0x1c7   :  { %3839 = vmatpush1.bf16.msra.mxu1 %v3838_v16  ;;  %v6627_v16 = vld [vmem:[#allocation72_spill] sm:$0xff] }
 0x1c8   :  { %3840 = vmatprep.subr.bf16.mxu1 %v6408_v21 }
 0x1c9   :  { %3629 = vmatpush1.bf16.msra.mxu0 %v3628_v43  ;;  %v6630_v43 = vld [vmem:[#allocation97_spill] sm:$0xff] }
 0x1ca   :  { %3630 = vmatprep.subr.bf16.mxu0 %v6408_v21 }
 0x1cb   :  { %3842 = vmatpush1.bf16.msra.mxu1 %v3841_v37  ;;  %v6629_v37 = vld [vmem:[#allocation96_spill] sm:$0xff] }
 0x1cc   :  { %3843 = vmatprep.subr.bf16.mxu1 %v6408_v21  ;;  %1286 = vmatmul.mubr.f32.vlgmr.msra.gmra.mrb[0].mxu0 %v6589_v10 }
 0x1cd   :  { %3632 = vmatpush1.bf16.msra.mxu0 %v6590_v28  ;;  %1292 = vmatprep.mubr.f32.mxu0 %v6591_v19 }
 0x1ce   :  { %3633 = vmatprep.subr.bf16.mxu0 %v6408_v21 }
 0x1cf   :  { %3845 = vmatpush1.bf16.msra.mxu1 %v3844_v42  ;;  %v6631_v42 = vld [vmem:[#allocation95_spill] sm:$0xff] }
 0x1d0   :  { %3846 = vmatprep.subr.bf16.mxu1 %v6408_v21  ;;  %1295 = vmatmul.mubr.f32.gmra.mrb[2].mxu0 %v6592_v50 }
 0x1d1   :  { %3635 = vmatpush1.bf16.msra.mxu0 %v6593_v41  ;;  %1301 = vmatprep.mubr.f32.mxu0 %v6595_v20 }
 0x1d2   :  { %2485 = vmatmul.mubr.f32.vlgmr.msra.gmra.mrb[0].mxu1 %v6589_v10  ;;  %3636 = vmatprep.subr.bf16.mxu0 %v6408_v21  ;;  %v6632_v10 = vld [vmem:[#allocation76_spill] sm:$0xff] }
 0x1d3   :  { %3848 = vmatpush1.bf16.msra.mxu1 %v6594_v62  ;;  %2491 = vmatprep.mubr.f32.mxu1 %v6591_v19  ;;  %v6633_v19 = vld [vmem:[#allocation102_spill] sm:$0xff] }
 0x1d4   :  { %3849 = vmatprep.subr.bf16.mxu1 %v6408_v21  ;;  %1304 = vmatmul.mubr.f32.gmra.mrb[4].mxu0 %v6596_v58 }
 0x1d5   :  { %3638 = vmatpush1.bf16.msra.mxu0 %v6597_v26  ;;  %1310 = vmatprep.mubr.f32.mxu0 %v6599_v3 }
 0x1d6   :  { %2494 = vmatmul.mubr.f32.gmra.mrb[2].mxu1 %v6592_v50  ;;  %3639 = vmatprep.subr.bf16.mxu0 %v6408_v21  ;;  %v6634_v50 = vld [vmem:[#allocation15_spill] sm:$0xff] }
 0x1d7   :  { %3851 = vmatpush1.bf16.msra.mxu1 %v6598_v5  ;;  %2500 = vmatprep.mubr.f32.mxu1 %v6595_v20  ;;  %v6635_v20 = vld [vmem:[#allocation109_spill] sm:$0xff] }
 0x1d8   :  { %3852 = vmatprep.subr.bf16.mxu1 %v6408_v21  ;;  %1313 = vmatmul.mubr.f32.gmra.mrb[6].mxu0 %v6600_v51 }
 0x1d9   :  { %3641 = vmatpush1.bf16.msra.mxu0 %v6601_v63  ;;  %1319 = vmatprep.mubr.f32.mxu0 %v5071_v44 }
 0x1da   :  { %2503 = vmatmul.mubr.f32.gmra.mrb[4].mxu1 %v6596_v58  ;;  %3642 = vmatprep.subr.bf16.mxu0 %v6408_v21  ;;  %v6636_v58 = vld [vmem:[#allocation118_spill] sm:$0xff] }
 0x1db   :  { %3854 = vmatpush1.bf16.msra.mxu1 %v6602_v39  ;;  %2509 = vmatprep.mubr.f32.mxu1 %v6599_v3  ;;  %v6637_v3 = vld [vmem:[#allocation25_spill] sm:$0xff] }
 0x1dc   :  { %3855 = vmatprep.subr.bf16.mxu1 %v6408_v21  ;;  %1322 = vmatmul.mubr.f32.gmra.mrb[8].mxu0 %v5074_v15 }
 0x1dd   :  { %3644 = vmatpush1.bf16.msra.mxu0 %v6603_v61  ;;  %1328 = vmatprep.mubr.f32.mxu0 %v5124_v36 }
 0x1de   :  { %2512 = vmatmul.mubr.f32.gmra.mrb[6].mxu1 %v6600_v51  ;;  %3645 = vmatprep.subr.bf16.mxu0 %v6408_v21  ;;  %v6638_v51 = vld [vmem:[#allocation17_spill] sm:$0xff] }
 0x1df   :  { %3857 = vmatpush1.bf16.msra.mxu1 %v6604_v23  ;;  %2518 = vmatprep.mubr.f32.mxu1 %v5071_v44  ;;  %v6607_v44 = vld [vmem:[#allocation31_spill] sm:$0xff] }
 0x1e0   :  { %3858 = vmatprep.subr.bf16.mxu1 %v6408_v21  ;;  %1331 = vmatmul.mubr.f32.gmra.mrb[10].mxu0 %v5344_v45 }
 0x1e1   :  { %3647 = vmatpush1.bf16.msra.mxu0 %v6605_v14  ;;  %1337 = vmatprep.mubr.f32.mxu0 %v5369_v12 }
 0x1e2   :  { %2521 = vmatmul.mubr.f32.gmra.mrb[8].mxu1 %v5074_v15  ;;  %3648 = vmatprep.subr.bf16.mxu0 %v6408_v21  ;;  %v6609_v15 = vld [vmem:[#allocation41_spill] sm:$0xff] }
 0x1e3   :  { %3860 = vmatpush1.bf16.msra.mxu1 %v6606_v18  ;;  %2527 = vmatprep.mubr.f32.mxu1 %v5124_v36  ;;  %v6610_v36 = vld [vmem:[#allocation33_spill] sm:$0xff] }
 0x1e4   :  { %3861 = vmatprep.subr.bf16.mxu1 %v6408_v21  ;;  %1340 = vmatmul.mubr.f32.gmra.mrb[12].mxu0 %v5399_v9 }
 0x1e5   :  { %3650 = vmatpush1.bf16.msra.mxu0 %v6607_v44  ;;  %1346 = vmatprep.mubr.f32.mxu0 %v5412_v27 }
 0x1e6   :  { %2530 = vmatmul.mubr.f32.gmra.mrb[10].mxu1 %v5344_v45  ;;  %3651 = vmatprep.subr.bf16.mxu0 %v6408_v21  ;;  %v6611_v45 = vld [vmem:[#allocation51_spill] sm:$0xff] }
 0x1e7   :  { %3863 = vmatpush1.bf16.msra.mxu1 %v6608_v46  ;;  %2536 = vmatprep.mubr.f32.mxu1 %v5369_v12  ;;  %v6613_v12 = vld [vmem:[#allocation43_spill] sm:$0xff] }
 0x1e8   :  { %3864 = vmatprep.subr.bf16.mxu1 %v6408_v21  ;;  %1349 = vmatmul.mubr.f32.gmra.mrb[14].mxu0 %v5424_v13 }
 0x1e9   :  { %3653 = vmatpush1.bf16.msra.mxu0 %v6609_v15  ;;  %1445 = vmatprep.mubr.f32.mxu0 %v6611_v45 }
 0x1ea   :  { %2539 = vmatmul.mubr.f32.gmra.mrb[12].mxu1 %v5399_v9  ;;  %3654 = vmatprep.subr.bf16.mxu0 %v6408_v21  ;;  %v6614_v9 = vld [vmem:[#allocation105_spill] sm:$0xff] }
 0x1eb   :  { %3866 = vmatpush1.bf16.msra.mxu1 %v6610_v36  ;;  %2545 = vmatprep.mubr.f32.mxu1 %v5412_v27  ;;  %v6616_v27 = vld [vmem:[#allocation107_spill] sm:$0xff] }
 0x1ec   :  { %3867 = vmatprep.subr.bf16.mxu1 %v6408_v21 }
 0x1ed   :  { %3656 = vmatpush1.bf16.msra.mxu0 %v6612_v6 }
 0x1ee   :  { %2548 = vmatmul.mubr.f32.gmra.mrb[14].mxu1 %v5424_v13  ;;  %3657 = vmatprep.subr.bf16.mxu0 %v6408_v21  ;;  %v6617_v13 = vld [vmem:[#allocation106_spill] sm:$0xff] }
 0x1ef   :  { %3869 = vmatpush1.bf16.msra.mxu1 %v6613_v12  ;;  %2644 = vmatprep.mubr.f32.mxu1 %v6611_v45  ;;  %v6639_v45 = vld [vmem:[#allocation119_spill] sm:$0xff] }
 0x1f0   :  { %3870 = vmatprep.subr.bf16.mxu1 %v6408_v21 }
 0x1f1   :  { %3659 = vmatpush1.bf16.msra.mxu0 %v6614_v9 }
 0x1f2   :  { %3660 = vmatprep.subr.bf16.mxu0 %v6408_v21 }
 0x1f3   :  { %3872 = vmatpush1.bf16.msra.mxu1 %v6615_v29 }
 0x1f4   :  { %3873 = vmatprep.subr.bf16.mxu1 %v6408_v21 }
 0x1f5   :  { %3662 = vmatpush1.bf16.msra.mxu0 %v5212_v52 }
 0x1f6   :  { %3663 = vmatprep.subr.bf16.mxu0 %v6408_v21 }
 0x1f7   :  { %3875 = vmatpush1.bf16.msra.mxu1 %v5210_v31 }
 0x1f8   :  { %3876 = vmatprep.subr.bf16.mxu1 %v6408_v21 }
 0x1f9   :  { %3665 = vmatpush1.bf16.msra.mxu0 %v6616_v27 }
 0x1fa   :  { %3666 = vmatprep.subr.bf16.mxu0 %v6408_v21 }
 0x1fb   :  { %3878 = vmatpush1.bf16.msra.mxu1 %v6617_v13 }
 0x1fc   :  { %3879 = vmatprep.subr.bf16.mxu1 %v6408_v21  ;;  %1449 = vmatmul.mubr.f32.vlgmr.msra.gmra.mrb[0].mxu0 %v6618_v25 }
 0x1fd   :  { %3668 = vmatpush1.bf16.msra.mxu0 %v6619_v32  ;;  %1456 = vmatprep.mubr.f32.mxu0 %v6621_v53  ;;  %v6641_v32 = vld [vmem:[#allocation39_spill] sm:$0xff] }
 0x1fe   :  { %3669 = vmatprep.subr.bf16.mxu0 %v6408_v21 }
 0x1ff   :  { %3881 = vmatpush1.bf16.msra.mxu1 %v6620_v49 }
 0x200   :  { %3882 = vmatprep.subr.bf16.mxu1 %v6408_v21  ;;  %1460 = vmatmul.mubr.f32.gmra.mrb[2].mxu0 %v6622_v34 }
 0x201   :  { %3671 = vmatpush1.bf16.msra.mxu0 %v6623_v35  ;;  %1467 = vmatprep.mubr.f32.mxu0 %v6625_v17  ;;  %v6646_v35 = vld [vmem:[#allocation40_spill] sm:$0xff] }
 0x202   :  { %2648 = vmatmul.mubr.f32.vlgmr.msra.gmra.mrb[0].mxu1 %v6618_v25  ;;  %3672 = vmatprep.subr.bf16.mxu0 %v6408_v21  ;;  %v6640_v25 = vld [vmem:[#allocation101_spill] sm:$0xff] }
 0x203   :  { %3884 = vmatpush1.bf16.msra.mxu1 %v6624_v30  ;;  %2655 = vmatprep.mubr.f32.mxu1 %v6621_v53  ;;  %v6642_v53 = vld [vmem:[#allocation26_spill] sm:$0xff] }
 0x204   :  { %3885 = vmatprep.subr.bf16.mxu1 %v6408_v21  ;;  %1471 = vmatmul.mubr.f32.gmra.mrb[4].mxu0 %v6626_v8  ;;  %v6647_v30 = vld [vmem:[#allocation110_spill] sm:$0xff] }
 0x205   :  { %3674 = vmatpush1.bf16.msra.mxu0 %v6627_v16  ;;  %1478 = vmatprep.mubr.f32.mxu0 %v6629_v37  ;;  %v6650_v16 = vld [vmem:[#allocation112_spill] sm:$0xff] }
 0x206   :  { %2659 = vmatmul.mubr.f32.gmra.mrb[2].mxu1 %v6622_v34  ;;  %3675 = vmatprep.subr.bf16.mxu0 %v6408_v21  ;;  %v6644_v34 = vld [vmem:[#allocation121_spill] sm:$0xff] }
 0x207   :  { %3887 = vmatpush1.bf16.msra.mxu1 %v6628_v56  ;;  %2666 = vmatprep.mubr.f32.mxu1 %v6625_v17  ;;  %v6648_v17 = vld [vmem:[#allocation46_spill] sm:$0xff]  ;;  %v6651_v56 = vld [vmem:[#allocation113_spill] sm:$0xff] }
 0x208   :  { %3888 = vmatprep.subr.bf16.mxu1 %v6408_v21  ;;  %1482 = vmatmul.mubr.f32.gmra.mrb[6].mxu0 %v6630_v43 }
 0x209   :  { %3677 = vmatpush1.bf16.msra.mxu0 %v6631_v42  ;;  %1489 = vmatprep.mubr.f32.mxu0 %v6633_v19  ;;  %v6654_v42 = vld [vmem:[#allocation116_spill] sm:$0xff] }
 0x20a   :  { %2670 = vmatmul.mubr.f32.gmra.mrb[4].mxu1 %v6626_v8  ;;  %3678 = vmatprep.subr.bf16.mxu0 %v6408_v21  ;;  %v6649_v8 = vld [vmem:[#allocation111_spill] sm:$0xff] }
 0x20b   :  { %3890 = vmatpush1.bf16.msra.mxu1 %v6632_v10  ;;  %2677 = vmatprep.mubr.f32.mxu1 %v6629_v37  ;;  %v6652_v37 = vld [vmem:[#allocation114_spill] sm:$0xff]  ;;  %v6655_v10 = vld [vmem:[#allocation117_spill] sm:$0xff] }
 0x20c   :  { %3891 = vmatprep.subr.bf16.mxu1 %v6408_v21  ;;  %1493 = vmatmul.mubr.f32.gmra.mrb[8].mxu0 %v5114_v60 }
 0x20d   :  { %3680 = vmatpush1.bf16.msra.mxu0 %v6634_v50  ;;  %1500 = vmatprep.mubr.f32.mxu0 %v5365_v0 }
 0x20e   :  { %2681 = vmatmul.mubr.f32.gmra.mrb[6].mxu1 %v6630_v43  ;;  %3681 = vmatprep.subr.bf16.mxu0 %v6408_v21  ;;  %v6653_v43 = vld [vmem:[#allocation115_spill] sm:$0xff] }
 0x20f   :  { %3893 = vmatpush1.bf16.msra.mxu1 %v6635_v20  ;;  %2688 = vmatprep.mubr.f32.mxu1 %v6633_v19 }
 0x210   :  { %3894 = vmatprep.subr.bf16.mxu1 %v6408_v21  ;;  %1504 = vmatmul.mubr.f32.gmra.mrb[10].mxu0 %v6636_v58 }
 0x211   :  { %3683 = vmatpush1.bf16.msra.mxu0 %v6637_v3  ;;  %1511 = vmatprep.mubr.f32.mxu0 %v6639_v45 }
 0x212   :  { %2692 = vmatmul.mubr.f32.gmra.mrb[8].mxu1 %v5114_v60  ;;  %3684 = vmatprep.subr.bf16.mxu0 %v6408_v21  ;;  %v6643_v60 = vld [vmem:[#allocation120_spill] sm:$0xff] }
 0x213   :  { %3896 = vmatpush1.bf16.msra.mxu1 %v6638_v51  ;;  %2699 = vmatprep.mubr.f32.mxu1 %v5365_v0  ;;  %v6645_v0 = vld [vmem:[#allocation45_spill] sm:$0xff] }
 0x214   :  { %3897 = vmatprep.subr.bf16.mxu1 %v6408_v21  ;;  %1515 = vmatmul.mubr.f32.gmra.mrb[12].mxu0 %v6640_v25 }
 0x215   :  { %3686 = vmatpush1.bf16.msra.mxu0 %v6641_v32  ;;  %1522 = vmatprep.mubr.f32.mxu0 %v6643_v60 }
 0x216   :  { %2703 = vmatmul.mubr.f32.gmra.mrb[10].mxu1 %v6636_v58  ;;  %3687 = vmatprep.subr.bf16.mxu0 %v6408_v21 }
 0x217   :  { %3899 = vmatpush1.bf16.msra.mxu1 %v6642_v53  ;;  %2710 = vmatprep.mubr.f32.mxu1 %v6639_v45 }
 0x218   :  { %3900 = vmatprep.subr.bf16.mxu1 %v6408_v21  ;;  %1526 = vmatmul.mubr.f32.gmra.mrb[14].mxu0 %v6644_v34 }
 0x219   :  { %3689 = vmatpush1.bf16.msra.mxu0 %v6645_v0  ;;  %1668 = vmatprep.mubr.f32.mxu0 %v6534_v2 }
 0x21a   :  { %2714 = vmatmul.mubr.f32.gmra.mrb[12].mxu1 %v6640_v25  ;;  %3690 = vmatprep.subr.bf16.mxu0 %v6408_v21 }
 0x21b   :  { %3902 = vmatpush1.bf16.msra.mxu1 %v6646_v35  ;;  %2721 = vmatprep.mubr.f32.mxu1 %v6643_v60 }
 0x21c   :  { %3903 = vmatprep.subr.bf16.mxu1 %v6408_v21 }
 0x21d   :  { %3692 = vmatpush1.bf16.msra.mxu0 %v6647_v30 }
 0x21e   :  { %2725 = vmatmul.mubr.f32.gmra.mrb[14].mxu1 %v6644_v34  ;;  %3693 = vmatprep.subr.bf16.mxu0 %v6408_v21 }
 0x21f   :  { %3905 = vmatpush1.bf16.msra.mxu1 %v6648_v17  ;;  %2867 = vmatprep.mubr.f32.mxu1 %v6534_v2 }
 0x220   :  { %3906 = vmatprep.subr.bf16.mxu1 %v6408_v21 }
 0x221   :  { %3695 = vmatpush1.bf16.msra.mxu0 %v6649_v8 }
 0x222   :  { %3696 = vmatprep.subr.bf16.mxu0 %v6408_v21 }
 0x223   :  { %3908 = vmatpush1.bf16.msra.mxu1 %v6650_v16 }
 0x224   :  { %3909 = vmatprep.subr.bf16.mxu1 %v6408_v21 }
 0x225   :  { %3698 = vmatpush1.bf16.msra.mxu0 %v6651_v56 }
 0x226   :  { %3699 = vmatprep.subr.bf16.mxu0 %v6408_v21 }
 0x227   :  { %3911 = vmatpush1.bf16.msra.mxu1 %v6652_v37 }
 0x228   :  { %3912 = vmatprep.subr.bf16.mxu1 %v6408_v21 }
 0x229   :  { %3701 = vmatpush1.bf16.msra.mxu0 %v6653_v43 }
 0x22a   :  { %3702 = vmatprep.subr.bf16.mxu0 %v6408_v21 }
 0x22b   :  { %3914 = vmatpush1.bf16.msra.mxu1 %v6654_v42 }
 0x22c   :  { %3915 = vmatprep.subr.bf16.mxu1 %v6408_v21  ;;  %1670 = vmatmul.mubr.f32.vlgmr.msra.gmra.mrb[0].mxu0 %v6542_v11 }
 0x22d   :  { %3704 = vmatpush1.bf16.msra.mxu0 %v6590_v28  ;;  %1675 = vmatprep.mubr.f32.mxu0 %v6548_v4 }
 0x22e   :  { %3705 = vmatprep.subr.bf16.mxu0 %v6408_v21 }
 0x22f   :  { %3917 = vmatpush1.bf16.msra.mxu1 %v6655_v10 }
 0x230   :  { %3918 = vmatprep.subr.bf16.mxu1 %v6408_v21  ;;  %1677 = vmatmul.mubr.f32.gmra.mrb[2].mxu0 %v6549_v54 }
 0x231   :  { %3707 = vmatpush1.bf16.msra.mxu0 %v6593_v41  ;;  %1682 = vmatprep.mubr.f32.mxu0 %v6557_v59 }
 0x232   :  { %2869 = vmatmul.mubr.f32.vlgmr.msra.gmra.mrb[0].mxu1 %v6542_v11  ;;  %3708 = vmatprep.subr.bf16.mxu0 %v6408_v21 }
 0x233   :  { %3920 = vmatpush1.bf16.msra.mxu1 %v6594_v62  ;;  %2874 = vmatprep.mubr.f32.mxu1 %v6548_v4 }
 0x234   :  { %3921 = vmatprep.subr.bf16.mxu1 %v6408_v21  ;;  %1684 = vmatmul.mubr.f32.gmra.mrb[4].mxu0 %v6558_v7 }
 0x235   :  { %3710 = vmatpush1.bf16.msra.mxu0 %v6597_v26  ;;  %1689 = vmatprep.mubr.f32.mxu0 %v6559_v55 }
 0x236   :  { %2876 = vmatmul.mubr.f32.gmra.mrb[2].mxu1 %v6549_v54  ;;  %3711 = vmatprep.subr.bf16.mxu0 %v6408_v21 }
 0x237   :  { %3923 = vmatpush1.bf16.msra.mxu1 %v6598_v5  ;;  %2881 = vmatprep.mubr.f32.mxu1 %v6557_v59 }
 0x238   :  { %3924 = vmatprep.subr.bf16.mxu1 %v6408_v21  ;;  %1691 = vmatmul.mubr.f32.gmra.mrb[6].mxu0 %v6560_v1 }
 0x239   :  { %3713 = vmatpush1.bf16.msra.mxu0 %v6601_v63  ;;  %1696 = vmatprep.mubr.f32.mxu0 %v6561_v22 }
 0x23a   :  { %2883 = vmatmul.mubr.f32.gmra.mrb[4].mxu1 %v6558_v7  ;;  %3714 = vmatprep.subr.bf16.mxu0 %v6408_v21 }
 0x23b   :  { %3926 = vmatpush1.bf16.msra.mxu1 %v6602_v39  ;;  %2888 = vmatprep.mubr.f32.mxu1 %v6559_v55 }
 0x23c   :  { %3927 = vmatprep.subr.bf16.mxu1 %v6408_v21  ;;  %1698 = vmatmul.mubr.f32.gmra.mrb[8].mxu0 %v6562_v40 }
 0x23d   :  { %3716 = vmatpush1.bf16.msra.mxu0 %v6603_v61  ;;  %1703 = vmatprep.mubr.f32.mxu0 %v6566_v38 }
 0x23e   :  { %2890 = vmatmul.mubr.f32.gmra.mrb[6].mxu1 %v6560_v1  ;;  %3717 = vmatprep.subr.bf16.mxu0 %v6408_v21 }
 0x23f   :  { %3929 = vmatpush1.bf16.msra.mxu1 %v6604_v23  ;;  %2895 = vmatprep.mubr.f32.mxu1 %v6561_v22 }
 0x240   :  { %3930 = vmatprep.subr.bf16.mxu1 %v6408_v21  ;;  %1705 = vmatmul.mubr.f32.gmra.mrb[10].mxu0 %v5127_v24 }
 0x241   :  { %3719 = vmatpush1.bf16.msra.mxu0 %v6605_v14  ;;  %1710 = vmatprep.mubr.f32.mxu0 %v5130_v47 }
 0x242   :  { %2897 = vmatmul.mubr.f32.gmra.mrb[8].mxu1 %v6562_v40  ;;  %3720 = vmatprep.subr.bf16.mxu0 %v6408_v21 }
 0x243   :  { %3932 = vmatpush1.bf16.msra.mxu1 %v6606_v18  ;;  %2902 = vmatprep.mubr.f32.mxu1 %v6566_v38 }
 0x244   :  { %3933 = vmatprep.subr.bf16.mxu1 %v6408_v21  ;;  %1712 = vmatmul.mubr.f32.gmra.mrb[12].mxu0 %v5346_v57 }
 0x245   :  { %3722 = vmatpush1.bf16.msra.mxu0 %v6607_v44  ;;  %1717 = vmatprep.mubr.f32.mxu0 %v5372_v48 }
 0x246   :  { %2904 = vmatmul.mubr.f32.gmra.mrb[10].mxu1 %v5127_v24  ;;  %3723 = vmatprep.subr.bf16.mxu0 %v6408_v21 }
 0x247   :  { %3935 = vmatpush1.bf16.msra.mxu1 %v6608_v46  ;;  %2909 = vmatprep.mubr.f32.mxu1 %v5130_v47 }
 0x248   :  { %3936 = vmatprep.subr.bf16.mxu1 %v6408_v21  ;;  %1719 = vmatmul.mubr.f32.gmra.mrb[14].mxu0 %v5401_v33 }
 0x249   :  { %3725 = vmatpush1.bf16.msra.mxu0 %v6609_v15  ;;  %1813 = vmatprep.mubr.f32.mxu0 %v6534_v2 }
 0x24a   :  { %2911 = vmatmul.mubr.f32.gmra.mrb[12].mxu1 %v5346_v57  ;;  %3726 = vmatprep.subr.bf16.mxu0 %v6408_v21 }
 0x24b   :  { %3938 = vmatpush1.bf16.msra.mxu1 %v6610_v36  ;;  %2916 = vmatprep.mubr.f32.mxu1 %v5372_v48 }
 0x24c   :  { %3939 = vmatprep.subr.bf16.mxu1 %v6408_v21 }
 0x24d   :  { %3728 = vmatpush1.bf16.msra.mxu0 %v6612_v6 }
 0x24e   :  { %2918 = vmatmul.mubr.f32.gmra.mrb[14].mxu1 %v5401_v33  ;;  %3729 = vmatprep.subr.bf16.mxu0 %v6408_v21 }
 0x24f   :  { %3941 = vmatpush1.bf16.msra.mxu1 %v6613_v12  ;;  %3012 = vmatprep.mubr.f32.mxu1 %v6534_v2 }
 0x250   :  { %3942 = vmatprep.subr.bf16.mxu1 %v6408_v21 }
 0x251   :  { %3731 = vmatpush1.bf16.msra.mxu0 %v6614_v9 }
 0x252   :  { %3732 = vmatprep.subr.bf16.mxu0 %v6408_v21 }
 0x253   :  { %3944 = vmatpush1.bf16.msra.mxu1 %v6615_v29 }
 0x254   :  { %3945 = vmatprep.subr.bf16.mxu1 %v6408_v21 }
 0x255   :  { %3734 = vmatpush1.bf16.msra.mxu0 %v5212_v52 }
 0x256   :  { %3735 = vmatprep.subr.bf16.mxu0 %v6408_v21 }
 0x257   :  { %3947 = vmatpush1.bf16.msra.mxu1 %v5210_v31 }
 0x258   :  { %3948 = vmatprep.subr.bf16.mxu1 %v6408_v21 }
 0x259   :  { %3737 = vmatpush1.bf16.msra.mxu0 %v6616_v27 }
 0x25b   :  { %3950 = vmatpush1.bf16.msra.mxu1 %v6617_v13 }
 0x25c   :  { %3951 = vmatprep.subr.bf16.mxu1 %v6408_v21  ;;  %1815 = vmatmul.mubr.f32.vlgmr.msra.gmra.mrb[0].mxu0 %v6542_v11  ;;  %v662_v21 = vpop.permute.xlu0 %661 }
 0x25d   :  { %1820 = vmatprep.mubr.f32.mxu0 %v6548_v4 }
 0x25f   :  { %3953 = vmatpush1.bf16.msra.mxu1 %v6620_v49 }
 0x260   :  { %1822 = vmatmul.mubr.f32.gmra.mrb[2].mxu0 %v6549_v54  ;;  %v5901_v52 = vpop.permute.xlu0 %671 }
 0x261   :  { %1827 = vmatprep.mubr.f32.mxu0 %v6557_v59 }
 0x262   :  { %3014 = vmatmul.mubr.f32.vlgmr.msra.gmra.mrb[0].mxu1 %v6542_v11 }
 0x263   :  { %3019 = vmatprep.mubr.f32.mxu1 %v6548_v4 }
 0x264   :  { %1829 = vmatmul.mubr.f32.gmra.mrb[4].mxu0 %v6558_v7  ;;  %v5903_v31 = vpop.permute.xlu0 %681 }
 0x265   :  { %1834 = vmatprep.mubr.f32.mxu0 %v6559_v55 }
 0x266   :  { %3021 = vmatmul.mubr.f32.gmra.mrb[2].mxu1 %v6549_v54 }
 0x267   :  { %3026 = vmatprep.mubr.f32.mxu1 %v6557_v59 }
 0x268   :  { %1836 = vmatmul.mubr.f32.gmra.mrb[6].mxu0 %v6560_v1  ;;  %v5905_v2 = vpop.permute.xlu0 %691 }
 0x269   :  { %1841 = vmatprep.mubr.f32.mxu0 %v6561_v22 }
 0x26a   :  { %3028 = vmatmul.mubr.f32.gmra.mrb[4].mxu1 %v6558_v7 }
 0x26b   :  { %3033 = vmatprep.mubr.f32.mxu1 %v6559_v55 }
 0x26c   :  { %1843 = vmatmul.mubr.f32.gmra.mrb[8].mxu0 %v6562_v40 }
 0x26d   :  { %1848 = vmatprep.mubr.f32.mxu0 %v6566_v38 }
 0x26e   :  { %3035 = vmatmul.mubr.f32.gmra.mrb[6].mxu1 %v6560_v1 }
 0x26f   :  { %3040 = vmatprep.mubr.f32.mxu1 %v6561_v22 }
 0x270   :  { %1850 = vmatmul.mubr.f32.gmra.mrb[10].mxu0 %v5127_v24 }
 0x271   :  { %1855 = vmatprep.mubr.f32.mxu0 %v5130_v47 }
 0x272   :  { %3042 = vmatmul.mubr.f32.gmra.mrb[8].mxu1 %v6562_v40 }
 0x273   :  { %3047 = vmatprep.mubr.f32.mxu1 %v6566_v38 }
 0x274   :  { %1857 = vmatmul.mubr.f32.gmra.mrb[12].mxu0 %v5346_v57 }
 0x275   :  { %1862 = vmatprep.mubr.f32.mxu0 %v5372_v48 }
 0x276   :  { %3049 = vmatmul.mubr.f32.gmra.mrb[10].mxu1 %v5127_v24  ;;  %v5907_v24 = vpop.permute.xlu0 %3172 }
 0x277   :  { %3054 = vmatprep.mubr.f32.mxu1 %v5130_v47 }
 0x278   :  { %1864 = vmatmul.mubr.f32.gmra.mrb[14].mxu0 %v5401_v33 }
 0x27a   :  { %3056 = vmatmul.mubr.f32.gmra.mrb[12].mxu1 %v5346_v57  ;;  %v5909_v11 = vpop.permute.xlu0 %3182 }
 0x27b   :  { %3061 = vmatprep.mubr.f32.mxu1 %v5372_v48 }
 0x27e   :  { %3063 = vmatmul.mubr.f32.gmra.mrb[14].mxu1 %v5401_v33  ;;  %v5911_v47 = vpop.permute.xlu0 %3192  ;;  %v657_v33 = vpop.permute.xlu1 %656 }
 0x282   :  { %v5913_v4 = vpop.permute.xlu0 %3202  ;;  %v667_v36 = vpop.permute.xlu1 %666 }
 0x286   :  { %v5915_v57 = vpop.permute.xlu0 %3237  ;;  %v677_v10 = vpop.permute.xlu1 %676 }
 0x28a   :  { %v5917_v48 = vpop.permute.xlu0 %3361 }
 0x28e   :  { %v5919_v55 = vpop.permute.xlu0 %3247 }
 0x292   :  { %v5939_v6 = vpop.permute.xlu0 %3252 }
 0x296   :  { %v5953_v25 = vpop.permute.xlu0 %3257 }
 0x32f   :  { %v1816_v54 = vpop.f32.mrb[0].mxu0 }
 0x330   :  { %v3954_v59 = vadd.f32 %v1816_v54, %v657_v33  ;;  %v1818_v7 = vpop.f32.mrb[1].mxu0 }
 0x332   :  { %v1869_v1 = vmax.f32 %v3954_v59, 0.0 }
 0x333   :  { %v1823_v22 = vpop.f32.mrb[2].mxu0 }
 0x334   :  { %v5923_v28 = vsel %vm445_vm2, %v1869_v1, 0.0  ;;  %v3955_v41 = vadd.f32 %v1823_v22, %v662_v21  ;;  %v1825_v26 = vpop.f32.mrb[3].mxu0 }
 0x335   :  { %v3015_v40 = vpop.f32.mrb[0].mxu1  ;;  %3109 = vrot.lane.b32.xlu1 %v5923_v28, %s4163_s28 }
 0x336   :  { %v3962_v62 = vadd.f32 %v3015_v40, %v657_v33  ;;  %v3017_v5 = vpop.f32.mrb[1].mxu1  ;;  %v1870_v63 = vmax.f32 %v3955_v41, 0.0 }
 0x337   :  { %v1830_v61 = vpop.f32.mrb[4].mxu0 }
 0x338   :  { %v3068_v39 = vmax.f32 %v3962_v62, 0.0  ;;  %v5929_v14 = vsel %vm445_vm2, %v1870_v63, 0.0  ;;  %v1832_v46 = vpop.f32.mrb[5].mxu0  ;;  %v3956_v27 = vadd.f32 %v1830_v61, %v667_v36 }
 0x339   :  { %v3022_v23 = vpop.f32.mrb[2].mxu1  ;;  %3111 = vrot.lane.b32.xlu0 %v5929_v14, %s4163_s28 }
 0x33a   :  { %v5933_v18 = vsel %vm445_vm2, %v3068_v39, 0.0  ;;  %v3963_v44 = vadd.f32 %v3022_v23, %v662_v21  ;;  %v3024_v15 = vpop.f32.mrb[3].mxu1  ;;  %v1871_v58 = vmax.f32 %v3956_v27, 0.0  ;;  %v5973_v21 = vpop.permute.xlu0 %3262 }
 0x33b   :  { %3125 = vrot.lane.b32.xlu1 %v5933_v18, %s4163_s28  ;;  %v1837_v9 = vpop.f32.mrb[6].mxu0 }
 0x33c   :  { %v3069_v12 = vmax.f32 %v3963_v44, 0.0  ;;  %v1839_v49 = vpop.f32.mrb[7].mxu0  ;;  %v5957_v60 = vsel %vm445_vm2, %v1871_v58, 0.0  ;;  %v3957_v34 = vadd.f32 %v1837_v9, %v5901_v52 }
 0x33d   :  { %v3029_v29 = vpop.f32.mrb[4].mxu1 }
 0x33e   :  { %v5943_v13 = vsel %vm445_vm2, %v3069_v12, 0.0  ;;  %v3031_v19 = vpop.f32.mrb[5].mxu1  ;;  %v3964_v3 = vadd.f32 %v3029_v29, %v667_v36  ;;  %v1872_v16 = vmax.f32 %v3957_v34, 0.0  ;;  %v3268_v5 = vpop.permute.xlu0 %3267 }
 0x33f   :  { %3127 = vrot.lane.b32.xlu0 %v5943_v13, %s4163_s28  ;;  %3302 = vrot.lane.b32.xlu1 %v5923_v28, %s4164_s16  ;;  %v1844_v50 = vpop.f32.mrb[8].mxu0 }
 0x340   :  { %v1846_v51 = vpop.f32.mrb[9].mxu0  ;;  %v3070_v0 = vmax.f32 %v3964_v3, 0.0  ;;  %v3958_v33 = vadd.f32 %v1844_v50, %v677_v10  ;;  %v5977_v7 = vsel %vm445_vm2, %v1872_v16, 0.0  ;;  %v687_v50 = vpop.permute.xlu1 %686 }
 0x341   :  { %v3036_v20 = vpop.f32.mrb[6].mxu1 }
 0x342   :  { %v3038_v45 = vpop.f32.mrb[7].mxu1  ;;  %v5966_v56 = vsel %vm445_vm2, %v3070_v0, 0.0  ;;  %v3965_v37 = vadd.f32 %v3036_v20, %v5901_v52  ;;  %v1873_v62 = vmax.f32 %v3958_v33, 0.0 }
 0x343   :  { %3304 = vrot.lane.b32.xlu0 %v5929_v14, %s4164_s16  ;;  %3318 = vrot.lane.b32.xlu1 %v5933_v18, %s4164_s16  ;;  %v1851_v32 = vpop.f32.mrb[10].mxu0 }
 0x344   :  { %v1853_v35 = vpop.f32.mrb[11].mxu0  ;;  %v3071_v1 = vmax.f32 %v3965_v37, 0.0  ;;  %v5999_v36 = vsel %vm445_vm2, %v1873_v62, 0.0  ;;  %v3959_v12 = vadd.f32 %v1851_v32, %v5903_v31  ;;  %v3168_v32 = vpop.permute.xlu1 %3167 }
 0x345   :  { %v3043_v53 = vpop.f32.mrb[8].mxu1 }
 0x346   :  { %v3045_v30 = vpop.f32.mrb[9].mxu1  ;;  %v5986_v63 = vsel %vm445_vm2, %v3071_v1, 0.0  ;;  %v3966_v39 = vadd.f32 %v3043_v53, %v677_v10  ;;  %v1874_v27 = vmax.f32 %v3959_v12, 0.0  ;;  %v6073_v1 = vpop.permute.xlu0 %3396 }
 0x347   :  { %3320 = vrot.lane.b32.xlu0 %v5943_v13, %s4164_s16  ;;  %3113 = vrot.lane.b32.xlu1 %v5957_v60, %s4163_s28  ;;  %v1858_v17 = vpop.f32.mrb[12].mxu0 }
 0x348   :  { %v1860_v43 = vpop.f32.mrb[13].mxu0  ;;  %v3072_v9 = vmax.f32 %v3966_v39, 0.0  ;;  %v6021_v20 = vsel %vm445_vm2, %v1874_v27, 0.0  ;;  %v3960_v58 = vadd.f32 %v1858_v17, %v687_v50  ;;  %v6043_v0 = vpop.permute.xlu1 %3177  ;;  %v3521_v17 = vld [vmem:[#allocation4] ss:$0 sm:$0xff] }
 0x349   :  { %v3050_v8 = vpop.f32.mrb[10].mxu1 }
 0x34a   :  { %v3052_v42 = vpop.f32.mrb[11].mxu1  ;;  %v6012_v49 = vsel %vm445_vm2, %v3072_v9, 0.0  ;;  %v3967_v19 = vadd.f32 %v3050_v8, %v5903_v31  ;;  %v1875_v31 = vmax.f32 %v3960_v58, 0.0  ;;  %v3271_v9 = vmul.f32 %v5915_v57, %v5929_v14 }
 0x34b   :  { %3322 = vrot.lane.b32.xlu0 %v5966_v56, %s4164_s16  ;;  %3129 = vrot.lane.b32.xlu1 %v5966_v56, %s4163_s28  ;;  %v1865_v54 = vpop.f32.mrb[14].mxu0  ;;  %v3279_v14 = vmul.f32 %v5915_v57, %v5943_v13 }
 0x34c   :  { %v3961_v52 = vadd.f32 %v1865_v54, %v5905_v2  ;;  %v1867_v22 = vpop.f32.mrb[15].mxu0  ;;  %v3073_v3 = vmax.f32 %v3967_v19, 0.0  ;;  %v6037_v53 = vsel %vm445_vm2, %v1875_v31, 0.0  ;;  %v6053_v30 = vpop.permute.xlu1 %3187 }
 0x34d   :  { %v3057_v59 = vpop.f32.mrb[12].mxu1 }
 0x34e   :  { %v3059_v40 = vpop.f32.mrb[13].mxu1  ;;  %v1876_v41 = vmax.f32 %v3961_v52, 0.0  ;;  %v6029_v51 = vsel %vm445_vm2, %v3073_v3, 0.0  ;;  %v3968_v45 = vadd.f32 %v3057_v59, %v687_v50 }
 0x34f   :  { %3115 = vrot.lane.b32.xlu0 %v5977_v7, %s4163_s28  ;;  %3306 = vrot.lane.b32.xlu1 %v5957_v60, %s4164_s16 }
 0x350   :  { %v1884_v61 = vsel %vm445_vm2, %v1876_v41, 0.0  ;;  %v3074_v34 = vmax.f32 %v3968_v45, 0.0  ;;  %v6060_v8 = vpop.permute.xlu1 %3197 }
 0x351   :  { %v3064_v26 = vpop.f32.mrb[14].mxu1  ;;  %v5991_v46 = vmul.f32 %v3268_v5, %v1884_v61 }
 0x352   :  { %v3969_v23 = vadd.f32 %v3064_v26, %v5905_v2  ;;  %v3066_v44 = vpop.f32.mrb[15].mxu1  ;;  %v6047_v35 = vsel %vm445_vm2, %v3074_v34, 0.0 }
 0x353   :  { %3131 = vrot.lane.b32.xlu0 %v5986_v63, %s4163_s28  ;;  %3308 = vrot.lane.b32.xlu1 %v5977_v7, %s4164_s16 }
 0x354   :  { %v3075_v15 = vmax.f32 %v3969_v23, 0.0  ;;  %v3233_v16 = vpop.permute.xlu1 %3232 }
 0x355   :  { %v3270_v44 = vmul.f32 %v3233_v16, %v5923_v28 }
 0x356   :  { %v3083_v2 = vsel %vm445_vm2, %v3075_v15, 0.0 }
 0x357   :  { %v6004_v29 = vmul.f32 %v3268_v5, %v3083_v2  ;;  %3324 = vrot.lane.b32.xlu0 %v5986_v63, %s4164_s16  ;;  %3117 = vrot.lane.b32.xlu1 %v5999_v36, %s4163_s28 }
 0x358   :  { %v3243_v37 = vpop.permute.xlu1 %3242 }
 0x35b   :  { %3310 = vrot.lane.b32.xlu0 %v5999_v36, %s4164_s16  ;;  %3133 = vrot.lane.b32.xlu1 %v6012_v49, %s4163_s28 }
 0x35c   :  { %v3367_v43 = vpop.permute.xlu1 %3366 }
 0x35f   :  { %3119 = vrot.lane.b32.xlu0 %v6021_v20, %s4163_s28  ;;  %3326 = vrot.lane.b32.xlu1 %v6012_v49, %s4164_s16 }
 0x360   :  { %v6063_v42 = vpop.permute.xlu1 %3371 }
 0x363   :  { %3135 = vrot.lane.b32.xlu0 %v6029_v51, %s4163_s28  ;;  %3312 = vrot.lane.b32.xlu1 %v6021_v20, %s4164_s16 }
 0x364   :  { %v6065_v10 = vpop.permute.xlu1 %3376 }
 0x367   :  { %3328 = vrot.lane.b32.xlu0 %v6029_v51, %s4164_s16  ;;  %3121 = vrot.lane.b32.xlu1 %v6037_v53, %s4163_s28 }
 0x368   :  { %v6067_v33 = vpop.permute.xlu1 %3381 }
 0x36b   :  { %3330 = vrot.lane.b32.xlu0 %v6047_v35, %s4164_s16  ;;  %3137 = vrot.lane.b32.xlu1 %v6047_v35, %s4163_s28 }
 0x36c   :  { %v6069_v54 = vpop.permute.xlu1 %3386 }
 0x36f   :  { %3123 = vrot.lane.b32.xlu0 %v1884_v61, %s4163_s28  ;;  %3314 = vrot.lane.b32.xlu1 %v6037_v53, %s4164_s16 }
 0x370   :  { %v6071_v59 = vpop.permute.xlu1 %3391 }
 0x373   :  { %3139 = vrot.lane.b32.xlu0 %v3083_v2, %s4163_s28  ;;  %3316 = vrot.lane.b32.xlu1 %v1884_v61, %s4164_s16  ;;  %s3481_s28 = sshll.u32 %s4167_s3, 4  ;;  %s3482_s28 = int_to_ptr.vmem [resolvable:$true] %s3481_s28 }
 0x374   :  { %p4143_p1 = scmp.lt.s32.totalorder %s3482_s28, %s3482_s28 }
 0x377   :  { %3332 = vrot.lane.b32.xlu0 %v3083_v2, %s4164_s16  ;;  %3464 = vperm.xlu1 %4137, %v3521_v17   ;;  %v3278_v17 = vmul.f32 %v3233_v16, %v5933_v18  ;;  %s4138_s16 = scalar_lea.vmem %s3482_s28, 32 }
 0x378   :  { %p4139_p0 = scmp.ne.s32.totalorder %s3482_s28, %s4138_s16  ;;  %p4144_p2 = scmp.lt.s32.totalorder %s4138_s16, %s4138_s16 }
 0x37a   :  { %p4145_p3 = por %p4144_p2, %p4143_p1 }
 0x37c   :  { %p4146_p4 = pnand %p4145_p3, %p4139_p0 }
 0x3a7   :  { %v3110_v52 = vpop.permute.xlu1 %3109 }
 0x3a8   :  { %v3141_v41 = vsel %vm82_vm0, %v3110_v52, 0.0 }
 0x3a9   :  { %v3205_v39 = vmul.f32 %v3168_v32, %v3141_v41 }
 0x3ab   :  { %v3112_v22 = vpop.permute.xlu0 %3111  ;;  %v3286_v50 = vadd.f32 %v3270_v44, %v3205_v39  ;;  %v3280_v44 = vmul.f32 %v3243_v37, %v5966_v56 }
 0x3ac   :  { %v3142_v62 = vsel %vm82_vm0, %v3112_v22, 0.0 }
 0x3ad   :  { %v3126_v40 = vpop.permute.xlu1 %3125  ;;  %v3206_v23 = vmul.f32 %v5907_v24, %v3142_v62 }
 0x3ae   :  { %v3149_v15 = vsel %vm82_vm0, %v3126_v40, 0.0 }
 0x3af   :  { %v3287_v3 = vadd.f32 %v3271_v9, %v3206_v23  ;;  %v3213_v31 = vmul.f32 %v3168_v32, %v3149_v15  ;;  %v3272_v9 = vmul.f32 %v3243_v37, %v5957_v60  ;;  %v3273_v60 = vmul.f32 %v5919_v55, %v5977_v7 }
 0x3b1   :  { %v3128_v26 = vpop.permute.xlu0 %3127  ;;  %v3303_v5 = vpop.permute.xlu1 %3302 }
 0x3b2   :  { %v3334_v61 = vsel %vm313_vm1, %v3303_v5, 0.0  ;;  %v3150_v12 = vsel %vm82_vm0, %v3128_v26, 0.0  ;;  %v3294_v5 = vadd.f32 %v3278_v17, %v3213_v31 }
 0x3b3   :  { %v3399_v2 = vmul.f32 %v5917_v48, %v3334_v61  ;;  %v3214_v45 = vmul.f32 %v5907_v24, %v3150_v12 }
 0x3b5   :  { %v3305_v27 = vpop.permute.xlu0 %3304  ;;  %v3319_v19 = vpop.permute.xlu1 %3318  ;;  %v3415_v52 = vadd.f32 %v3399_v2, %v3286_v50  ;;  %v3295_v39 = vadd.f32 %v3279_v14, %v3214_v45 }
 0x3b6   :  { %v3335_v58 = vsel %vm313_vm1, %v3305_v27, 0.0  ;;  %v3342_v28 = vsel %vm313_vm1, %v3319_v19, 0.0 }
 0x3b7   :  { %v3400_v34 = vmul.f32 %v3367_v43, %v3335_v58  ;;  %v3407_v40 = vmul.f32 %v5917_v48, %v3342_v28 }
 0x3b9   :  { %v3416_v22 = vadd.f32 %v3400_v34, %v3287_v3  ;;  %v3321_v41 = vpop.permute.xlu0 %3320  ;;  %v3114_v62 = vpop.permute.xlu1 %3113  ;;  %v3423_v18 = vadd.f32 %v3407_v40, %v3294_v5 }
 0x3ba   :  { %v3343_v26 = vsel %vm313_vm1, %v3321_v41, 0.0  ;;  %v3143_v24 = vsel %vm82_vm0, %v3114_v62, 0.0 }
 0x3bb   :  { %v3431_v32 = vadd.f32 %v3416_v22, %v3415_v52  ;;  %v3408_v61 = vmul.f32 %v3367_v43, %v3343_v26  ;;  %v3207_v12 = vmul.f32 %v6043_v0, %v3143_v24 }
 0x3bd   :  { %v3424_v16 = vadd.f32 %v3408_v61, %v3295_v39  ;;  %v3323_v23 = vpop.permute.xlu0 %3322  ;;  %v3130_v57 = vpop.permute.xlu1 %3129  ;;  %v3288_v3 = vadd.f32 %v3272_v9, %v3207_v12  ;;  %v3282_v12 = vmul.f32 %v5939_v6, %v6012_v49 }
 0x3be   :  { %v3344_v13 = vsel %vm313_vm1, %v3323_v23, 0.0  ;;  %v3151_v48 = vsel %vm82_vm0, %v3130_v57, 0.0 }
 0x3bf   :  { %v3444_v15 = vadd.f32 %v3424_v16, %v3423_v18  ;;  %v3215_v43 = vmul.f32 %v6043_v0, %v3151_v48  ;;  %v3409_v2 = vmul.f32 %v6063_v42, %v3344_v13  ;;  %v3274_v16 = vmul.f32 %v5939_v6, %v5999_v36 }
 0x3c1   :  { %v3296_v27 = vadd.f32 %v3280_v44, %v3215_v43  ;;  %v3116_v19 = vpop.permute.xlu0 %3115  ;;  %v3307_v50 = vpop.permute.xlu1 %3306 }
 0x3c2   :  { %v3144_v58 = vsel %vm82_vm0, %v3116_v19, 0.0  ;;  %v3336_v28 = vsel %vm313_vm1, %v3307_v50, 0.0 }
 0x3c3   :  { %v3425_v56 = vadd.f32 %v3409_v2, %v3296_v27  ;;  %v3208_v31 = vmul.f32 %v5909_v11, %v3144_v58  ;;  %v3401_v45 = vmul.f32 %v6063_v42, %v3336_v28  ;;  %v3281_v42 = vmul.f32 %v5919_v55, %v5986_v63 }
 0x3c5   :  { %v3417_v0 = vadd.f32 %v3401_v45, %v3288_v3  ;;  %v3132_v37 = vpop.permute.xlu0 %3131  ;;  %v3309_v34 = vpop.permute.xlu1 %3308  ;;  %v3445_v17 = vadd.f32 %v3444_v15, %v3425_v56  ;;  %v3289_v22 = vadd.f32 %v3273_v60, %v3208_v31 }
 0x3c6   :  { %v3152_v14 = vsel %vm82_vm0, %v3132_v37, 0.0  ;;  %v3337_v52 = vsel %vm313_vm1, %v3309_v34, 0.0 }
 0x3c7   :  { %v3432_v40 = vadd.f32 %v3431_v32, %v3417_v0  ;;  %v3216_v41 = vmul.f32 %v5909_v11, %v3152_v14  ;;  %v3402_v62 = vmul.f32 %v6065_v10, %v3337_v52 }
 0x3c9   :  { %v3418_v7 = vadd.f32 %v3402_v62, %v3289_v22  ;;  %v3325_v26 = vpop.permute.xlu0 %3324  ;;  %v3118_v5 = vpop.permute.xlu1 %3117  ;;  %v3297_v24 = vadd.f32 %v3281_v42, %v3216_v41 }
 0x3ca   :  { %v3345_v39 = vsel %vm313_vm1, %v3325_v26, 0.0  ;;  %v3145_v61 = vsel %vm82_vm0, %v3118_v5, 0.0 }
 0x3cb   :  { %v3433_v18 = vadd.f32 %v3432_v40, %v3418_v7  ;;  %v3410_v32 = vmul.f32 %v6065_v10, %v3345_v39  ;;  %v3209_v11 = vmul.f32 %v6053_v30, %v3145_v61  ;;  %v3276_v39 = vmul.f32 %v5973_v21, %v6037_v53 }
 0x3cd   :  { %v3426_v23 = vadd.f32 %v3410_v32, %v3297_v24  ;;  %v3311_v55 = vpop.permute.xlu0 %3310  ;;  %v3134_v63 = vpop.permute.xlu1 %3133  ;;  %v3290_v44 = vadd.f32 %v3274_v16, %v3209_v11 }
 0x3ce   :  { %v3338_v57 = vsel %vm313_vm1, %v3311_v55, 0.0  ;;  %v3153_v13 = vsel %vm82_vm0, %v3134_v63, 0.0 }
 0x3cf   :  { %v3446_v48 = vadd.f32 %v3445_v17, %v3426_v23  ;;  %v3403_v15 = vmul.f32 %v6067_v33, %v3338_v57  ;;  %v3217_v10 = vmul.f32 %v6053_v30, %v3153_v13  ;;  %v3275_v30 = vmul.f32 %v5953_v25, %v6021_v20 }
 0x3d1   :  { %v3419_v43 = vadd.f32 %v3403_v15, %v3290_v44  ;;  %v3120_v36 = vpop.permute.xlu0 %3119  ;;  %v3327_v9 = vpop.permute.xlu1 %3326  ;;  %v3298_v50 = vadd.f32 %v3282_v12, %v3217_v10 }
 0x3d2   :  { %v3146_v2 = vsel %vm82_vm0, %v3120_v36, 0.0  ;;  %v3346_v27 = vsel %vm313_vm1, %v3327_v9, 0.0 }
 0x3d3   :  { %v3434_v19 = vadd.f32 %v3433_v18, %v3419_v43  ;;  %v3210_v58 = vmul.f32 %v5911_v47, %v3146_v2  ;;  %v3411_v28 = vmul.f32 %v6067_v33, %v3346_v27  ;;  %v3283_v33 = vmul.f32 %v5953_v25, %v6029_v51 }
 0x3d4   :  { %v3284_v51 = vmul.f32 %v5973_v21, %v6047_v35 }
 0x3d5   :  { %v3427_v3 = vadd.f32 %v3411_v28, %v3298_v50  ;;  %v3136_v6 = vpop.permute.xlu0 %3135  ;;  %v3313_v49 = vpop.permute.xlu1 %3312  ;;  %v3291_v45 = vadd.f32 %v3275_v30, %v3210_v58 }
 0x3d6   :  { %v3154_v56 = vsel %vm82_vm0, %v3136_v6, 0.0  ;;  %v3339_v31 = vsel %vm313_vm1, %v3313_v49, 0.0 }
 0x3d7   :  { %v3447_v60 = vadd.f32 %v3446_v48, %v3427_v3  ;;  %v3218_v0 = vmul.f32 %v5911_v47, %v3154_v56  ;;  %v3404_v37 = vmul.f32 %v6069_v54, %v3339_v31 }
 0x3d9   :  { %v3420_v34 = vadd.f32 %v3404_v37, %v3291_v45  ;;  %v3329_v20 = vpop.permute.xlu0 %3328  ;;  %v3122_v17 = vpop.permute.xlu1 %3121  ;;  %v3299_v52 = vadd.f32 %v3283_v33, %v3218_v0 }
 0x3da   :  { %v3347_v14 = vsel %vm313_vm1, %v3329_v20, 0.0  ;;  %v3147_v41 = vsel %vm82_vm0, %v3122_v17, 0.0 }
 0x3db   :  { %v3435_v22 = vadd.f32 %v3434_v19, %v3420_v34  ;;  %v3412_v40 = vmul.f32 %v6069_v54, %v3347_v14  ;;  %v3211_v5 = vmul.f32 %v6060_v8, %v3147_v41 }
 0x3dd   :  { %v3428_v62 = vadd.f32 %v3412_v40, %v3299_v52  ;;  %v3331_v47 = vpop.permute.xlu0 %3330  ;;  %v3138_v42 = vpop.permute.xlu1 %3137  ;;  %v3292_v35 = vadd.f32 %v3276_v39, %v3211_v5 }
 0x3de   :  { %v3348_v7 = vsel %vm313_vm1, %v3331_v47, 0.0  ;;  %v3155_v25 = vsel %vm82_vm0, %v3138_v42, 0.0 }
 0x3df   :  { %v3448_v26 = vadd.f32 %v3447_v60, %v3428_v62  ;;  %v3219_v54 = vmul.f32 %v6060_v8, %v3155_v25  ;;  %v3413_v61 = vmul.f32 %v6071_v59, %v3348_v7 }
 0x3e1   :  { %v3300_v24 = vadd.f32 %v3284_v51, %v3219_v54  ;;  %v3124_v18 = vpop.permute.xlu0 %3123  ;;  %v3315_v32 = vpop.permute.xlu1 %3314 }
 0x3e2   :  { %v3148_v11 = vsel %vm82_vm0, %v3124_v18, 0.0  ;;  %v3340_v16 = vsel %vm313_vm1, %v3315_v32, 0.0 }
 0x3e3   :  { %v3429_v23 = vadd.f32 %v3413_v61, %v3300_v24  ;;  %v3212_v55 = vmul.f32 %v5913_v4, %v3148_v11  ;;  %v3405_v8 = vmul.f32 %v6071_v59, %v3340_v16 }
 0x3e5   :  { %v3421_v63 = vadd.f32 %v3405_v8, %v3292_v35  ;;  %v3140_v57 = vpop.permute.xlu0 %3139  ;;  %v3317_v21 = vpop.permute.xlu1 %3316  ;;  %v3449_v53 = vadd.f32 %v3448_v26, %v3429_v23  ;;  %v3293_v44 = vadd.f32 %v5991_v46, %v3212_v55 }
 0x3e6   :  { %v3156_v13 = vsel %vm82_vm0, %v3140_v57, 0.0  ;;  %v3341_v48 = vsel %vm313_vm1, %v3317_v21, 0.0 }
 0x3e7   :  { %v3436_v15 = vadd.f32 %v3435_v22, %v3421_v63  ;;  %v3220_v10 = vmul.f32 %v5913_v4, %v3156_v13  ;;  %v3406_v12 = vmul.f32 %v6073_v1, %v3341_v48 }
 0x3e9   :  { %v3422_v43 = vadd.f32 %v3406_v12, %v3293_v44  ;;  %v3333_v36 = vpop.permute.xlu0 %3332  ;;  %v3301_v9 = vadd.f32 %v6004_v29, %v3220_v10 }
 0x3ea   :  { %v3349_v59 = vsel %vm313_vm1, %v3333_v36, 0.0 }
 0x3eb   :  { %v3437_v2 = vadd.f32 %v3436_v15, %v3422_v43  ;;  %v3414_v27 = vmul.f32 %v6073_v1, %v3349_v59 }
 0x3ed   :  { %v3438_v19 = vrot.slane %v3437_v2, 4  ;;  %v3430_v50 = vadd.f32 %v3414_v27, %v3301_v9 }
 0x3ef   :  { %v3450_v58 = vadd.f32 %v3449_v53, %v3430_v50  ;;  %v3439_v28 = vadd.f32 %v3438_v19, %v3437_v2 }
 0x3f1   :  { %v3451_v46 = vrot.slane %v3450_v58, 4  ;;  %v3440_v30 = vrot.slane %v3439_v28, 2 }
 0x3f3   :  { %v3441_v3 = vadd.f32 %v3440_v30, %v3439_v28  ;;  %v3452_v4 = vadd.f32 %v3451_v46, %v3450_v58 }
 0x3f5   :  { %v3442_v6 = vrot.slane %v3441_v3, 1  ;;  %v3453_v49 = vrot.slane %v3452_v4, 2 }
 0x3f6   :  { %v3465_v29 = vpop.permute.xlu1 %3464 }
 0x3f7   :  { %v3454_v56 = vadd.f32 %v3453_v49, %v3452_v4  ;;  %v3443_v31 = vadd.f32 %v3442_v6, %v3441_v3 }
 0x3f9   :  { %v3455_v45 = vrot.slane %v3454_v56, 1  ;;  %v3467_v60 = vadd.f32 %v3465_v29, %v3443_v31 }
 0x3fb   :  { %v3456_v38 = vadd.f32 %v3455_v45, %v3454_v56 }
 0x3fd   :  { %v3468_v1 = vadd.f32 %v3465_v29, %v3456_v38 }
 0x3ff   :  { %v3472_v0 = vsel %vm3471_vm4, %v3468_v1, %v3467_v60 }
 0x400   :  { %3474 = vst [vmem:[#allocation5] sm:$0x3] %v3472_v0 }
 0x401   :  { %4149 = shalt.err (!%p4146_p4)
}
 0x402   :  { %s4150_s15 = scalar_lea.hbm %s6212_s7, 32 }
 0x403   :  { %p4151_p5 = scmp.ne.s32.totalorder %s6212_s7, %s4150_s15  ;;  %p4154_p6 = scmp.lt.u32.totalorder %s4150_s15, %s6212_s7 }
 0x405   :  { %p4156_p7 = pnand %p4154_p6, %p4151_p5 }
 0x407   :  { %4159 = shalt.err (!%p4156_p7)
}
 0x408   :  { %3484 = dma.vmem_to_hbm [thread:$0]  %s3482_s28, 32, %s6212_s7, [#allocation6]  }
 0x409   :  { %4160 = dma.done.wait [#allocation6], 32  }
 0x40a   :  { %4161 = vsyncadd [#allocation6], 4294967264 }
 0x40b   :  { %3488 = vsyncpa [#allocation6], 1 }

</bundles_post_ra>
